<compile_context>
chip_gen: v7x
topology: tpu7x:2x2x1
jax: 0.10.0
libtpu: 0.0.40
codegen_flags: <defaults>
</compile_context>

<pallas_src>
import functools

import jax
import jax.numpy as jnp
from jax.experimental import pallas as pl
from jax.experimental.pallas import tpu as pltpu


def _pool_fc_kernel(feat_ref, w_ref, b_ref, out_ref, *, hw):
    """Fused global-average-pool + linear classifier (single shot per tile).

    feat_ref : [tb, C, HW]   conv5 features for a batch tile (HW last)
    w_ref    : [C, NCp]      classifier weight, transposed + lane-padded
    b_ref    : [1, NCp]      classifier bias, lane-padded
    out_ref  : [tb, NCp]     padded logits
    """
    feat = feat_ref[...].astype(jnp.float32)            # [tb, C, HW]
    pooled_sum = jnp.sum(feat, axis=-1)                  # [tb, C]  (sum; /HW after dot)
    logits = jnp.dot(
        pooled_sum,
        w_ref[...].astype(jnp.float32),
        preferred_element_type=jnp.float32,
    )                                                    # [tb, NCp]
    inv_hw = jnp.float32(1.0 / hw)
    out_ref[...] = (logits * inv_hw + b_ref[...]).astype(out_ref.dtype)


def basenet_head_forward(conv5_nchw, weight, bias):
    """Pool + classifier head of BaseNet.

    conv5_nchw : [B, C, H, W] float32 feature map (C = 2048 for ResNet-50)
    weight     : [num_classes, C]  (PyTorch nn.Linear layout)
    bias       : [num_classes]
    returns    : {'logits': [ [B, num_classes] ]}
    """
    B, C, H, W = conv5_nchw.shape
    NC = weight.shape[0]
    HW = H * W

    # Lane-pad the (tiny) class dimension to a full 128-lane width so the
    # output store and the MXU N dimension are dense.
    NCp = pl.cdiv(NC, 128) * 128

    # Free layout: NCHW -> [B, C, HW]; reduction axis (HW) is trailing and
    # equals the full array dim, so the BlockSpec stays legal and DMA is
    # contiguous — no transpose pass over HBM.
    feat = conv5_nchw.reshape(B, C, HW)
    w_t = jnp.pad(jnp.transpose(weight, (1, 0)), ((0, 0), (0, NCp - NC)))  # [C, NCp]
    b_2d = jnp.pad(bias.reshape(1, NC), ((0, 0), (0, NCp - NC)))           # [1, NCp]

    # Batch tiling: purely "parallel" (megacore-shardable on v7x). For the
    # demo sizes it collapses to a single grid step.  tb=8 keeps the feature
    # block well under VMEM limits on all generations (incl. v7x's 64 MiB)
    # even at realistic HW=49.
    tb = 8 if (B % 8 == 0) else B
    grid = (B // tb,)

    kernel = functools.partial(_pool_fc_kernel, hw=HW)

    logits_padded = pl.pallas_call(
        kernel,
        out_shape=jax.ShapeDtypeStruct((B, NCp), jnp.float32),
        grid_spec=pltpu.PrefetchScalarGridSpec(
            num_scalar_prefetch=0,
            grid=grid,
            in_specs=[
                pl.BlockSpec((tb, C, HW), lambda i: (i, 0, 0)),
                pl.BlockSpec((C, NCp), lambda i: (0, 0)),
                pl.BlockSpec((1, NCp), lambda i: (0, 0)),
            ],
            out_specs=pl.BlockSpec((tb, NCp), lambda i: (i, 0)),
        ),
        compiler_params=pltpu.CompilerParams(
            dimension_semantics=("parallel",),
        ),
    )(feat, w_t, b_2d)

    logits = logits_padded[:, :NC]
    return {"logits": [logits]}


def _reference(conv5_nchw, weight, bias):
    pooled = jnp.mean(conv5_nchw, axis=(2, 3))          # [B, C]
    return pooled @ weight.T + bias[None, :]            # [B, NC]


if __name__ == "__main__":
    key = jax.random.PRNGKey(0)
    k_feat, k_w, k_b = jax.random.split(key, 3)

    B, C, H, W = 2, 2048, 4, 4       # small conv5 feature map (C fixed at 2048)
    NUM_CLASSES = 8

    conv5 = jax.random.normal(k_feat, (B, C, H, W), dtype=jnp.float32)

    # Deterministic nn.Linear-style init: U(-1/sqrt(C), 1/sqrt(C)).
    bound = 1.0 / (C ** 0.5)
    weight = jax.random.uniform(k_w, (NUM_CLASSES, C), jnp.float32, -bound, bound)
    bias = jax.random.uniform(k_b, (NUM_CLASSES,), jnp.float32, -bound, bound)

    outputs = basenet_head_forward(conv5, weight, bias)
    logits = outputs["logits"][0]
    jax.block_until_ready(logits)

    ref = _reference(conv5, weight, bias)
    assert logits.shape == (B, NUM_CLASSES)
    assert jnp.allclose(logits, ref, atol=1e-4, rtol=1e-4)

    print("KERNEL_OK")
</pallas_src>

<mosaic_0001>
module attributes {stable_mosaic.version = 11 : i64} {
  func.func @_pool_fc_kernel(%arg0: i32, %arg1: memref<2x2048x16xf32, #tpu.memory_space<vmem>>, %arg2: memref<2048x128xf32, #tpu.memory_space<vmem>>, %arg3: memref<1x128xf32, #tpu.memory_space<vmem>>, %arg4: memref<2x128xf32, #tpu.memory_space<vmem>>) attributes {dimension_semantics = [#tpu.dimension_semantics<parallel>], iteration_bounds = array<i64: 1>, scalar_prefetch = 0 : i64, scratch_operands = 0 : i64, tpu.core_type = #tpu.core_type<tc>, window_params = [{transform_indices = @transform_0, window_bounds = array<i64: 2, 2048, 16>}, {pipeline_mode = #tpu.pipeline_mode<synchronous>, transform_indices = @transform_1, window_bounds = array<i64: 2048, 128>}, {pipeline_mode = #tpu.pipeline_mode<synchronous>, transform_indices = @transform_2, window_bounds = array<i64: 1, 128>}, {transform_indices = @transform_3, window_bounds = array<i64: 2, 128>}]} {
    %c0 = arith.constant 0 : index
    %c0_0 = arith.constant 0 : index
    %c0_1 = arith.constant 0 : index
    %0 = vector.load %arg1[%c0, %c0_0, %c0_1] : memref<2x2048x16xf32, #tpu.memory_space<vmem>>, vector<2x2048x16xf32>
    %cst = arith.constant dense<0.000000e+00> : vector<2x2048xf32>
    %1 = vector.multi_reduction <add>, %0, %cst [2] : vector<2x2048x16xf32> to vector<2x2048xf32>
    %c0_2 = arith.constant 0 : index
    %c0_3 = arith.constant 0 : index
    %2 = vector.load %arg2[%c0_2, %c0_3] : memref<2048x128xf32, #tpu.memory_space<vmem>>, vector<2048x128xf32>
    %cst_4 = arith.constant dense<0.000000e+00> : vector<2x128xf32>
    %3 = tpu.matmul %1, %2, %cst_4 {dimension_numbers = #tpu.dot_dimension_numbers<[1], [0], [0], [1], [0, 0, 1, 1], [], []>} : vector<2x2048xf32>, vector<2048x128xf32>, vector<2x128xf32> -> vector<2x128xf32>
    %cst_5 = arith.constant 6.250000e-02 : f32
    %4 = vector.broadcast %cst_5 : f32 to vector<2x128xf32>
    %5 = arith.mulf %3, %4 : vector<2x128xf32>
    %c0_6 = arith.constant 0 : index
    %c0_7 = arith.constant 0 : index
    %6 = vector.load %arg3[%c0_6, %c0_7] : memref<1x128xf32, #tpu.memory_space<vmem>>, vector<1x128xf32>
    %7 = vector.broadcast %6 : vector<1x128xf32> to vector<2x128xf32>
    %8 = arith.addf %5, %7 : vector<2x128xf32>
    %c0_8 = arith.constant 0 : index
    %c0_9 = arith.constant 0 : index
    %9 = vector.load %arg4[%c0_8, %c0_9] : memref<2x128xf32, #tpu.memory_space<vmem>>, vector<2x128xf32>
    tpu.vector_store %arg4[%c0_8, %c0_9], %8 {strides = array<i32>} : memref<2x128xf32, #tpu.memory_space<vmem>>, vector<2x128xf32>,
    return
  }
  func.func @transform_0(%arg0: i32) -> (i32, i32, i32) {
    %c0_i32 = arith.constant 0 : i32
    %c0_i32_0 = arith.constant 0 : i32
    %c0_i32_1 = arith.constant 0 : i32
    return %arg0, %c0_i32, %c0_i32_0 : i32, i32, i32
  }
  func.func @transform_1(%arg0: i32) -> (i32, i32) {
    %c0_i32 = arith.constant 0 : i32
    %c0_i32_0 = arith.constant 0 : i32
    %c0_i32_1 = arith.constant 0 : i32
    return %c0_i32, %c0_i32_0 : i32, i32
  }
  func.func @transform_2(%arg0: i32) -> (i32, i32) {
    %c0_i32 = arith.constant 0 : i32
    %c0_i32_0 = arith.constant 0 : i32
    %c0_i32_1 = arith.constant 0 : i32
    return %c0_i32, %c0_i32_0 : i32, i32
  }
  func.func @transform_3(%arg0: i32) -> (i32, i32) {
    %c0_i32 = arith.constant 0 : i32
    %c0_i32_0 = arith.constant 0 : i32
    return %arg0, %c0_i32 : i32, i32
  }
}

</mosaic_0001>

<bundles_post_ra>
// kernel: tpu_custom_call.1
= control target key start
LH: loop header
LB: loop body
LE: loop exit
PB: predicated region body
PF: predicated region fallthrough
CT: control target
= control target key end

     0   :  { %vm527_vm0 = vcmask 130048   ;;  %s10937_s0 = inlined_call_operand.vmem [shape: f32[2,2048,16], index: 0, kind: input, shape index: {}]   ;;  %s10938_s1 = inlined_call_operand.vmem [shape: f32[2048,128], index: 1, kind: input, shape index: {}]   ;;  %s10939_s2 = inlined_call_operand.vmem [shape: f32[1,128], index: 2, kind: input, shape index: {}]   ;;  %s10940_s3 = inlined_call_operand.hbm [shape: f32[2,128], index: 3, kind: output, shape index: {}]  }
   0x1   :  { %v17_v0 = vld [vmem:[%s10937_s0 + $0x10] sm:$0xff]  ;;  %v15_v1 = vld [vmem:[%s10937_s0] sm:$0xff]  ;;  %v18_v2 = vld [vmem:[%s10937_s0 + $0x18] sm:$0xff] }
   0x2   :  { %v534_v3 = vsel %vm527_vm0, %v17_v0, 0.0  ;;  %v528_v4 = vsel %vm527_vm0, %v15_v1, 0.0  ;;  %v16_v5 = vld [vmem:[%s10937_s0 + $0x8] sm:$0xff]  ;;  %v537_v6 = vsel %vm527_vm0, %v18_v2, 0.0  ;;  %v19_v9 = vld [vmem:[%s10937_s0 + $0x20] sm:$0xff]  ;;  %v22_v12 = vld [vmem:[%s10937_s0 + $0x38] sm:$0xff] }
   0x3   :  { %535 = vadd.xlane.f32.xlu1 %v534_v3  ;;  %529 = vadd.xlane.f32.xlu0 %v528_v4  ;;  %v531_v7 = vsel %vm527_vm0, %v16_v5, 0.0  ;;  %v20_v8 = vld [vmem:[%s10937_s0 + $0x28] sm:$0xff]  ;;  %v540_v11 = vsel %vm527_vm0, %v19_v9, 0.0  ;;  %v21_v13 = vld [vmem:[%s10937_s0 + $0x30] sm:$0xff]  ;;  %v549_v14 = vsel %vm527_vm0, %v22_v12, 0.0  ;;  %v23_v17 = vld [vmem:[%s10937_s0 + $0x40] sm:$0xff] }
   0x4   :  { %v543_v10 = vsel %vm527_vm0, %v20_v8, 0.0  ;;  %v546_v15 = vsel %vm527_vm0, %v21_v13, 0.0  ;;  %v24_v16 = vld [vmem:[%s10937_s0 + $0x48] sm:$0xff]  ;;  %v552_v19 = vsel %vm527_vm0, %v23_v17, 0.0  ;;  %v26_v20 = vld [vmem:[%s10937_s0 + $0x58] sm:$0xff]  ;;  %v25_v21 = vld [vmem:[%s10937_s0 + $0x50] sm:$0xff] }
   0x5   :  { %v555_v18 = vsel %vm527_vm0, %v24_v16, 0.0  ;;  %v561_v22 = vsel %vm527_vm0, %v26_v20, 0.0  ;;  %v558_v23 = vsel %vm527_vm0, %v25_v21, 0.0  ;;  %v28_v24 = vld [vmem:[%s10937_s0 + $0x68] sm:$0xff]  ;;  %v27_v25 = vld [vmem:[%s10937_s0 + $0x60] sm:$0xff]  ;;  %v30_v28 = vld [vmem:[%s10937_s0 + $0x78] sm:$0xff] }
   0x6   :  { %v567_v26 = vsel %vm527_vm0, %v28_v24, 0.0  ;;  %v564_v27 = vsel %vm527_vm0, %v27_v25, 0.0  ;;  %v29_v29 = vld [vmem:[%s10937_s0 + $0x70] sm:$0xff]  ;;  %v573_v30 = vsel %vm527_vm0, %v30_v28, 0.0 }
   0x7   :  { %538 = vadd.xlane.f32.xlu1 %v537_v6  ;;  %532 = vadd.xlane.f32.xlu0 %v531_v7  ;;  %v570_v31 = vsel %vm527_vm0, %v29_v29, 0.0 }
   0xb   :  { %544 = vadd.xlane.f32.xlu1 %v543_v10  ;;  %541 = vadd.xlane.f32.xlu0 %v540_v11 }
   0xf   :  { %550 = vadd.xlane.f32.xlu1 %v549_v14  ;;  %547 = vadd.xlane.f32.xlu0 %v546_v15 }
  0x13   :  { %556 = vadd.xlane.f32.xlu1 %v555_v18  ;;  %553 = vadd.xlane.f32.xlu0 %v552_v19 }
  0x17   :  { %562 = vadd.xlane.f32.xlu1 %v561_v22  ;;  %559 = vadd.xlane.f32.xlu0 %v558_v23 }
  0x1b   :  { %568 = vadd.xlane.f32.xlu1 %v567_v26  ;;  %565 = vadd.xlane.f32.xlu0 %v564_v27 }
  0x1c   :  { %8 = vsyncpa [#allocation3], 0  ;;  %v32_v32 = vld [vmem:[%s10937_s0 + $0x88] sm:$0xff]  ;;  %v31_v33 = vld [vmem:[%s10937_s0 + $0x80] sm:$0xff]  ;;  %vm2843_vm1 = vcmask 130112   ;;  %vm2850_vm2 = vcmask 195712  }
  0x1d   :  { %v579_v34 = vsel %vm527_vm0, %v32_v32, 0.0  ;;  %v576_v35 = vsel %vm527_vm0, %v31_v33, 0.0  ;;  %v34_v36 = vld [vmem:[%s10937_s0 + $0x98] sm:$0xff]  ;;  %v33_v37 = vld [vmem:[%s10937_s0 + $0x90] sm:$0xff]  ;;  %v36_v40 = vld [vmem:[%s10937_s0 + $0xa8] sm:$0xff]  ;;  %vm2857_vm3 = vcmask 261312  }
  0x1e   :  { %v585_v38 = vsel %vm527_vm0, %v34_v36, 0.0  ;;  %v582_v39 = vsel %vm527_vm0, %v33_v37, 0.0  ;;  %v35_v41 = vld [vmem:[%s10937_s0 + $0xa0] sm:$0xff]  ;;  %v591_v42 = vsel %vm527_vm0, %v36_v40, 0.0  ;;  %v38_v44 = vld [vmem:[%s10937_s0 + $0xb8] sm:$0xff]  ;;  %v37_v45 = vld [vmem:[%s10937_s0 + $0xb0] sm:$0xff] }
  0x1f   :  { %574 = vadd.xlane.f32.xlu1 %v573_v30  ;;  %571 = vadd.xlane.f32.xlu0 %v570_v31  ;;  %v588_v43 = vsel %vm527_vm0, %v35_v41, 0.0  ;;  %v597_v46 = vsel %vm527_vm0, %v38_v44, 0.0  ;;  %v594_v47 = vsel %vm527_vm0, %v37_v45, 0.0  ;;  %v40_v48 = vld [vmem:[%s10937_s0 + $0xc8] sm:$0xff]  ;;  %v39_v49 = vld [vmem:[%s10937_s0 + $0xc0] sm:$0xff]  ;;  %v42_v52 = vld [vmem:[%s10937_s0 + $0xd8] sm:$0xff] }
  0x20   :  { %v603_v50 = vsel %vm527_vm0, %v40_v48, 0.0  ;;  %v600_v51 = vsel %vm527_vm0, %v39_v49, 0.0  ;;  %v41_v53 = vld [vmem:[%s10937_s0 + $0xd0] sm:$0xff]  ;;  %v609_v54 = vsel %vm527_vm0, %v42_v52, 0.0  ;;  %v44_v56 = vld [vmem:[%s10937_s0 + $0xe8] sm:$0xff]  ;;  %v43_v57 = vld [vmem:[%s10937_s0 + $0xe0] sm:$0xff] }
  0x21   :  { %v606_v55 = vsel %vm527_vm0, %v41_v53, 0.0  ;;  %v615_v58 = vsel %vm527_vm0, %v44_v56, 0.0  ;;  %v612_v59 = vsel %vm527_vm0, %v43_v57, 0.0  ;;  %v46_v60 = vld [vmem:[%s10937_s0 + $0xf8] sm:$0xff]  ;;  %v45_v61 = vld [vmem:[%s10937_s0 + $0xf0] sm:$0xff]  ;;  %v48_v0 = vld [vmem:[%s10937_s0 + $0x108] sm:$0xff] }
  0x22   :  { %v621_v62 = vsel %vm527_vm0, %v46_v60, 0.0  ;;  %v618_v63 = vsel %vm527_vm0, %v45_v61, 0.0  ;;  %v47_v1 = vld [vmem:[%s10937_s0 + $0x100] sm:$0xff]  ;;  %v627_v2 = vsel %vm527_vm0, %v48_v0, 0.0  ;;  %v50_v4 = vld [vmem:[%s10937_s0 + $0x118] sm:$0xff]  ;;  %v49_v5 = vld [vmem:[%s10937_s0 + $0x110] sm:$0xff] }
  0x23   :  { %580 = vadd.xlane.f32.xlu1 %v579_v34  ;;  %577 = vadd.xlane.f32.xlu0 %v576_v35  ;;  %v624_v3 = vsel %vm527_vm0, %v47_v1, 0.0  ;;  %v633_v6 = vsel %vm527_vm0, %v50_v4, 0.0  ;;  %v630_v7 = vsel %vm527_vm0, %v49_v5, 0.0  ;;  %v52_v8 = vld [vmem:[%s10937_s0 + $0x128] sm:$0xff]  ;;  %v51_v9 = vld [vmem:[%s10937_s0 + $0x120] sm:$0xff]  ;;  %v54_v12 = vld [vmem:[%s10937_s0 + $0x138] sm:$0xff] }
  0x24   :  { %v639_v10 = vsel %vm527_vm0, %v52_v8, 0.0  ;;  %v636_v11 = vsel %vm527_vm0, %v51_v9, 0.0  ;;  %v53_v13 = vld [vmem:[%s10937_s0 + $0x130] sm:$0xff]  ;;  %v645_v14 = vsel %vm527_vm0, %v54_v12, 0.0  ;;  %v56_v16 = vld [vmem:[%s10937_s0 + $0x148] sm:$0xff]  ;;  %v55_v17 = vld [vmem:[%s10937_s0 + $0x140] sm:$0xff] }
  0x25   :  { %v642_v15 = vsel %vm527_vm0, %v53_v13, 0.0  ;;  %v651_v18 = vsel %vm527_vm0, %v56_v16, 0.0  ;;  %v648_v19 = vsel %vm527_vm0, %v55_v17, 0.0  ;;  %v58_v20 = vld [vmem:[%s10937_s0 + $0x158] sm:$0xff]  ;;  %v57_v21 = vld [vmem:[%s10937_s0 + $0x150] sm:$0xff]  ;;  %v60_v24 = vld [vmem:[%s10937_s0 + $0x168] sm:$0xff] }
  0x26   :  { %v657_v22 = vsel %vm527_vm0, %v58_v20, 0.0  ;;  %v654_v23 = vsel %vm527_vm0, %v57_v21, 0.0  ;;  %v59_v25 = vld [vmem:[%s10937_s0 + $0x160] sm:$0xff]  ;;  %v663_v26 = vsel %vm527_vm0, %v60_v24, 0.0  ;;  %v62_v28 = vld [vmem:[%s10937_s0 + $0x178] sm:$0xff]  ;;  %v61_v29 = vld [vmem:[%s10937_s0 + $0x170] sm:$0xff] }
  0x27   :  { %586 = vadd.xlane.f32.xlu1 %v585_v38  ;;  %583 = vadd.xlane.f32.xlu0 %v582_v39  ;;  %v660_v27 = vsel %vm527_vm0, %v59_v25, 0.0  ;;  %v669_v30 = vsel %vm527_vm0, %v62_v28, 0.0  ;;  %v666_v31 = vsel %vm527_vm0, %v61_v29, 0.0  ;;  %v64_v32 = vld [vmem:[%s10937_s0 + $0x188] sm:$0xff]  ;;  %v63_v33 = vld [vmem:[%s10937_s0 + $0x180] sm:$0xff]  ;;  %v66_v36 = vld [vmem:[%s10937_s0 + $0x198] sm:$0xff] }
  0x28   :  { %v675_v34 = vsel %vm527_vm0, %v64_v32, 0.0  ;;  %v672_v35 = vsel %vm527_vm0, %v63_v33, 0.0  ;;  %v65_v37 = vld [vmem:[%s10937_s0 + $0x190] sm:$0xff]  ;;  %v681_v38 = vsel %vm527_vm0, %v66_v36, 0.0  ;;  %v68_v40 = vld [vmem:[%s10937_s0 + $0x1a8] sm:$0xff]  ;;  %v67_v41 = vld [vmem:[%s10937_s0 + $0x1a0] sm:$0xff] }
  0x29   :  { %v678_v39 = vsel %vm527_vm0, %v65_v37, 0.0  ;;  %v70_v44 = vld [vmem:[%s10937_s0 + $0x1b8] sm:$0xff]  ;;  %v69_v45 = vld [vmem:[%s10937_s0 + $0x1b0] sm:$0xff]  ;;  %v72_v48 = vld [vmem:[%s10937_s0 + $0x1c8] sm:$0xff]  ;;  %vm2864_vm4 = vcmask 326912   ;;  %vm2871_vm5 = vcmask 392512  }
  0x2a   :  { %v71_v49 = vld [vmem:[%s10937_s0 + $0x1c0] sm:$0xff]  ;;  %v74_v52 = vld [vmem:[%s10937_s0 + $0x1d8] sm:$0xff]  ;;  %v73_v53 = vld [vmem:[%s10937_s0 + $0x1d0] sm:$0xff]  ;;  %vm2878_vm6 = vcmask 458112   ;;  %vm2885_vm7 = vcmask 523712   ;;  %vm10942_vm8 = vcmask 589312  }
  0x2b   :  { %592 = vadd.xlane.f32.xlu1 %v591_v42  ;;  %589 = vadd.xlane.f32.xlu0 %v588_v43  ;;  %v687_v42 = vsel %vm527_vm0, %v68_v40, 0.0  ;;  %v684_v43 = vsel %vm527_vm0, %v67_v41, 0.0  ;;  %v76_v56 = vld [vmem:[%s10937_s0 + $0x1e8] sm:$0xff]  ;;  %v75_v57 = vld [vmem:[%s10937_s0 + $0x1e0] sm:$0xff]  ;;  %v78_v60 = vld [vmem:[%s10937_s0 + $0x1f8] sm:$0xff]  ;;  %vm2899_vm9 = vcmask 654912  }
  0x2c   :  { %v77_v61 = vld [vmem:[%s10937_s0 + $0x1f0] sm:$0xff]  ;;  %v80_v0 = vld [vmem:[%s10937_s0 + $0x208] sm:$0xff]  ;;  %v79_v1 = vld [vmem:[%s10937_s0 + $0x200] sm:$0xff]  ;;  %vm10943_vm10 = vcmask 720512   ;;  %vm2913_vm11 = vcmask 786112   ;;  %vm10941_vm12 = vcmask 851712  }
  0x2d   :  { %v82_v4 = vld [vmem:[%s10937_s0 + $0x218] sm:$0xff]  ;;  %v81_v5 = vld [vmem:[%s10937_s0 + $0x210] sm:$0xff]  ;;  %v84_v8 = vld [vmem:[%s10937_s0 + $0x228] sm:$0xff]  ;;  %vm2927_vm13 = vcmask 917312   ;;  %vm2934_vm14 = vcmask 982912   ;;  %vm2941_vm15 = vcmask 1048512  }
  0x2e   :  { %v83_v9 = vld [vmem:[%s10937_s0 + $0x220] sm:$0xff]  ;;  %v86_v13 = vld [vmem:[%s10937_s0 + $0x238] sm:$0xff]  ;;  %v89_v33 = vld [vmem:[%s10937_s0 + $0x250] sm:$0xff]  ;;  %s6571_s5 = smov [#allocation2]  }
  0x2f   :  { %598 = vadd.xlane.f32.xlu1 %v597_v46  ;;  %595 = vadd.xlane.f32.xlu0 %v594_v47  ;;  %v693_v46 = vsel %vm527_vm0, %v70_v44, 0.0  ;;  %v690_v47 = vsel %vm527_vm0, %v69_v45, 0.0  ;;  %v732_v12 = vsel %vm527_vm0, %v83_v9, 0.0  ;;  %v741_v16 = vsel %vm527_vm0, %v86_v13, 0.0  ;;  %v87_v20 = vld [vmem:[%s10937_s0 + $0x240] sm:$0xff]  ;;  %v90_v28 = vld [vmem:[%s10937_s0 + $0x258] sm:$0xff] }
  0x30   :  { %v753_v36 = vsel %vm527_vm0, %v90_v28, 0.0  ;;  %v92_v41 = vld [vmem:[%s10937_s0 + $0x268] sm:$0xff]  ;;  %v95_v9 = vld [vmem:[%s10937_s0 + $0x280] sm:$0xff]  ;;  %s6001_s6 = sshll.u32 %s6571_s5, 4  ;;  %s6002_s6 = int_to_ptr.vmem [resolvable:$true] %s6001_s6 }
  0x31   :  { %s6547_s7 = scalar_lea.vmem %s6002_s6, 32  ;;  %p6552_p1 = scmp.lt.s32.totalorder %s6002_s6, %s6002_s6 }
  0x32   :  { %p6548_p0 = scmp.ne.s32.totalorder %s6002_s6, %s6547_s7  ;;  %p6553_p2 = scmp.lt.s32.totalorder %s6547_s7, %s6547_s7 }
  0x33   :  { %604 = vadd.xlane.f32.xlu1 %v603_v50  ;;  %601 = vadd.xlane.f32.xlu0 %v600_v51  ;;  %v699_v50 = vsel %vm527_vm0, %v72_v48, 0.0  ;;  %v696_v51 = vsel %vm527_vm0, %v71_v49, 0.0 }
  0x34   :  { %p6554_p3 = por %p6553_p2, %p6552_p1 }
  0x36   :  { %p6555_p4 = pnand %p6554_p3, %p6548_p0 }
  0x37   :  { %610 = vadd.xlane.f32.xlu1 %v609_v54  ;;  %607 = vadd.xlane.f32.xlu0 %v606_v55  ;;  %v705_v54 = vsel %vm527_vm0, %v74_v52, 0.0  ;;  %v702_v55 = vsel %vm527_vm0, %v73_v53, 0.0 }
  0x3b   :  { %616 = vadd.xlane.f32.xlu1 %v615_v58  ;;  %613 = vadd.xlane.f32.xlu0 %v612_v59  ;;  %v711_v58 = vsel %vm527_vm0, %v76_v56, 0.0  ;;  %v708_v59 = vsel %vm527_vm0, %v75_v57, 0.0 }
  0x3f   :  { %622 = vadd.xlane.f32.xlu1 %v621_v62  ;;  %619 = vadd.xlane.f32.xlu0 %v618_v63  ;;  %v717_v62 = vsel %vm527_vm0, %v78_v60, 0.0  ;;  %v714_v63 = vsel %vm527_vm0, %v77_v61, 0.0 }
  0x43   :  { %628 = vadd.xlane.f32.xlu1 %v627_v2  ;;  %625 = vadd.xlane.f32.xlu0 %v624_v3  ;;  %v723_v2 = vsel %vm527_vm0, %v80_v0, 0.0  ;;  %v720_v3 = vsel %vm527_vm0, %v79_v1, 0.0 }
  0x47   :  { %634 = vadd.xlane.f32.xlu1 %v633_v6  ;;  %631 = vadd.xlane.f32.xlu0 %v630_v7  ;;  %v729_v6 = vsel %vm527_vm0, %v82_v4, 0.0  ;;  %v726_v7 = vsel %vm527_vm0, %v81_v5, 0.0 }
  0x4b   :  { %640 = vadd.xlane.f32.xlu1 %v639_v10  ;;  %637 = vadd.xlane.f32.xlu0 %v636_v11  ;;  %v2832_v10 = vlaneseq  ;;  %v735_v11 = vsel %vm527_vm0, %v84_v8, 0.0  ;;  %v96_v8 = vld [vmem:[%s10937_s0 + $0x288] sm:$0xff] }
  0x4f   :  { %646 = vadd.xlane.f32.xlu1 %v645_v14  ;;  %643 = vadd.xlane.f32.xlu0 %v642_v15  ;;  %v85_v14 = vld [vmem:[%s10937_s0 + $0x230] sm:$0xff]  ;;  %v6878_v15 = vand.u32 127, %v2832_v10 }
  0x50   :  { %v738_v17 = vsel %vm527_vm0, %v85_v14, 0.0 }
  0x51   :  { %v2852_v21 = vadd.s32 4294967272, %v6878_v15  ;;  %v2866_v29 = vadd.s32 4294967256, %v6878_v15  ;;  %v2873_v44 = vadd.s32 4294967248, %v6878_v15  ;;  %v2894_v60 = vadd.s32 4294967224, %v6878_v15 }
  0x52   :  { %v2887_v0 = vadd.s32 4294967232, %v6878_v15  ;;  %v2901_v14 = vadd.s32 4294967216, %v6878_v15 }
  0x53   :  { %652 = vadd.xlane.f32.xlu1 %v651_v18  ;;  %649 = vadd.xlane.f32.xlu0 %v648_v19  ;;  %v6882_v18 = vshrl.u32 %v2832_v10, 7  ;;  %v88_v19 = vld [vmem:[%s10937_s0 + $0x248] sm:$0xff]  ;;  %v2908_v10 = vadd.s32 4294967208, %v6878_v15 }
  0x55   :  { %v6919_v40 = vsub.s32 %v2866_v29, %v6882_v18  ;;  %v6944_v57 = vsub.s32 %v2873_v44, %v6882_v18  ;;  %v6974_v13 = vsub.s32 %v2887_v0, %v6882_v18  ;;  %v6994_v29 = vsub.s32 %v2901_v14, %v6882_v18 }
  0x57   :  { %658 = vadd.xlane.f32.xlu1 %v657_v22  ;;  %655 = vadd.xlane.f32.xlu0 %v654_v23  ;;  %v2838_v22 = vadd.s32 4294967288, %v6878_v15  ;;  %v2845_v23 = vadd.s32 4294967280, %v6878_v15 }
  0x59   :  { %v6907_v32 = vsub.s32 %v2838_v22, %v6882_v18 }
  0x5b   :  { %664 = vadd.xlane.f32.xlu1 %v663_v26  ;;  %661 = vadd.xlane.f32.xlu0 %v660_v27  ;;  %v747_v26 = vsel %vm527_vm0, %v88_v19, 0.0  ;;  %v744_v27 = vsel %vm527_vm0, %v87_v20, 0.0  ;;  %v768_v19 = vsel %vm527_vm0, %v95_v9, 0.0  ;;  %v103_v9 = vld [vmem:[%s10937_s0 + $0x2c0] sm:$0xff] }
  0x5f   :  { %670 = vadd.xlane.f32.xlu1 %v669_v30  ;;  %667 = vadd.xlane.f32.xlu0 %v666_v31  ;;  %v6901_v30 = vsub.s32 %v6878_v15, %v6882_v18  ;;  %v6904_v31 = vsub.s32 %v2852_v21, %v6882_v18 }
  0x61   :  { %10950 = vst [vmem:[#allocation5_spill] sm:$0xff] %v6904_v31 }
  0x63   :  { %676 = vadd.xlane.f32.xlu1 %v675_v34  ;;  %673 = vadd.xlane.f32.xlu0 %v672_v35  ;;  %v2859_v34 = vadd.s32 4294967264, %v6878_v15  ;;  %v6914_v35 = vsub.s32 %v2845_v23, %v6882_v18  ;;  %v6982_v23 = vsub.s32 %v2908_v10, %v6882_v18 }
  0x65   :  { %10951 = vst [vmem:[#allocation6_spill] sm:$0xff] %v6914_v35  ;;  %v6933_v48 = vsub.s32 %v2859_v34, %v6882_v18 }
  0x67   :  { %682 = vadd.xlane.f32.xlu1 %v681_v38  ;;  %679 = vadd.xlane.f32.xlu0 %v678_v39  ;;  %v750_v39 = vsel %vm527_vm0, %v89_v33, 0.0  ;;  %10952 = vst [vmem:[#allocation7_spill] sm:$0xff] %v6933_v48  ;;  %v2922_v33 = vadd.s32 4294967192, %v6878_v15 }
  0x6b   :  { %688 = vadd.xlane.f32.xlu1 %v687_v42  ;;  %685 = vadd.xlane.f32.xlu0 %v684_v43  ;;  %v91_v42 = vld [vmem:[%s10937_s0 + $0x260] sm:$0xff]  ;;  %v2880_v43 = vadd.s32 4294967240, %v6878_v15 }
  0x6c   :  { %v756_v52 = vsel %vm527_vm0, %v91_v42, 0.0 }
  0x6d   :  { %v6941_v56 = vsub.s32 %v2880_v43, %v6882_v18  ;;  %v2929_v43 = vadd.s32 4294967184, %v6878_v15 }
  0x6f   :  { %694 = vadd.xlane.f32.xlu1 %v693_v46  ;;  %691 = vadd.xlane.f32.xlu0 %v690_v47 }
  0x73   :  { %700 = vadd.xlane.f32.xlu1 %v699_v50  ;;  %697 = vadd.xlane.f32.xlu0 %v696_v51  ;;  %v759_v51 = vsel %vm527_vm0, %v92_v41, 0.0 }
  0x77   :  { %706 = vadd.xlane.f32.xlu1 %v705_v54  ;;  %703 = vadd.xlane.f32.xlu0 %v702_v55 }
  0x7b   :  { %712 = vadd.xlane.f32.xlu1 %v711_v58  ;;  %709 = vadd.xlane.f32.xlu0 %v708_v59  ;;  %v94_v58 = vld [vmem:[%s10937_s0 + $0x278] sm:$0xff]  ;;  %v93_v59 = vld [vmem:[%s10937_s0 + $0x270] sm:$0xff] }
  0x7f   :  { %718 = vadd.xlane.f32.xlu1 %v717_v62  ;;  %715 = vadd.xlane.f32.xlu0 %v714_v63 }
  0x83   :  { %724 = vadd.xlane.f32.xlu1 %v723_v2  ;;  %721 = vadd.xlane.f32.xlu0 %v720_v3  ;;  %v765_v2 = vsel %vm527_vm0, %v94_v58, 0.0  ;;  %v762_v3 = vsel %vm527_vm0, %v93_v59, 0.0  ;;  %v7022_v59 = vsub.s32 %v2929_v43, %v6882_v18 }
  0x87   :  { %730 = vadd.xlane.f32.xlu1 %v729_v6  ;;  %727 = vadd.xlane.f32.xlu0 %v726_v7  ;;  %v6962_v7 = vsub.s32 %v2894_v60, %v6882_v18 }
  0x8b   :  { %736 = vadd.xlane.f32.xlu1 %v735_v11  ;;  %733 = vadd.xlane.f32.xlu0 %v732_v12 }
  0x8f   :  { %742 = vadd.xlane.f32.xlu1 %v741_v16  ;;  %739 = vadd.xlane.f32.xlu0 %v738_v17  ;;  %v771_v17 = vsel %vm527_vm0, %v96_v8, 0.0  ;;  %v104_v8 = vld [vmem:[%s10937_s0 + $0x2c8] sm:$0xff] }
  0x90   :  { %v536_v24 = vpop.xlane.xlu1 %535  ;;  %v530_v25 = vpop.xlane.xlu0 %529  ;;  %v795_v14 = vsel %vm527_vm0, %v104_v8, 0.0 }
  0x91   :  { %v2837_v45 = vrot.slane %v530_v25, %v6901_v30  ;;  %v2849_v49 = vrot.slane %v536_v24, %v6914_v35  ;;  %v98_v24 = vld [vmem:[%s10937_s0 + $0x298] sm:$0xff]  ;;  %v97_v25 = vld [vmem:[%s10937_s0 + $0x290] sm:$0xff] }
  0x93   :  { %748 = vadd.xlane.f32.xlu1 %v747_v26  ;;  %745 = vadd.xlane.f32.xlu0 %v744_v27  ;;  %v2915_v26 = vadd.s32 4294967200, %v6878_v15 }
  0x94   :  { %v539_v37 = vpop.xlane.xlu1 %538  ;;  %v533_v38 = vpop.xlane.xlu0 %532 }
  0x95   :  { %v2856_v46 = vrot.slane %v539_v37, %v6904_v31  ;;  %v2842_v47 = vrot.slane %v533_v38, %v6907_v32  ;;  %v774_v37 = vsel %vm527_vm0, %v97_v25, 0.0  ;;  %v7002_v42 = vsub.s32 %v2915_v26, %v6882_v18 }
  0x97   :  { %v2844_v50 = vsel %vm2843_vm1, %v2842_v47, %v2837_v45  ;;  %754 = vadd.xlane.f32.xlu1 %v753_v36  ;;  %751 = vadd.xlane.f32.xlu0 %v750_v39  ;;  %v777_v36 = vsel %vm527_vm0, %v98_v24, 0.0  ;;  %v100_v47 = vld [vmem:[%s10937_s0 + $0x2a8] sm:$0xff] }
  0x98   :  { %v2851_v53 = vsel %vm2850_vm2, %v2849_v49, %v2844_v50  ;;  %v545_v54 = vpop.xlane.xlu1 %544  ;;  %v542_v55 = vpop.xlane.xlu0 %541  ;;  %v99_v49 = vld [vmem:[%s10937_s0 + $0x2a0] sm:$0xff]  ;;  %v2936_v50 = vadd.s32 4294967176, %v6878_v15 }
  0x99   :  { %v2870_v61 = vrot.slane %v545_v54, %v6919_v40  ;;  %v2858_v62 = vsel %vm2857_vm3, %v2856_v46, %v2851_v53  ;;  %v2863_v63 = vrot.slane %v542_v55, %v6933_v48  ;;  %v7008_v46 = vsub.s32 %v2922_v33, %v6882_v18 }
  0x9a   :  { %v783_v55 = vsel %vm527_vm0, %v100_v47, 0.0  ;;  %v780_v58 = vsel %vm527_vm0, %v99_v49, 0.0 }
  0x9b   :  { %v2865_v1 = vsel %vm2864_vm4, %v2863_v63, %v2858_v62  ;;  %760 = vadd.xlane.f32.xlu1 %v759_v51  ;;  %757 = vadd.xlane.f32.xlu0 %v756_v52  ;;  %v102_v62 = vld [vmem:[%s10937_s0 + $0x2b8] sm:$0xff]  ;;  %v101_v63 = vld [vmem:[%s10937_s0 + $0x2b0] sm:$0xff] }
  0x9c   :  { %v551_v4 = vpop.xlane.xlu1 %550  ;;  %v2872_v5 = vsel %vm2871_vm5, %v2870_v61, %v2865_v1  ;;  %v548_v6 = vpop.xlane.xlu0 %547  ;;  %v7027_v61 = vsub.s32 %v2936_v50, %v6882_v18  ;;  %v786_v18 = vsel %vm527_vm0, %v101_v63, 0.0  ;;  %v110_v50 = vld [vmem:[%s10937_s0 + $0x2f8] sm:$0xff]  ;;  %v112_v63 = vld [vmem:[%s10937_s0 + $0x308] sm:$0xff] }
  0x9d   :  { %v2884_v11 = vrot.slane %v551_v4, %v6941_v56  ;;  %v2877_v12 = vrot.slane %v548_v6, %v6944_v57 }
  0x9f   :  { %v2879_v16 = vsel %vm2878_vm6, %v2877_v12, %v2872_v5  ;;  %766 = vadd.xlane.f32.xlu1 %v765_v2  ;;  %763 = vadd.xlane.f32.xlu0 %v762_v3  ;;  %v789_v3 = vsel %vm527_vm0, %v102_v62, 0.0 }
  0xa0   :  { %v557_v20 = vpop.xlane.xlu1 %556  ;;  %v2886_v21 = vsel %vm2885_vm7, %v2884_v11, %v2879_v16  ;;  %v554_v22 = vpop.xlane.xlu0 %553  ;;  %v792_v16 = vsel %vm527_vm0, %v103_v9, 0.0  ;;  %v114_v9 = vld [vmem:[%s10937_s0 + $0x318] sm:$0xff] }
  0xa1   :  { %v2898_v27 = vrot.slane %v557_v20, %v6962_v7  ;;  %v2891_v28 = vrot.slane %v554_v22, %v6974_v13  ;;  %v105_v22 = vld [vmem:[%s10937_s0 + $0x2d0] sm:$0xff] }
  0xa3   :  { %v2893_v34 = vsel %vm10942_vm8, %v2891_v28, %v2886_v21  ;;  %772 = vadd.xlane.f32.xlu1 %v771_v17  ;;  %769 = vadd.xlane.f32.xlu0 %v768_v19  ;;  %v106_v21 = vld [vmem:[%s10937_s0 + $0x2d8] sm:$0xff]  ;;  %v798_v28 = vsel %vm527_vm0, %v105_v22, 0.0 }
  0xa4   :  { %v563_v38 = vpop.xlane.xlu1 %562  ;;  %v2900_v39 = vsel %vm2899_vm9, %v2898_v27, %v2893_v34  ;;  %v560_v41 = vpop.xlane.xlu0 %559  ;;  %v801_v27 = vsel %vm527_vm0, %v106_v21, 0.0 }
  0xa5   :  { %v2912_v44 = vrot.slane %v563_v38, %v6982_v23  ;;  %v2905_v45 = vrot.slane %v560_v41, %v6994_v29 }
  0xa7   :  { %v2907_v51 = vsel %vm10943_vm10, %v2905_v45, %v2900_v39  ;;  %778 = vadd.xlane.f32.xlu1 %v777_v36  ;;  %775 = vadd.xlane.f32.xlu0 %v774_v37  ;;  %v108_v36 = vld [vmem:[%s10937_s0 + $0x2e8] sm:$0xff]  ;;  %v107_v37 = vld [vmem:[%s10937_s0 + $0x2e0] sm:$0xff] }
  0xa8   :  { %v569_v52 = vpop.xlane.xlu1 %568  ;;  %v2914_v53 = vsel %vm2913_vm11, %v2912_v44, %v2907_v51  ;;  %v566_v54 = vpop.xlane.xlu0 %565  ;;  %v807_v44 = vsel %vm527_vm0, %v108_v36, 0.0  ;;  %v804_v45 = vsel %vm527_vm0, %v107_v37, 0.0  ;;  %v109_v51 = vld [vmem:[%s10937_s0 + $0x2f0] sm:$0xff] }
  0xa9   :  { %v2926_v60 = vrot.slane %v569_v52, %v7008_v46  ;;  %v2919_v15 = vrot.slane %v566_v54, %v7002_v42 }
  0xab   :  { %v2921_v0 = vsel %vm10941_vm12, %v2919_v15, %v2914_v53  ;;  %784 = vadd.xlane.f32.xlu1 %v783_v55  ;;  %781 = vadd.xlane.f32.xlu0 %v780_v58  ;;  %v813_v58 = vsel %vm527_vm0, %v110_v50, 0.0 }
  0xac   :  { %v575_v1 = vpop.xlane.xlu1 %574  ;;  %v572_v2 = vpop.xlane.xlu0 %571  ;;  %v2928_v4 = vsel %vm2927_vm13, %v2926_v60, %v2921_v0  ;;  %v810_v60 = vsel %vm527_vm0, %v109_v51, 0.0  ;;  %v111_v0 = vld [vmem:[%s10937_s0 + $0x300] sm:$0xff] }
  0xad   :  { %v2940_v5 = vrot.slane %v575_v1, %v7027_v61  ;;  %v2933_v6 = vrot.slane %v572_v2, %v7022_v59 }
  0xaf   :  { %790 = vadd.xlane.f32.xlu1 %v789_v3  ;;  %787 = vadd.xlane.f32.xlu0 %v786_v18  ;;  %v2935_v10 = vsel %vm2934_vm14, %v2933_v6, %v2928_v4  ;;  %v819_v4 = vsel %vm527_vm0, %v112_v63, 0.0 }
  0xb0   :  { %v581_v11 = vpop.xlane.xlu1 %580  ;;  %v578_v12 = vpop.xlane.xlu0 %577  ;;  %v7051_v17 = vsel %vm2941_vm15, %v2940_v5, %v2935_v10  ;;  %v816_v5 = vsel %vm527_vm0, %v111_v0, 0.0  ;;  %v113_v10 = vld [vmem:[%s10937_s0 + $0x310] sm:$0xff] }
  0xb1   :  { %v2950_v19 = vrot.slane %v581_v11, %v6907_v32  ;;  %v2946_v20 = vrot.slane %v578_v12, %v6901_v30 }
  0xb3   :  { %v2951_v24 = vsel %vm2843_vm1, %v2950_v19, %v2946_v20  ;;  %796 = vadd.xlane.f32.xlu1 %v795_v14  ;;  %793 = vadd.xlane.f32.xlu0 %v792_v16  ;;  %v825_v19 = vsel %vm527_vm0, %v114_v9, 0.0  ;;  %v822_v20 = vsel %vm527_vm0, %v113_v10, 0.0 }
  0xb4   :  { %v587_v25 = vpop.xlane.xlu1 %586  ;;  %v584_v26 = vpop.xlane.xlu0 %583 }
  0xb5   :  { %v2960_v33 = vrot.slane %v587_v25, %v6904_v31  ;;  %v2955_v34 = vrot.slane %v584_v26, %v6914_v35  ;;  %v115_v25 = vld [vmem:[%s10937_s0 + $0x320] sm:$0xff] }
  0xb6   :  { %v828_v36 = vsel %vm527_vm0, %v115_v25, 0.0 }
  0xb7   :  { %v2956_v38 = vsel %vm2850_vm2, %v2955_v34, %v2951_v24  ;;  %802 = vadd.xlane.f32.xlu1 %v801_v27  ;;  %799 = vadd.xlane.f32.xlu0 %v798_v28  ;;  %v116_v24 = vld [vmem:[%s10937_s0 + $0x328] sm:$0xff] }
  0xb8   :  { %v593_v39 = vpop.xlane.xlu1 %592  ;;  %v2961_v41 = vsel %vm2857_vm3, %v2960_v33, %v2956_v38  ;;  %v590_v43 = vpop.xlane.xlu0 %589  ;;  %v831_v34 = vsel %vm527_vm0, %v116_v24, 0.0 }
  0xb9   :  { %v2970_v47 = vrot.slane %v593_v39, %v6919_v40  ;;  %v2965_v49 = vrot.slane %v590_v43, %v6933_v48  ;;  %v118_v39 = vld [vmem:[%s10937_s0 + $0x338] sm:$0xff] }
  0xbb   :  { %v2966_v52 = vsel %vm2864_vm4, %v2965_v49, %v2961_v41  ;;  %808 = vadd.xlane.f32.xlu1 %v807_v44  ;;  %805 = vadd.xlane.f32.xlu0 %v804_v45  ;;  %v117_v41 = vld [vmem:[%s10937_s0 + $0x330] sm:$0xff] }
  0xbc   :  { %v599_v53 = vpop.xlane.xlu1 %598  ;;  %v2971_v54 = vsel %vm2871_vm5, %v2970_v47, %v2966_v52  ;;  %v596_v55 = vpop.xlane.xlu0 %595  ;;  %v837_v47 = vsel %vm527_vm0, %v118_v39, 0.0  ;;  %v834_v49 = vsel %vm527_vm0, %v117_v41, 0.0 }
  0xbd   :  { %v2980_v15 = vrot.slane %v599_v53, %v6941_v56  ;;  %v2975_v62 = vrot.slane %v596_v55, %v6944_v57  ;;  %v120_v53 = vld [vmem:[%s10937_s0 + $0x348] sm:$0xff] }
  0xbf   :  { %v2976_v1 = vsel %vm2878_vm6, %v2975_v62, %v2971_v54  ;;  %814 = vadd.xlane.f32.xlu1 %v813_v58  ;;  %811 = vadd.xlane.f32.xlu0 %v810_v60  ;;  %v119_v54 = vld [vmem:[%s10937_s0 + $0x340] sm:$0xff] }
  0xc0   :  { %v605_v2 = vpop.xlane.xlu1 %604  ;;  %v2981_v3 = vsel %vm2885_vm7, %v2980_v15, %v2976_v1  ;;  %v602_v18 = vpop.xlane.xlu0 %601  ;;  %v843_v15 = vsel %vm527_vm0, %v120_v53, 0.0  ;;  %v840_v62 = vsel %vm527_vm0, %v119_v54, 0.0 }
  0xc1   :  { %v2990_v6 = vrot.slane %v605_v2, %v6962_v7  ;;  %v2985_v8 = vrot.slane %v602_v18, %v6974_v13  ;;  %v122_v2 = vld [vmem:[%s10937_s0 + $0x358] sm:$0xff] }
  0xc3   :  { %v2986_v11 = vsel %vm10942_vm8, %v2985_v8, %v2981_v3  ;;  %820 = vadd.xlane.f32.xlu1 %v819_v4  ;;  %817 = vadd.xlane.f32.xlu0 %v816_v5  ;;  %v121_v3 = vld [vmem:[%s10937_s0 + $0x350] sm:$0xff] }
  0xc4   :  { %v611_v12 = vpop.xlane.xlu1 %610  ;;  %v2991_v14 = vsel %vm2899_vm9, %v2990_v6, %v2986_v11  ;;  %v608_v16 = vpop.xlane.xlu0 %607  ;;  %v849_v6 = vsel %vm527_vm0, %v122_v2, 0.0  ;;  %v846_v8 = vsel %vm527_vm0, %v121_v3, 0.0  ;;  %v124_v11 = vld [vmem:[%s10937_s0 + $0x368] sm:$0xff] }
  0xc5   :  { %v3000_v21 = vrot.slane %v611_v12, %v6982_v23  ;;  %v2995_v22 = vrot.slane %v608_v16, %v6994_v29  ;;  %v123_v12 = vld [vmem:[%s10937_s0 + $0x360] sm:$0xff] }
  0xc7   :  { %v2996_v26 = vsel %vm10943_vm10, %v2995_v22, %v2991_v14  ;;  %826 = vadd.xlane.f32.xlu1 %v825_v19  ;;  %823 = vadd.xlane.f32.xlu0 %v822_v20  ;;  %v852_v22 = vsel %vm527_vm0, %v123_v12, 0.0 }
  0xc8   :  { %v617_v27 = vpop.xlane.xlu1 %616  ;;  %v3001_v28 = vsel %vm2913_vm11, %v3000_v21, %v2996_v26  ;;  %v614_v33 = vpop.xlane.xlu0 %613  ;;  %v855_v21 = vsel %vm527_vm0, %v124_v11, 0.0  ;;  %v126_v26 = vld [vmem:[%s10937_s0 + $0x378] sm:$0xff] }
  0xc9   :  { %v3010_v37 = vrot.slane %v617_v27, %v7008_v46  ;;  %v3005_v38 = vrot.slane %v614_v33, %v7002_v42  ;;  %v125_v27 = vld [vmem:[%s10937_s0 + $0x370] sm:$0xff] }
  0xcb   :  { %v3006_v43 = vsel %vm10941_vm12, %v3005_v38, %v3001_v28  ;;  %832 = vadd.xlane.f32.xlu1 %v831_v34  ;;  %829 = vadd.xlane.f32.xlu0 %v828_v36  ;;  %v858_v38 = vsel %vm527_vm0, %v125_v27, 0.0 }
  0xcc   :  { %v623_v44 = vpop.xlane.xlu1 %622  ;;  %v620_v45 = vpop.xlane.xlu0 %619  ;;  %v3011_v50 = vsel %vm2927_vm13, %v3010_v37, %v3006_v43  ;;  %v861_v37 = vsel %vm527_vm0, %v126_v26, 0.0  ;;  %v128_v43 = vld [vmem:[%s10937_s0 + $0x388] sm:$0xff] }
  0xcd   :  { %v3020_v51 = vrot.slane %v623_v44, %v7027_v61  ;;  %v3015_v52 = vrot.slane %v620_v45, %v7022_v59  ;;  %v127_v44 = vld [vmem:[%s10937_s0 + $0x380] sm:$0xff] }
  0xcf   :  { %838 = vadd.xlane.f32.xlu1 %v837_v47  ;;  %835 = vadd.xlane.f32.xlu0 %v834_v49  ;;  %v3016_v55 = vsel %vm2934_vm14, %v3015_v52, %v3011_v50  ;;  %v864_v52 = vsel %vm527_vm0, %v127_v44, 0.0 }
  0xd0   :  { %v629_v58 = vpop.xlane.xlu1 %628  ;;  %v626_v60 = vpop.xlane.xlu0 %625  ;;  %v7148_v63 = vsel %vm2941_vm15, %v3020_v51, %v3016_v55  ;;  %v867_v51 = vsel %vm527_vm0, %v128_v43, 0.0  ;;  %v130_v55 = vld [vmem:[%s10937_s0 + $0x398] sm:$0xff] }
  0xd1   :  { %v3029_v0 = vrot.slane %v629_v58, %v6907_v32  ;;  %v3025_v1 = vrot.slane %v626_v60, %v6901_v30  ;;  %v129_v58 = vld [vmem:[%s10937_s0 + $0x390] sm:$0xff] }
  0xd2   :  { %v870_v2 = vsel %vm527_vm0, %v129_v58, 0.0 }
  0xd3   :  { %v3030_v18 = vsel %vm2843_vm1, %v3029_v0, %v3025_v1  ;;  %844 = vadd.xlane.f32.xlu1 %v843_v15  ;;  %841 = vadd.xlane.f32.xlu0 %v840_v62  ;;  %v873_v1 = vsel %vm527_vm0, %v130_v55, 0.0 }
  0xd4   :  { %v635_v4 = vpop.xlane.xlu1 %634  ;;  %v632_v5 = vpop.xlane.xlu0 %631 }
  0xd5   :  { %v3039_v9 = vrot.slane %v635_v4, %v6904_v31  ;;  %v3034_v10 = vrot.slane %v632_v5, %v6914_v35  ;;  %v132_v4 = vld [vmem:[%s10937_s0 + $0x3a8] sm:$0xff]  ;;  %v131_v5 = vld [vmem:[%s10937_s0 + $0x3a0] sm:$0xff] }
  0xd6   :  { %v879_v11 = vsel %vm527_vm0, %v132_v4, 0.0  ;;  %v876_v12 = vsel %vm527_vm0, %v131_v5, 0.0 }
  0xd7   :  { %v3035_v14 = vsel %vm2850_vm2, %v3034_v10, %v3030_v18  ;;  %850 = vadd.xlane.f32.xlu1 %v849_v6  ;;  %847 = vadd.xlane.f32.xlu0 %v846_v8 }
  0xd8   :  { %v641_v16 = vpop.xlane.xlu1 %640  ;;  %v3040_v19 = vsel %vm2857_vm3, %v3039_v9, %v3035_v14  ;;  %v638_v20 = vpop.xlane.xlu0 %637 }
  0xd9   :  { %v3049_v24 = vrot.slane %v641_v16, %v6919_v40  ;;  %v3044_v25 = vrot.slane %v638_v20, %v6933_v48  ;;  %v133_v20 = vld [vmem:[%s10937_s0 + $0x3b0] sm:$0xff] }
  0xda   :  { %v882_v26 = vsel %vm527_vm0, %v133_v20, 0.0 }
  0xdb   :  { %v3045_v28 = vsel %vm2864_vm4, %v3044_v25, %v3040_v19  ;;  %856 = vadd.xlane.f32.xlu1 %v855_v21  ;;  %853 = vadd.xlane.f32.xlu0 %v852_v22  ;;  %v134_v19 = vld [vmem:[%s10937_s0 + $0x3b8] sm:$0xff] }
  0xdc   :  { %v647_v33 = vpop.xlane.xlu1 %646  ;;  %v3050_v34 = vsel %vm2871_vm5, %v3049_v24, %v3045_v28  ;;  %v644_v36 = vpop.xlane.xlu0 %643  ;;  %v885_v25 = vsel %vm527_vm0, %v134_v19, 0.0 }
  0xdd   :  { %v3059_v39 = vrot.slane %v647_v33, %v6941_v56  ;;  %v3054_v41 = vrot.slane %v644_v36, %v6944_v57  ;;  %v135_v36 = vld [vmem:[%s10937_s0 + $0x3c0] sm:$0xff] }
  0xde   :  { %v888_v43 = vsel %vm527_vm0, %v135_v36, 0.0 }
  0xdf   :  { %v3055_v45 = vsel %vm2878_vm6, %v3054_v41, %v3050_v34  ;;  %862 = vadd.xlane.f32.xlu1 %v861_v37  ;;  %859 = vadd.xlane.f32.xlu0 %v858_v38  ;;  %v136_v34 = vld [vmem:[%s10937_s0 + $0x3c8] sm:$0xff] }
  0xe0   :  { %v653_v47 = vpop.xlane.xlu1 %652  ;;  %v3060_v49 = vsel %vm2885_vm7, %v3059_v39, %v3055_v45  ;;  %v650_v50 = vpop.xlane.xlu0 %649  ;;  %v891_v41 = vsel %vm527_vm0, %v136_v34, 0.0 }
  0xe1   :  { %v3069_v53 = vrot.slane %v653_v47, %v6962_v7  ;;  %v3064_v54 = vrot.slane %v650_v50, %v6974_v13  ;;  %v137_v50 = vld [vmem:[%s10937_s0 + $0x3d0] sm:$0xff] }
  0xe2   :  { %v894_v55 = vsel %vm527_vm0, %v137_v50, 0.0 }
  0xe3   :  { %v3065_v60 = vsel %vm10942_vm8, %v3064_v54, %v3060_v49  ;;  %868 = vadd.xlane.f32.xlu1 %v867_v51  ;;  %865 = vadd.xlane.f32.xlu0 %v864_v52  ;;  %v138_v49 = vld [vmem:[%s10937_s0 + $0x3d8] sm:$0xff] }
  0xe4   :  { %v659_v15 = vpop.xlane.xlu1 %658  ;;  %v3070_v62 = vsel %vm2899_vm9, %v3069_v53, %v3065_v60  ;;  %v656_v0 = vpop.xlane.xlu0 %655  ;;  %v897_v54 = vsel %vm527_vm0, %v138_v49, 0.0 }
  0xe5   :  { %v3079_v3 = vrot.slane %v659_v15, %v6982_v23  ;;  %v3074_v18 = vrot.slane %v656_v0, %v6994_v29  ;;  %v140_v15 = vld [vmem:[%s10937_s0 + $0x3e8] sm:$0xff] }
  0xe7   :  { %v3075_v6 = vsel %vm10943_vm10, %v3074_v18, %v3070_v62  ;;  %874 = vadd.xlane.f32.xlu1 %v873_v1  ;;  %871 = vadd.xlane.f32.xlu0 %v870_v2  ;;  %v139_v62 = vld [vmem:[%s10937_s0 + $0x3e0] sm:$0xff]  ;;  %v903_v18 = vsel %vm527_vm0, %v140_v15, 0.0 }
  0xe8   :  { %v665_v8 = vpop.xlane.xlu1 %664  ;;  %v3080_v9 = vsel %vm2913_vm11, %v3079_v3, %v3075_v6  ;;  %v662_v10 = vpop.xlane.xlu0 %661  ;;  %v900_v4 = vsel %vm527_vm0, %v139_v62, 0.0 }
  0xe9   :  { %v3089_v14 = vrot.slane %v665_v8, %v7008_v46  ;;  %v3084_v16 = vrot.slane %v662_v10, %v7002_v42  ;;  %v142_v8 = vld [vmem:[%s10937_s0 + $0x3f8] sm:$0xff] }
  0xeb   :  { %v3085_v21 = vsel %vm10941_vm12, %v3084_v16, %v3080_v9  ;;  %880 = vadd.xlane.f32.xlu1 %v879_v11  ;;  %877 = vadd.xlane.f32.xlu0 %v876_v12  ;;  %v141_v9 = vld [vmem:[%s10937_s0 + $0x3f0] sm:$0xff]  ;;  %v909_v16 = vsel %vm527_vm0, %v142_v8, 0.0 }
  0xec   :  { %v671_v22 = vpop.xlane.xlu1 %670  ;;  %v668_v24 = vpop.xlane.xlu0 %667  ;;  %v3090_v27 = vsel %vm2927_vm13, %v3089_v14, %v3085_v21  ;;  %v906_v19 = vsel %vm527_vm0, %v141_v9, 0.0 }
  0xed   :  { %v3099_v28 = vrot.slane %v671_v22, %v7027_v61  ;;  %v3094_v33 = vrot.slane %v668_v24, %v7022_v59  ;;  %v144_v22 = vld [vmem:[%s10937_s0 + $0x408] sm:$0xff]  ;;  %v143_v24 = vld [vmem:[%s10937_s0 + $0x400] sm:$0xff] }
  0xee   :  { %v912_v34 = vsel %vm527_vm0, %v143_v24, 0.0 }
  0xef   :  { %886 = vadd.xlane.f32.xlu1 %v885_v25  ;;  %883 = vadd.xlane.f32.xlu0 %v882_v26  ;;  %v3095_v37 = vsel %vm2934_vm14, %v3094_v33, %v3090_v27  ;;  %v915_v33 = vsel %vm527_vm0, %v144_v22, 0.0 }
  0xf0   :  { %v677_v38 = vpop.xlane.xlu1 %676  ;;  %v674_v39 = vpop.xlane.xlu0 %673  ;;  %v7245_v44 = vsel %vm2941_vm15, %v3099_v28, %v3095_v37 }
  0xf1   :  { %v3108_v45 = vrot.slane %v677_v38, %v6907_v32  ;;  %v3104_v47 = vrot.slane %v674_v39, %v6901_v30  ;;  %v146_v38 = vld [vmem:[%s10937_s0 + $0x418] sm:$0xff]  ;;  %v145_v39 = vld [vmem:[%s10937_s0 + $0x410] sm:$0xff] }
  0xf2   :  { %v921_v49 = vsel %vm527_vm0, %v146_v38, 0.0  ;;  %v918_v50 = vsel %vm527_vm0, %v145_v39, 0.0 }
  0xf3   :  { %v3109_v51 = vsel %vm2843_vm1, %v3108_v45, %v3104_v47  ;;  %892 = vadd.xlane.f32.xlu1 %v891_v41  ;;  %889 = vadd.xlane.f32.xlu0 %v888_v43 }
  0xf4   :  { %v683_v52 = vpop.xlane.xlu1 %682  ;;  %v680_v53 = vpop.xlane.xlu0 %679 }
  0xf5   :  { %v3118_v58 = vrot.slane %v683_v52, %v6904_v31  ;;  %v3113_v60 = vrot.slane %v680_v53, %v6914_v35  ;;  %v148_v53 = vld [vmem:[%s10937_s0 + $0x428] sm:$0xff] }
  0xf6   :  { %v927_v62 = vsel %vm527_vm0, %v148_v53, 0.0 }
  0xf7   :  { %v3114_v0 = vsel %vm2850_vm2, %v3113_v60, %v3109_v51  ;;  %898 = vadd.xlane.f32.xlu1 %v897_v54  ;;  %895 = vadd.xlane.f32.xlu0 %v894_v55  ;;  %v147_v54 = vld [vmem:[%s10937_s0 + $0x420] sm:$0xff] }
  0xf8   :  { %v689_v1 = vpop.xlane.xlu1 %688  ;;  %v3119_v2 = vsel %vm2857_vm3, %v3118_v58, %v3114_v0  ;;  %v686_v3 = vpop.xlane.xlu0 %685  ;;  %v924_v0 = vsel %vm527_vm0, %v147_v54, 0.0 }
  0xf9   :  { %v3128_v5 = vrot.slane %v689_v1, %v6919_v40  ;;  %v3123_v6 = vrot.slane %v686_v3, %v6933_v48  ;;  %v150_v3 = vld [vmem:[%s10937_s0 + $0x438] sm:$0xff] }
  0xfa   :  { %v933_v8 = vsel %vm527_vm0, %v150_v3, 0.0 }
  0xfb   :  { %v3124_v10 = vsel %vm2864_vm4, %v3123_v6, %v3119_v2  ;;  %904 = vadd.xlane.f32.xlu1 %v903_v18  ;;  %901 = vadd.xlane.f32.xlu0 %v900_v4  ;;  %v149_v18 = vld [vmem:[%s10937_s0 + $0x430] sm:$0xff] }
  0xfc   :  { %v695_v11 = vpop.xlane.xlu1 %694  ;;  %v3129_v12 = vsel %vm2871_vm5, %v3128_v5, %v3124_v10  ;;  %v692_v14 = vpop.xlane.xlu0 %691  ;;  %v930_v9 = vsel %vm527_vm0, %v149_v18, 0.0 }
  0xfd   :  { %v3138_v20 = vrot.slane %v695_v11, %v6941_v56  ;;  %v3133_v21 = vrot.slane %v692_v14, %v6944_v57  ;;  %v152_v14 = vld [vmem:[%s10937_s0 + $0x448] sm:$0xff] }
  0xfe   :  { %v939_v22 = vsel %vm527_vm0, %v152_v14, 0.0 }
  0xff   :  { %v3134_v25 = vsel %vm2878_vm6, %v3133_v21, %v3129_v12  ;;  %910 = vadd.xlane.f32.xlu1 %v909_v16  ;;  %907 = vadd.xlane.f32.xlu0 %v906_v19  ;;  %v151_v16 = vld [vmem:[%s10937_s0 + $0x440] sm:$0xff] }
 0x100   :  { %v701_v26 = vpop.xlane.xlu1 %700  ;;  %v3139_v27 = vsel %vm2885_vm7, %v3138_v20, %v3134_v25  ;;  %v698_v28 = vpop.xlane.xlu0 %697  ;;  %v936_v24 = vsel %vm527_vm0, %v151_v16, 0.0 }
 0x101   :  { %v3148_v36 = vrot.slane %v701_v26, %v6962_v7  ;;  %v3143_v37 = vrot.slane %v698_v28, %v6974_v13  ;;  %v154_v28 = vld [vmem:[%s10937_s0 + $0x458] sm:$0xff] }
 0x102   :  { %v945_v38 = vsel %vm527_vm0, %v154_v28, 0.0 }
 0x103   :  { %v3144_v41 = vsel %vm10942_vm8, %v3143_v37, %v3139_v27  ;;  %916 = vadd.xlane.f32.xlu1 %v915_v33  ;;  %913 = vadd.xlane.f32.xlu0 %v912_v34  ;;  %v153_v33 = vld [vmem:[%s10937_s0 + $0x450] sm:$0xff] }
 0x104   :  { %v707_v43 = vpop.xlane.xlu1 %706  ;;  %v3149_v45 = vsel %vm2899_vm9, %v3148_v36, %v3144_v41  ;;  %v704_v47 = vpop.xlane.xlu0 %703  ;;  %v942_v39 = vsel %vm527_vm0, %v153_v33, 0.0 }
 0x105   :  { %v3158_v51 = vrot.slane %v707_v43, %v6982_v23  ;;  %v3153_v52 = vrot.slane %v704_v47, %v6994_v29  ;;  %v155_v47 = vld [vmem:[%s10937_s0 + $0x460] sm:$0xff] }
 0x106   :  { %v948_v54 = vsel %vm527_vm0, %v155_v47, 0.0 }
 0x107   :  { %v3154_v55 = vsel %vm10943_vm10, %v3153_v52, %v3149_v45  ;;  %922 = vadd.xlane.f32.xlu1 %v921_v49  ;;  %919 = vadd.xlane.f32.xlu0 %v918_v50  ;;  %v156_v45 = vld [vmem:[%s10937_s0 + $0x468] sm:$0xff] }
 0x108   :  { %v713_v58 = vpop.xlane.xlu1 %712  ;;  %v3159_v60 = vsel %vm2913_vm11, %v3158_v51, %v3154_v55  ;;  %v710_v15 = vpop.xlane.xlu0 %709  ;;  %v951_v53 = vsel %vm527_vm0, %v156_v45, 0.0 }
 0x109   :  { %v3168_v1 = vrot.slane %v713_v58, %v7008_v46  ;;  %v3163_v2 = vrot.slane %v710_v15, %v7002_v42  ;;  %v157_v15 = vld [vmem:[%s10937_s0 + $0x470] sm:$0xff] }
 0x10a   :  { %v954_v18 = vsel %vm527_vm0, %v157_v15, 0.0 }
 0x10b   :  { %v3164_v4 = vsel %vm10941_vm12, %v3163_v2, %v3159_v60  ;;  %928 = vadd.xlane.f32.xlu1 %v927_v62  ;;  %925 = vadd.xlane.f32.xlu0 %v924_v0  ;;  %v158_v60 = vld [vmem:[%s10937_s0 + $0x478] sm:$0xff] }
 0x10c   :  { %v719_v5 = vpop.xlane.xlu1 %718  ;;  %v716_v6 = vpop.xlane.xlu0 %715  ;;  %v3169_v10 = vsel %vm2927_vm13, %v3168_v1, %v3164_v4  ;;  %v957_v3 = vsel %vm527_vm0, %v158_v60, 0.0 }
 0x10d   :  { %v3178_v11 = vrot.slane %v719_v5, %v7027_v61  ;;  %v3173_v12 = vrot.slane %v716_v6, %v7022_v59  ;;  %v160_v6 = vld [vmem:[%s10937_s0 + $0x488] sm:$0xff] }
 0x10e   :  { %v963_v14 = vsel %vm527_vm0, %v160_v6, 0.0 }
 0x10f   :  { %934 = vadd.xlane.f32.xlu1 %v933_v8  ;;  %931 = vadd.xlane.f32.xlu0 %v930_v9  ;;  %v3174_v19 = vsel %vm2934_vm14, %v3173_v12, %v3169_v10  ;;  %v159_v8 = vld [vmem:[%s10937_s0 + $0x480] sm:$0xff] }
 0x110   :  { %v725_v20 = vpop.xlane.xlu1 %724  ;;  %v722_v21 = vpop.xlane.xlu0 %721  ;;  %v7342_v25 = vsel %vm2941_vm15, %v3178_v11, %v3174_v19  ;;  %v960_v16 = vsel %vm527_vm0, %v159_v8, 0.0 }
 0x111   :  { %v3187_v26 = vrot.slane %v725_v20, %v6907_v32  ;;  %v3183_v27 = vrot.slane %v722_v21, %v6901_v30  ;;  %v162_v21 = vld [vmem:[%s10937_s0 + $0x498] sm:$0xff] }
 0x112   :  { %v969_v33 = vsel %vm527_vm0, %v162_v21, 0.0 }
 0x113   :  { %v3188_v34 = vsel %vm2843_vm1, %v3187_v26, %v3183_v27  ;;  %940 = vadd.xlane.f32.xlu1 %v939_v22  ;;  %937 = vadd.xlane.f32.xlu0 %v936_v24  ;;  %v161_v22 = vld [vmem:[%s10937_s0 + $0x490] sm:$0xff] }
 0x114   :  { %v731_v36 = vpop.xlane.xlu1 %730  ;;  %v728_v37 = vpop.xlane.xlu0 %727 }
 0x115   :  { %v3197_v41 = vrot.slane %v731_v36, %v6904_v31  ;;  %v3192_v43 = vrot.slane %v728_v37, %v6914_v35 }
 0x117   :  { %v3193_v49 = vsel %vm2850_vm2, %v3192_v43, %v3188_v34  ;;  %946 = vadd.xlane.f32.xlu1 %v945_v38  ;;  %943 = vadd.xlane.f32.xlu0 %v942_v39  ;;  %v966_v34 = vsel %vm527_vm0, %v161_v22, 0.0  ;;  %v164_v38 = vld [vmem:[%s10937_s0 + $0x4a8] sm:$0xff]  ;;  %v163_v39 = vld [vmem:[%s10937_s0 + $0x4a0] sm:$0xff] }
 0x118   :  { %v737_v50 = vpop.xlane.xlu1 %736  ;;  %v3198_v51 = vsel %vm2857_vm3, %v3197_v41, %v3193_v49  ;;  %v734_v52 = vpop.xlane.xlu0 %733  ;;  %v975_v49 = vsel %vm527_vm0, %v164_v38, 0.0 }
 0x119   :  { %v3207_v55 = vrot.slane %v737_v50, %v6919_v40  ;;  %v3202_v58 = vrot.slane %v734_v52, %v6933_v48  ;;  %v972_v50 = vsel %vm527_vm0, %v163_v39, 0.0 }
 0x11b   :  { %v3203_v62 = vsel %vm2864_vm4, %v3202_v58, %v3198_v51  ;;  %952 = vadd.xlane.f32.xlu1 %v951_v53  ;;  %949 = vadd.xlane.f32.xlu0 %v948_v54  ;;  %v166_v53 = vld [vmem:[%s10937_s0 + $0x4b8] sm:$0xff]  ;;  %v165_v54 = vld [vmem:[%s10937_s0 + $0x4b0] sm:$0xff] }
 0x11c   :  { %v743_v0 = vpop.xlane.xlu1 %742  ;;  %v3208_v1 = vsel %vm2871_vm5, %v3207_v55, %v3203_v62  ;;  %v740_v2 = vpop.xlane.xlu0 %739  ;;  %v981_v62 = vsel %vm527_vm0, %v166_v53, 0.0 }
 0x11d   :  { %v3217_v4 = vrot.slane %v743_v0, %v6941_v56  ;;  %v3212_v5 = vrot.slane %v740_v2, %v6944_v57  ;;  %v978_v0 = vsel %vm527_vm0, %v165_v54, 0.0 }
 0x11f   :  { %v3213_v9 = vsel %vm2878_vm6, %v3212_v5, %v3208_v1  ;;  %958 = vadd.xlane.f32.xlu1 %v957_v3  ;;  %955 = vadd.xlane.f32.xlu0 %v954_v18  ;;  %v168_v3 = vld [vmem:[%s10937_s0 + $0x4c8] sm:$0xff]  ;;  %v167_v18 = vld [vmem:[%s10937_s0 + $0x4c0] sm:$0xff] }
 0x120   :  { %v749_v10 = vpop.xlane.xlu1 %748  ;;  %v3218_v11 = vsel %vm2885_vm7, %v3217_v4, %v3213_v9  ;;  %v746_v12 = vpop.xlane.xlu0 %745  ;;  %v987_v8 = vsel %vm527_vm0, %v168_v3, 0.0  ;;  %v984_v9 = vsel %vm527_vm0, %v167_v18, 0.0 }
 0x121   :  { %v3227_v19 = vrot.slane %v749_v10, %v6962_v7  ;;  %v3222_v20 = vrot.slane %v746_v12, %v6974_v13 }
 0x123   :  { %v3223_v24 = vsel %vm10942_vm8, %v3222_v20, %v3218_v11  ;;  %964 = vadd.xlane.f32.xlu1 %v963_v14  ;;  %961 = vadd.xlane.f32.xlu0 %v960_v16  ;;  %v170_v14 = vld [vmem:[%s10937_s0 + $0x4d8] sm:$0xff]  ;;  %v169_v16 = vld [vmem:[%s10937_s0 + $0x4d0] sm:$0xff] }
 0x124   :  { %v755_v26 = vpop.xlane.xlu1 %754  ;;  %v3228_v27 = vsel %vm2899_vm9, %v3227_v19, %v3223_v24  ;;  %v752_v28 = vpop.xlane.xlu0 %751  ;;  %v993_v22 = vsel %vm527_vm0, %v170_v14, 0.0  ;;  %v990_v24 = vsel %vm527_vm0, %v169_v16, 0.0 }
 0x125   :  { %v3237_v36 = vrot.slane %v755_v26, %v6982_v23  ;;  %v3232_v37 = vrot.slane %v752_v28, %v6994_v29  ;;  %v172_v28 = vld [vmem:[%s10937_s0 + $0x4e8] sm:$0xff] }
 0x126   :  { %v999_v39 = vsel %vm527_vm0, %v172_v28, 0.0 }
 0x127   :  { %v3233_v41 = vsel %vm10943_vm10, %v3232_v37, %v3228_v27  ;;  %970 = vadd.xlane.f32.xlu1 %v969_v33  ;;  %967 = vadd.xlane.f32.xlu0 %v966_v34  ;;  %v171_v33 = vld [vmem:[%s10937_s0 + $0x4e0] sm:$0xff] }
 0x128   :  { %v761_v43 = vpop.xlane.xlu1 %760  ;;  %v3238_v45 = vsel %vm2913_vm11, %v3237_v36, %v3233_v41  ;;  %v758_v47 = vpop.xlane.xlu0 %757  ;;  %v996_v41 = vsel %vm527_vm0, %v171_v33, 0.0 }
 0x129   :  { %v3247_v51 = vrot.slane %v761_v43, %v7008_v46  ;;  %v3242_v52 = vrot.slane %v758_v47, %v7002_v42  ;;  %v174_v47 = vld [vmem:[%s10937_s0 + $0x4f8] sm:$0xff] }
 0x12a   :  { %v1005_v54 = vsel %vm527_vm0, %v174_v47, 0.0 }
 0x12b   :  { %v3243_v55 = vsel %vm10941_vm12, %v3242_v52, %v3238_v45  ;;  %976 = vadd.xlane.f32.xlu1 %v975_v49  ;;  %973 = vadd.xlane.f32.xlu0 %v972_v50  ;;  %v173_v49 = vld [vmem:[%s10937_s0 + $0x4f0] sm:$0xff] }
 0x12c   :  { %v767_v58 = vpop.xlane.xlu1 %766  ;;  %v3248_v60 = vsel %vm2927_vm13, %v3247_v51, %v3243_v55  ;;  %v764_v15 = vpop.xlane.xlu0 %763  ;;  %v1002_v55 = vsel %vm527_vm0, %v173_v49, 0.0 }
 0x12d   :  { %v3257_v1 = vrot.slane %v767_v58, %v7027_v61  ;;  %v3252_v2 = vrot.slane %v764_v15, %v7022_v59  ;;  %v176_v15 = vld [vmem:[%s10937_s0 + $0x508] sm:$0xff] }
 0x12e   :  { %v1011_v18 = vsel %vm527_vm0, %v176_v15, 0.0 }
 0x12f   :  { %v3253_v4 = vsel %vm2934_vm14, %v3252_v2, %v3248_v60  ;;  %982 = vadd.xlane.f32.xlu1 %v981_v62  ;;  %979 = vadd.xlane.f32.xlu0 %v978_v0  ;;  %v175_v62 = vld [vmem:[%s10937_s0 + $0x500] sm:$0xff] }
 0x130   :  { %v773_v5 = vpop.xlane.xlu1 %772  ;;  %v770_v6 = vpop.xlane.xlu0 %769  ;;  %v7439_v10 = vsel %vm2941_vm15, %v3257_v1, %v3253_v4  ;;  %v1008_v4 = vsel %vm527_vm0, %v175_v62, 0.0 }
 0x131   :  { %v3266_v11 = vrot.slane %v773_v5, %v6907_v32  ;;  %v3262_v12 = vrot.slane %v770_v6, %v6901_v30 }
 0x133   :  { %v3267_v19 = vsel %vm2843_vm1, %v3266_v11, %v3262_v12  ;;  %988 = vadd.xlane.f32.xlu1 %v987_v8  ;;  %985 = vadd.xlane.f32.xlu0 %v984_v9  ;;  %v178_v8 = vld [vmem:[%s10937_s0 + $0x518] sm:$0xff]  ;;  %v177_v9 = vld [vmem:[%s10937_s0 + $0x510] sm:$0xff] }
 0x134   :  { %v779_v20 = vpop.xlane.xlu1 %778  ;;  %v776_v21 = vpop.xlane.xlu0 %775 }
 0x135   :  { %v3276_v26 = vrot.slane %v779_v20, %v6904_v31  ;;  %v3271_v27 = vrot.slane %v776_v21, %v6914_v35  ;;  %v1014_v20 = vsel %vm527_vm0, %v177_v9, 0.0 }
 0x137   :  { %v3272_v34 = vsel %vm2850_vm2, %v3271_v27, %v3267_v19  ;;  %994 = vadd.xlane.f32.xlu1 %v993_v22  ;;  %991 = vadd.xlane.f32.xlu0 %v990_v24  ;;  %v1017_v19 = vsel %vm527_vm0, %v178_v8, 0.0  ;;  %v180_v24 = vld [vmem:[%s10937_s0 + $0x528] sm:$0xff] }
 0x138   :  { %v785_v36 = vpop.xlane.xlu1 %784  ;;  %v3277_v37 = vsel %vm2857_vm3, %v3276_v26, %v3272_v34  ;;  %v782_v38 = vpop.xlane.xlu0 %781  ;;  %v179_v26 = vld [vmem:[%s10937_s0 + $0x520] sm:$0xff] }
 0x139   :  { %v3286_v43 = vrot.slane %v785_v36, %v6919_v40  ;;  %v3281_v45 = vrot.slane %v782_v38, %v6933_v48  ;;  %v1023_v36 = vsel %vm527_vm0, %v180_v24, 0.0 }
 0x13b   :  { %v3282_v50 = vsel %vm2864_vm4, %v3281_v45, %v3277_v37  ;;  %1000 = vadd.xlane.f32.xlu1 %v999_v39  ;;  %997 = vadd.xlane.f32.xlu0 %v996_v41  ;;  %v1020_v37 = vsel %vm527_vm0, %v179_v26, 0.0  ;;  %v182_v41 = vld [vmem:[%s10937_s0 + $0x538] sm:$0xff] }
 0x13c   :  { %v791_v51 = vpop.xlane.xlu1 %790  ;;  %v3287_v52 = vsel %vm2871_vm5, %v3286_v43, %v3282_v50  ;;  %v788_v53 = vpop.xlane.xlu0 %787  ;;  %v181_v43 = vld [vmem:[%s10937_s0 + $0x530] sm:$0xff]  ;;  %v1029_v50 = vsel %vm527_vm0, %v182_v41, 0.0 }
 0x13d   :  { %v3296_v58 = vrot.slane %v791_v51, %v6941_v56  ;;  %v3291_v60 = vrot.slane %v788_v53, %v6944_v57  ;;  %v1026_v51 = vsel %vm527_vm0, %v181_v43, 0.0 }
 0x13f   :  { %v3292_v0 = vsel %vm2878_vm6, %v3291_v60, %v3287_v52  ;;  %1006 = vadd.xlane.f32.xlu1 %v1005_v54  ;;  %1003 = vadd.xlane.f32.xlu0 %v1002_v55  ;;  %v184_v55 = vld [vmem:[%s10937_s0 + $0x548] sm:$0xff] }
 0x140   :  { %v797_v1 = vpop.xlane.xlu1 %796  ;;  %v3297_v2 = vsel %vm2885_vm7, %v3296_v58, %v3292_v0  ;;  %v794_v3 = vpop.xlane.xlu0 %793  ;;  %v183_v58 = vld [vmem:[%s10937_s0 + $0x540] sm:$0xff]  ;;  %v1035_v0 = vsel %vm527_vm0, %v184_v55, 0.0 }
 0x141   :  { %v3306_v5 = vrot.slane %v797_v1, %v6962_v7  ;;  %v3301_v6 = vrot.slane %v794_v3, %v6974_v13  ;;  %v1032_v1 = vsel %vm527_vm0, %v183_v58, 0.0 }
 0x143   :  { %v3302_v11 = vsel %vm10942_vm8, %v3301_v6, %v3297_v2  ;;  %1012 = vadd.xlane.f32.xlu1 %v1011_v18  ;;  %1009 = vadd.xlane.f32.xlu0 %v1008_v4  ;;  %v186_v4 = vld [vmem:[%s10937_s0 + $0x558] sm:$0xff] }
 0x144   :  { %v803_v12 = vpop.xlane.xlu1 %802  ;;  %v3307_v14 = vsel %vm2899_vm9, %v3306_v5, %v3302_v11  ;;  %v800_v16 = vpop.xlane.xlu0 %799  ;;  %v185_v5 = vld [vmem:[%s10937_s0 + $0x550] sm:$0xff]  ;;  %v1041_v11 = vsel %vm527_vm0, %v186_v4, 0.0 }
 0x145   :  { %v3316_v21 = vrot.slane %v803_v12, %v6982_v23  ;;  %v3311_v22 = vrot.slane %v800_v16, %v6994_v29  ;;  %v1038_v12 = vsel %vm527_vm0, %v185_v5, 0.0 }
 0x147   :  { %v3312_v27 = vsel %vm10943_vm10, %v3311_v22, %v3307_v14  ;;  %1018 = vadd.xlane.f32.xlu1 %v1017_v19  ;;  %1015 = vadd.xlane.f32.xlu0 %v1014_v20  ;;  %v188_v19 = vld [vmem:[%s10937_s0 + $0x568] sm:$0xff]  ;;  %v187_v20 = vld [vmem:[%s10937_s0 + $0x560] sm:$0xff] }
 0x148   :  { %v809_v28 = vpop.xlane.xlu1 %808  ;;  %v3317_v33 = vsel %vm2913_vm11, %v3316_v21, %v3312_v27  ;;  %v806_v34 = vpop.xlane.xlu0 %805  ;;  %v1047_v27 = vsel %vm527_vm0, %v188_v19, 0.0 }
 0x149   :  { %v3326_v38 = vrot.slane %v809_v28, %v7008_v46  ;;  %v3321_v39 = vrot.slane %v806_v34, %v7002_v42  ;;  %v1044_v28 = vsel %vm527_vm0, %v187_v20, 0.0 }
 0x14b   :  { %v3322_v45 = vsel %vm10941_vm12, %v3321_v39, %v3317_v33  ;;  %1024 = vadd.xlane.f32.xlu1 %v1023_v36  ;;  %1021 = vadd.xlane.f32.xlu0 %v1020_v37  ;;  %v190_v36 = vld [vmem:[%s10937_s0 + $0x578] sm:$0xff]  ;;  %v189_v37 = vld [vmem:[%s10937_s0 + $0x570] sm:$0xff] }
 0x14c   :  { %v815_v47 = vpop.xlane.xlu1 %814  ;;  %v812_v49 = vpop.xlane.xlu0 %811  ;;  %v3327_v52 = vsel %vm2927_vm13, %v3326_v38, %v3322_v45  ;;  %v1053_v45 = vsel %vm527_vm0, %v190_v36, 0.0 }
 0x14d   :  { %v3336_v53 = vrot.slane %v815_v47, %v7027_v61  ;;  %v3331_v54 = vrot.slane %v812_v49, %v7022_v59  ;;  %v1050_v47 = vsel %vm527_vm0, %v189_v37, 0.0 }
 0x14f   :  { %1030 = vadd.xlane.f32.xlu1 %v1029_v50  ;;  %1027 = vadd.xlane.f32.xlu0 %v1026_v51  ;;  %v3332_v60 = vsel %vm2934_vm14, %v3331_v54, %v3327_v52  ;;  %v192_v51 = vld [vmem:[%s10937_s0 + $0x588] sm:$0xff]  ;;  %v191_v52 = vld [vmem:[%s10937_s0 + $0x580] sm:$0xff] }
 0x150   :  { %v821_v15 = vpop.xlane.xlu1 %820  ;;  %v818_v62 = vpop.xlane.xlu0 %817  ;;  %v7536_v2 = vsel %vm2941_vm15, %v3336_v53, %v3332_v60  ;;  %v1059_v60 = vsel %vm527_vm0, %v192_v51, 0.0 }
 0x151   :  { %v3345_v3 = vrot.slane %v821_v15, %v6907_v32  ;;  %v3341_v18 = vrot.slane %v818_v62, %v6901_v30  ;;  %v1056_v15 = vsel %vm527_vm0, %v191_v52, 0.0 }
 0x153   :  { %v3346_v6 = vsel %vm2843_vm1, %v3345_v3, %v3341_v18  ;;  %1036 = vadd.xlane.f32.xlu1 %v1035_v0  ;;  %1033 = vadd.xlane.f32.xlu0 %v1032_v1  ;;  %v194_v1 = vld [vmem:[%s10937_s0 + $0x598] sm:$0xff]  ;;  %v193_v3 = vld [vmem:[%s10937_s0 + $0x590] sm:$0xff] }
 0x154   :  { %v827_v8 = vpop.xlane.xlu1 %826  ;;  %v824_v9 = vpop.xlane.xlu0 %823 }
 0x155   :  { %v3355_v14 = vrot.slane %v827_v8, %v6904_v31  ;;  %v3350_v16 = vrot.slane %v824_v9, %v6914_v35  ;;  %v1065_v8 = vsel %vm527_vm0, %v194_v1, 0.0  ;;  %v1062_v9 = vsel %vm527_vm0, %v193_v3, 0.0 }
 0x157   :  { %v3351_v21 = vsel %vm2850_vm2, %v3350_v16, %v3346_v6  ;;  %1042 = vadd.xlane.f32.xlu1 %v1041_v11  ;;  %1039 = vadd.xlane.f32.xlu0 %v1038_v12  ;;  %v195_v16 = vld [vmem:[%s10937_s0 + $0x5a0] sm:$0xff] }
 0x158   :  { %v833_v22 = vpop.xlane.xlu1 %832  ;;  %v3356_v24 = vsel %vm2857_vm3, %v3355_v14, %v3351_v21  ;;  %v830_v26 = vpop.xlane.xlu0 %829  ;;  %v196_v14 = vld [vmem:[%s10937_s0 + $0x5a8] sm:$0xff] }
 0x159   :  { %v3365_v33 = vrot.slane %v833_v22, %v6919_v40  ;;  %v3360_v34 = vrot.slane %v830_v26, %v6933_v48  ;;  %v1068_v26 = vsel %vm527_vm0, %v195_v16, 0.0 }
 0x15b   :  { %v3361_v38 = vsel %vm2864_vm4, %v3360_v34, %v3356_v24  ;;  %1048 = vadd.xlane.f32.xlu1 %v1047_v27  ;;  %1045 = vadd.xlane.f32.xlu0 %v1044_v28  ;;  %v1071_v24 = vsel %vm527_vm0, %v196_v14, 0.0  ;;  %v197_v34 = vld [vmem:[%s10937_s0 + $0x5b0] sm:$0xff] }
 0x15c   :  { %v839_v39 = vpop.xlane.xlu1 %838  ;;  %v3366_v41 = vsel %vm2871_vm5, %v3365_v33, %v3361_v38  ;;  %v836_v43 = vpop.xlane.xlu0 %835  ;;  %v198_v33 = vld [vmem:[%s10937_s0 + $0x5b8] sm:$0xff] }
 0x15d   :  { %v3375_v49 = vrot.slane %v839_v39, %v6941_v56  ;;  %v3370_v50 = vrot.slane %v836_v43, %v6944_v57  ;;  %v1074_v43 = vsel %vm527_vm0, %v197_v34, 0.0 }
 0x15f   :  { %v3371_v53 = vsel %vm2878_vm6, %v3370_v50, %v3366_v41  ;;  %1054 = vadd.xlane.f32.xlu1 %v1053_v45  ;;  %1051 = vadd.xlane.f32.xlu0 %v1050_v47  ;;  %v1077_v41 = vsel %vm527_vm0, %v198_v33, 0.0  ;;  %v199_v50 = vld [vmem:[%s10937_s0 + $0x5c0] sm:$0xff] }
 0x160   :  { %v845_v54 = vpop.xlane.xlu1 %844  ;;  %v3376_v55 = vsel %vm2885_vm7, %v3375_v49, %v3371_v53  ;;  %v842_v58 = vpop.xlane.xlu0 %841  ;;  %v200_v49 = vld [vmem:[%s10937_s0 + $0x5c8] sm:$0xff] }
 0x161   :  { %v3385_v62 = vrot.slane %v845_v54, %v6962_v7  ;;  %v3380_v0 = vrot.slane %v842_v58, %v6974_v13  ;;  %v1083_v54 = vsel %vm527_vm0, %v200_v49, 0.0 }
 0x163   :  { %v3381_v18 = vsel %vm10942_vm8, %v3380_v0, %v3376_v55  ;;  %1060 = vadd.xlane.f32.xlu1 %v1059_v60  ;;  %1057 = vadd.xlane.f32.xlu0 %v1056_v15  ;;  %v1080_v55 = vsel %vm527_vm0, %v199_v50, 0.0  ;;  %v201_v0 = vld [vmem:[%s10937_s0 + $0x5d0] sm:$0xff] }
 0x164   :  { %v851_v4 = vpop.xlane.xlu1 %850  ;;  %v3386_v5 = vsel %vm2899_vm9, %v3385_v62, %v3381_v18  ;;  %v848_v6 = vpop.xlane.xlu0 %847  ;;  %v202_v62 = vld [vmem:[%s10937_s0 + $0x5d8] sm:$0xff] }
 0x165   :  { %v3395_v11 = vrot.slane %v851_v4, %v6982_v23  ;;  %v3390_v12 = vrot.slane %v848_v6, %v6994_v29  ;;  %v1089_v4 = vsel %vm527_vm0, %v202_v62, 0.0 }
 0x167   :  { %v3391_v19 = vsel %vm10943_vm10, %v3390_v12, %v3386_v5  ;;  %1066 = vadd.xlane.f32.xlu1 %v1065_v8  ;;  %1063 = vadd.xlane.f32.xlu0 %v1062_v9  ;;  %v1086_v5 = vsel %vm527_vm0, %v201_v0, 0.0  ;;  %v204_v9 = vld [vmem:[%s10937_s0 + $0x5e8] sm:$0xff] }
 0x168   :  { %v857_v20 = vpop.xlane.xlu1 %856  ;;  %v3396_v21 = vsel %vm2913_vm11, %v3395_v11, %v3391_v19  ;;  %v854_v22 = vpop.xlane.xlu0 %853  ;;  %v203_v11 = vld [vmem:[%s10937_s0 + $0x5e0] sm:$0xff] }
 0x169   :  { %v3405_v27 = vrot.slane %v857_v20, %v7008_v46  ;;  %v3400_v28 = vrot.slane %v854_v22, %v7002_v42  ;;  %v1095_v20 = vsel %vm527_vm0, %v204_v9, 0.0  ;;  %v211_v9 = vld [vmem:[%s10937_s0 + $0x620] sm:$0xff] }
 0x16b   :  { %v3401_v36 = vsel %vm10941_vm12, %v3400_v28, %v3396_v21  ;;  %1072 = vadd.xlane.f32.xlu1 %v1071_v24  ;;  %1069 = vadd.xlane.f32.xlu0 %v1068_v26  ;;  %v1092_v21 = vsel %vm527_vm0, %v203_v11, 0.0  ;;  %v206_v26 = vld [vmem:[%s10937_s0 + $0x5f8] sm:$0xff] }
 0x16c   :  { %v863_v37 = vpop.xlane.xlu1 %862  ;;  %v3406_v38 = vsel %vm2927_vm13, %v3405_v27, %v3401_v36  ;;  %v860_v39 = vpop.xlane.xlu0 %859  ;;  %v205_v27 = vld [vmem:[%s10937_s0 + $0x5f0] sm:$0xff] }
 0x16d   :  { %v3415_v45 = vrot.slane %v863_v37, %v7027_v61  ;;  %v3410_v47 = vrot.slane %v860_v39, %v7022_v59  ;;  %v1101_v37 = vsel %vm527_vm0, %v206_v26, 0.0  ;;  %v213_v26 = vld [vmem:[%s10937_s0 + $0x630] sm:$0xff] }
 0x16f   :  { %v3411_v51 = vsel %vm2934_vm14, %v3410_v47, %v3406_v38  ;;  %1078 = vadd.xlane.f32.xlu1 %v1077_v41  ;;  %1075 = vadd.xlane.f32.xlu0 %v1074_v43  ;;  %v1098_v38 = vsel %vm527_vm0, %v205_v27, 0.0  ;;  %v208_v43 = vld [vmem:[%s10937_s0 + $0x608] sm:$0xff] }
 0x170   :  { %v869_v52 = vpop.xlane.xlu1 %868  ;;  %v866_v53 = vpop.xlane.xlu0 %865  ;;  %v7633_v58 = vsel %vm2941_vm15, %v3415_v45, %v3411_v51  ;;  %v207_v45 = vld [vmem:[%s10937_s0 + $0x600] sm:$0xff] }
 0x171   :  { %v3424_v60 = vrot.slane %v869_v52, %v6907_v32  ;;  %v3420_v15 = vrot.slane %v866_v53, %v6901_v30  ;;  %v1107_v52 = vsel %vm527_vm0, %v208_v43, 0.0  ;;  %v1104_v53 = vsel %vm527_vm0, %v207_v45, 0.0  ;;  %v215_v43 = vld [vmem:[%s10937_s0 + $0x640] sm:$0xff] }
 0x173   :  { %v3425_v1 = vsel %vm2843_vm1, %v3424_v60, %v3420_v15  ;;  %1084 = vadd.xlane.f32.xlu1 %v1083_v54  ;;  %1081 = vadd.xlane.f32.xlu0 %v1080_v55  ;;  %v210_v60 = vld [vmem:[%s10937_s0 + $0x618] sm:$0xff]  ;;  %v209_v15 = vld [vmem:[%s10937_s0 + $0x610] sm:$0xff] }
 0x174   :  { %v875_v3 = vpop.xlane.xlu1 %874  ;;  %v872_v18 = vpop.xlane.xlu0 %871 }
 0x175   :  { %v3434_v6 = vrot.slane %v875_v3, %v6904_v31  ;;  %v3429_v8 = vrot.slane %v872_v18, %v6914_v35  ;;  %v1113_v18 = vsel %vm527_vm0, %v210_v60, 0.0  ;;  %v217_v60 = vld [vmem:[%s10937_s0 + $0x650] sm:$0xff] }
 0x177   :  { %v3430_v12 = vsel %vm2850_vm2, %v3429_v8, %v3425_v1  ;;  %1090 = vadd.xlane.f32.xlu1 %v1089_v4  ;;  %1087 = vadd.xlane.f32.xlu0 %v1086_v5  ;;  %v1110_v4 = vsel %vm527_vm0, %v209_v15, 0.0  ;;  %v212_v8 = vld [vmem:[%s10937_s0 + $0x628] sm:$0xff] }
 0x178   :  { %v881_v14 = vpop.xlane.xlu1 %880  ;;  %v3435_v16 = vsel %vm2857_vm3, %v3434_v6, %v3430_v12  ;;  %v878_v19 = vpop.xlane.xlu0 %877 }
 0x179   :  { %v3444_v22 = vrot.slane %v881_v14, %v6919_v40  ;;  %v3439_v24 = vrot.slane %v878_v19, %v6933_v48  ;;  %v1119_v19 = vsel %vm527_vm0, %v212_v8, 0.0 }
 0x17b   :  { %v3440_v28 = vsel %vm2864_vm4, %v3439_v24, %v3435_v16  ;;  %1096 = vadd.xlane.f32.xlu1 %v1095_v20  ;;  %1093 = vadd.xlane.f32.xlu0 %v1092_v21  ;;  %v1116_v20 = vsel %vm527_vm0, %v211_v9, 0.0  ;;  %v214_v24 = vld [vmem:[%s10937_s0 + $0x638] sm:$0xff] }
 0x17c   :  { %v887_v33 = vpop.xlane.xlu1 %886  ;;  %v3445_v34 = vsel %vm2871_vm5, %v3444_v22, %v3440_v28  ;;  %v884_v36 = vpop.xlane.xlu0 %883 }
 0x17d   :  { %v3454_v39 = vrot.slane %v887_v33, %v6941_v56  ;;  %v3449_v41 = vrot.slane %v884_v36, %v6944_v57  ;;  %v1122_v36 = vsel %vm527_vm0, %v213_v26, 0.0 }
 0x17f   :  { %v3450_v47 = vsel %vm2878_vm6, %v3449_v41, %v3445_v34  ;;  %1102 = vadd.xlane.f32.xlu1 %v1101_v37  ;;  %1099 = vadd.xlane.f32.xlu0 %v1098_v38  ;;  %v1125_v34 = vsel %vm527_vm0, %v214_v24, 0.0  ;;  %v216_v41 = vld [vmem:[%s10937_s0 + $0x648] sm:$0xff] }
 0x180   :  { %v893_v49 = vpop.xlane.xlu1 %892  ;;  %v3455_v50 = vsel %vm2885_vm7, %v3454_v39, %v3450_v47  ;;  %v890_v51 = vpop.xlane.xlu0 %889 }
 0x181   :  { %v3464_v54 = vrot.slane %v893_v49, %v6962_v7  ;;  %v3459_v55 = vrot.slane %v890_v51, %v6974_v13  ;;  %v1128_v51 = vsel %vm527_vm0, %v215_v43, 0.0 }
 0x183   :  { %v3460_v62 = vsel %vm10942_vm8, %v3459_v55, %v3455_v50  ;;  %1108 = vadd.xlane.f32.xlu1 %v1107_v52  ;;  %1105 = vadd.xlane.f32.xlu0 %v1104_v53  ;;  %v1131_v50 = vsel %vm527_vm0, %v216_v41, 0.0  ;;  %v218_v55 = vld [vmem:[%s10937_s0 + $0x658] sm:$0xff] }
 0x184   :  { %v899_v0 = vpop.xlane.xlu1 %898  ;;  %v3465_v1 = vsel %vm2899_vm9, %v3464_v54, %v3460_v62  ;;  %v896_v3 = vpop.xlane.xlu0 %895 }
 0x185   :  { %v3474_v5 = vrot.slane %v899_v0, %v6982_v23  ;;  %v3469_v6 = vrot.slane %v896_v3, %v6994_v29  ;;  %v1134_v3 = vsel %vm527_vm0, %v217_v60, 0.0 }
 0x187   :  { %v3470_v11 = vsel %vm10943_vm10, %v3469_v6, %v3465_v1  ;;  %1114 = vadd.xlane.f32.xlu1 %v1113_v18  ;;  %1111 = vadd.xlane.f32.xlu0 %v1110_v4  ;;  %v1137_v1 = vsel %vm527_vm0, %v218_v55, 0.0  ;;  %v219_v6 = vld [vmem:[%s10937_s0 + $0x660] sm:$0xff]  ;;  %v225_v55 = vld [vmem:[%s10937_s0 + $0x690] sm:$0xff] }
 0x188   :  { %v905_v12 = vpop.xlane.xlu1 %904  ;;  %v3475_v14 = vsel %vm2913_vm11, %v3474_v5, %v3470_v11  ;;  %v902_v16 = vpop.xlane.xlu0 %901  ;;  %v220_v5 = vld [vmem:[%s10937_s0 + $0x668] sm:$0xff] }
 0x189   :  { %v3484_v21 = vrot.slane %v905_v12, %v7008_v46  ;;  %v3479_v22 = vrot.slane %v902_v16, %v7002_v42  ;;  %v1140_v16 = vsel %vm527_vm0, %v219_v6, 0.0  ;;  %v227_v6 = vld [vmem:[%s10937_s0 + $0x6a0] sm:$0xff] }
 0x18b   :  { %v3480_v27 = vsel %vm10941_vm12, %v3479_v22, %v3475_v14  ;;  %1120 = vadd.xlane.f32.xlu1 %v1119_v19  ;;  %1117 = vadd.xlane.f32.xlu0 %v1116_v20  ;;  %v1143_v14 = vsel %vm527_vm0, %v220_v5, 0.0  ;;  %v221_v22 = vld [vmem:[%s10937_s0 + $0x670] sm:$0xff]  ;;  %v228_v5 = vld [vmem:[%s10937_s0 + $0x6a8] sm:$0xff] }
 0x18c   :  { %v911_v28 = vpop.xlane.xlu1 %910  ;;  %v908_v33 = vpop.xlane.xlu0 %907  ;;  %v3485_v37 = vsel %vm2927_vm13, %v3484_v21, %v3480_v27  ;;  %v222_v21 = vld [vmem:[%s10937_s0 + $0x678] sm:$0xff] }
 0x18d   :  { %v3494_v38 = vrot.slane %v911_v28, %v7027_v61  ;;  %v3489_v39 = vrot.slane %v908_v33, %v7022_v59  ;;  %v1149_v33 = vsel %vm527_vm0, %v222_v21, 0.0  ;;  %v230_v21 = vld [vmem:[%s10937_s0 + $0x6b8] sm:$0xff] }
 0x18f   :  { %1126 = vadd.xlane.f32.xlu1 %v1125_v34  ;;  %1123 = vadd.xlane.f32.xlu0 %v1122_v36  ;;  %v3490_v45 = vsel %vm2934_vm14, %v3489_v39, %v3485_v37  ;;  %v1146_v34 = vsel %vm527_vm0, %v221_v22, 0.0  ;;  %v223_v39 = vld [vmem:[%s10937_s0 + $0x680] sm:$0xff]  ;;  %v229_v22 = vld [vmem:[%s10937_s0 + $0x6b0] sm:$0xff] }
 0x190   :  { %v917_v47 = vpop.xlane.xlu1 %916  ;;  %v914_v49 = vpop.xlane.xlu0 %913  ;;  %v7730_v52 = vsel %vm2941_vm15, %v3494_v38, %v3490_v45  ;;  %v224_v38 = vld [vmem:[%s10937_s0 + $0x688] sm:$0xff] }
 0x191   :  { %v3503_v53 = vrot.slane %v917_v47, %v6907_v32  ;;  %v3499_v54 = vrot.slane %v914_v49, %v6901_v30  ;;  %v1155_v49 = vsel %vm527_vm0, %v224_v38, 0.0  ;;  %v232_v38 = vld [vmem:[%s10937_s0 + $0x6c8] sm:$0xff] }
 0x193   :  { %v3504_v15 = vsel %vm2843_vm1, %v3503_v53, %v3499_v54  ;;  %1132 = vadd.xlane.f32.xlu1 %v1131_v50  ;;  %1129 = vadd.xlane.f32.xlu0 %v1128_v51  ;;  %v1152_v50 = vsel %vm527_vm0, %v223_v39, 0.0  ;;  %v226_v54 = vld [vmem:[%s10937_s0 + $0x698] sm:$0xff]  ;;  %v231_v39 = vld [vmem:[%s10937_s0 + $0x6c0] sm:$0xff] }
 0x194   :  { %v923_v62 = vpop.xlane.xlu1 %922  ;;  %v920_v0 = vpop.xlane.xlu0 %919 }
 0x195   :  { %v3513_v18 = vrot.slane %v923_v62, %v6904_v31  ;;  %v3508_v4 = vrot.slane %v920_v0, %v6914_v35 }
 0x197   :  { %v3509_v8 = vsel %vm2850_vm2, %v3508_v4, %v3504_v15  ;;  %1138 = vadd.xlane.f32.xlu1 %v1137_v1  ;;  %1135 = vadd.xlane.f32.xlu0 %v1134_v3  ;;  %v1161_v1 = vsel %vm527_vm0, %v226_v54, 0.0  ;;  %v1158_v3 = vsel %vm527_vm0, %v225_v55, 0.0  ;;  %v234_v54 = vld [vmem:[%s10937_s0 + $0x6d8] sm:$0xff]  ;;  %v233_v55 = vld [vmem:[%s10937_s0 + $0x6d0] sm:$0xff] }
 0x198   :  { %v929_v9 = vpop.xlane.xlu1 %928  ;;  %v3514_v11 = vsel %vm2857_vm3, %v3513_v18, %v3509_v8  ;;  %v926_v12 = vpop.xlane.xlu0 %925 }
 0x199   :  { %v3523_v19 = vrot.slane %v929_v9, %v6919_v40  ;;  %v3518_v20 = vrot.slane %v926_v12, %v6933_v48 }
 0x19b   :  { %v3519_v24 = vsel %vm2864_vm4, %v3518_v20, %v3514_v11  ;;  %1144 = vadd.xlane.f32.xlu1 %v1143_v14  ;;  %1141 = vadd.xlane.f32.xlu0 %v1140_v16  ;;  %v1167_v14 = vsel %vm527_vm0, %v228_v5, 0.0  ;;  %v1164_v16 = vsel %vm527_vm0, %v227_v6, 0.0  ;;  %v235_v5 = vld [vmem:[%s10937_s0 + $0x6e0] sm:$0xff] }
 0x19c   :  { %v935_v26 = vpop.xlane.xlu1 %934  ;;  %v3524_v27 = vsel %vm2871_vm5, %v3523_v19, %v3519_v24  ;;  %v932_v28 = vpop.xlane.xlu0 %931 }
 0x19d   :  { %v3533_v36 = vrot.slane %v935_v26, %v6941_v56  ;;  %v3528_v37 = vrot.slane %v932_v28, %v6944_v57 }
 0x19f   :  { %v3529_v41 = vsel %vm2878_vm6, %v3528_v37, %v3524_v27  ;;  %1150 = vadd.xlane.f32.xlu1 %v1149_v33  ;;  %1147 = vadd.xlane.f32.xlu0 %v1146_v34  ;;  %v1173_v33 = vsel %vm527_vm0, %v230_v21, 0.0  ;;  %v1170_v34 = vsel %vm527_vm0, %v229_v22, 0.0  ;;  %v237_v21 = vld [vmem:[%s10937_s0 + $0x6f0] sm:$0xff] }
 0x1a0   :  { %v941_v43 = vpop.xlane.xlu1 %940  ;;  %v3534_v45 = vsel %vm2885_vm7, %v3533_v36, %v3529_v41  ;;  %v938_v47 = vpop.xlane.xlu0 %937 }
 0x1a1   :  { %v3543_v51 = vrot.slane %v941_v43, %v6962_v7  ;;  %v3538_v53 = vrot.slane %v938_v47, %v6974_v13  ;;  %v1179_v47 = vsel %vm527_vm0, %v232_v38, 0.0  ;;  %v239_v38 = vld [vmem:[%s10937_s0 + $0x700] sm:$0xff] }
 0x1a3   :  { %v3539_v60 = vsel %vm10942_vm8, %v3538_v53, %v3534_v45  ;;  %1156 = vadd.xlane.f32.xlu1 %v1155_v49  ;;  %1153 = vadd.xlane.f32.xlu0 %v1152_v50  ;;  %v1176_v49 = vsel %vm527_vm0, %v231_v39, 0.0 }
 0x1a4   :  { %v947_v15 = vpop.xlane.xlu1 %946  ;;  %v3544_v62 = vsel %vm2899_vm9, %v3543_v51, %v3539_v60  ;;  %v944_v0 = vpop.xlane.xlu0 %943 }
 0x1a5   :  { %v3553_v18 = vrot.slane %v947_v15, %v6982_v23  ;;  %v3548_v4 = vrot.slane %v944_v0, %v6994_v29  ;;  %v1185_v0 = vsel %vm527_vm0, %v234_v54, 0.0  ;;  %v242_v54 = vld [vmem:[%s10937_s0 + $0x718] sm:$0xff] }
 0x1a7   :  { %v3549_v8 = vsel %vm10943_vm10, %v3548_v4, %v3544_v62  ;;  %1162 = vadd.xlane.f32.xlu1 %v1161_v1  ;;  %1159 = vadd.xlane.f32.xlu0 %v1158_v3  ;;  %v1182_v1 = vsel %vm527_vm0, %v233_v55, 0.0  ;;  %v236_v4 = vld [vmem:[%s10937_s0 + $0x6e8] sm:$0xff]  ;;  %v241_v55 = vld [vmem:[%s10937_s0 + $0x710] sm:$0xff] }
 0x1a8   :  { %v953_v9 = vpop.xlane.xlu1 %952  ;;  %v3554_v11 = vsel %vm2913_vm11, %v3553_v18, %v3549_v8  ;;  %v950_v12 = vpop.xlane.xlu0 %949 }
 0x1a9   :  { %v3563_v19 = vrot.slane %v953_v9, %v7008_v46  ;;  %v3558_v20 = vrot.slane %v950_v12, %v7002_v42  ;;  %v1191_v12 = vsel %vm527_vm0, %v236_v4, 0.0 }
 0x1ab   :  { %v3559_v24 = vsel %vm10941_vm12, %v3558_v20, %v3554_v11  ;;  %1168 = vadd.xlane.f32.xlu1 %v1167_v14  ;;  %1165 = vadd.xlane.f32.xlu0 %v1164_v16  ;;  %v1188_v14 = vsel %vm527_vm0, %v235_v5, 0.0  ;;  %v238_v20 = vld [vmem:[%s10937_s0 + $0x6f8] sm:$0xff]  ;;  %v244_v5 = vld [vmem:[%s10937_s0 + $0x728] sm:$0xff] }
 0x1ac   :  { %v959_v26 = vpop.xlane.xlu1 %958  ;;  %v3564_v27 = vsel %vm2927_vm13, %v3563_v19, %v3559_v24  ;;  %v956_v28 = vpop.xlane.xlu0 %955 }
 0x1ad   :  { %v3573_v36 = vrot.slane %v959_v26, %v7027_v61  ;;  %v3568_v37 = vrot.slane %v956_v28, %v7022_v59  ;;  %v1197_v28 = vsel %vm527_vm0, %v238_v20, 0.0 }
 0x1af   :  { %v3569_v41 = vsel %vm2934_vm14, %v3568_v37, %v3564_v27  ;;  %1174 = vadd.xlane.f32.xlu1 %v1173_v33  ;;  %1171 = vadd.xlane.f32.xlu0 %v1170_v34  ;;  %v1194_v33 = vsel %vm527_vm0, %v237_v21, 0.0  ;;  %v240_v37 = vld [vmem:[%s10937_s0 + $0x708] sm:$0xff]  ;;  %v246_v21 = vld [vmem:[%s10937_s0 + $0x738] sm:$0xff] }
 0x1b0   :  { %v965_v43 = vpop.xlane.xlu1 %964  ;;  %v962_v45 = vpop.xlane.xlu0 %961  ;;  %v7827_v50 = vsel %vm2941_vm15, %v3573_v36, %v3569_v41 }
 0x1b1   :  { %10953 = vst [vmem:[#allocation8_spill] sm:$0xff] %v7827_v50  ;;  %v3582_v51 = vrot.slane %v965_v43, %v6907_v32  ;;  %v3578_v53 = vrot.slane %v962_v45, %v6901_v30 }
 0x1b3   :  { %v3583_v60 = vsel %vm2843_vm1, %v3582_v51, %v3578_v53  ;;  %1180 = vadd.xlane.f32.xlu1 %v1179_v47  ;;  %1177 = vadd.xlane.f32.xlu0 %v1176_v49  ;;  %v1203_v47 = vsel %vm527_vm0, %v240_v37, 0.0  ;;  %v1200_v49 = vsel %vm527_vm0, %v239_v38, 0.0  ;;  %v248_v38 = vld [vmem:[%s10937_s0 + $0x748] sm:$0xff] }
 0x1b4   :  { %v971_v15 = vpop.xlane.xlu1 %970  ;;  %v968_v62 = vpop.xlane.xlu0 %967 }
 0x1b5   :  { %v3592_v3 = vrot.slane %v971_v15, %v6904_v31  ;;  %v3587_v18 = vrot.slane %v968_v62, %v6914_v35 }
 0x1b7   :  { %v3588_v6 = vsel %vm2850_vm2, %v3587_v18, %v3583_v60  ;;  %1186 = vadd.xlane.f32.xlu1 %v1185_v0  ;;  %1183 = vadd.xlane.f32.xlu0 %v1182_v1  ;;  %v1209_v1 = vsel %vm527_vm0, %v242_v54, 0.0 }
 0x1b8   :  { %v977_v8 = vpop.xlane.xlu1 %976  ;;  %v3593_v9 = vsel %vm2857_vm3, %v3592_v3, %v3588_v6  ;;  %v974_v11 = vpop.xlane.xlu0 %973  ;;  %v1206_v3 = vsel %vm527_vm0, %v241_v55, 0.0  ;;  %v243_v6 = vld [vmem:[%s10937_s0 + $0x720] sm:$0xff]  ;;  %v250_v55 = vld [vmem:[%s10937_s0 + $0x758] sm:$0xff] }
 0x1b9   :  { %v3602_v16 = vrot.slane %v977_v8, %v6919_v40  ;;  %v3597_v19 = vrot.slane %v974_v11, %v6933_v48 }
 0x1bb   :  { %v3598_v22 = vsel %vm2864_vm4, %v3597_v19, %v3593_v9  ;;  %1192 = vadd.xlane.f32.xlu1 %v1191_v12  ;;  %1189 = vadd.xlane.f32.xlu0 %v1188_v14  ;;  %v1215_v14 = vsel %vm527_vm0, %v244_v5, 0.0  ;;  %v252_v5 = vld [vmem:[%s10937_s0 + $0x768] sm:$0xff] }
 0x1bc   :  { %v983_v24 = vpop.xlane.xlu1 %982  ;;  %v3603_v26 = vsel %vm2871_vm5, %v3602_v16, %v3598_v22  ;;  %v980_v27 = vpop.xlane.xlu0 %979  ;;  %v1212_v16 = vsel %vm527_vm0, %v243_v6, 0.0  ;;  %v245_v22 = vld [vmem:[%s10937_s0 + $0x730] sm:$0xff]  ;;  %v251_v6 = vld [vmem:[%s10937_s0 + $0x760] sm:$0xff] }
 0x1bd   :  { %v3612_v34 = vrot.slane %v983_v24, %v6941_v56  ;;  %v3607_v36 = vrot.slane %v980_v27, %v6944_v57 }
 0x1bf   :  { %v3608_v39 = vsel %vm2878_vm6, %v3607_v36, %v3603_v26  ;;  %1198 = vadd.xlane.f32.xlu1 %v1197_v28  ;;  %1195 = vadd.xlane.f32.xlu0 %v1194_v33  ;;  %v1221_v28 = vsel %vm527_vm0, %v246_v21, 0.0  ;;  %v1218_v33 = vsel %vm527_vm0, %v245_v22, 0.0  ;;  %v254_v21 = vld [vmem:[%s10937_s0 + $0x778] sm:$0xff]  ;;  %v253_v22 = vld [vmem:[%s10937_s0 + $0x770] sm:$0xff] }
 0x1c0   :  { %v989_v41 = vpop.xlane.xlu1 %988  ;;  %v3613_v43 = vsel %vm2885_vm7, %v3612_v34, %v3608_v39  ;;  %v986_v45 = vpop.xlane.xlu0 %985  ;;  %v247_v39 = vld [vmem:[%s10937_s0 + $0x740] sm:$0xff] }
 0x1c1   :  { %v3622_v51 = vrot.slane %v989_v41, %v6962_v7  ;;  %v3617_v53 = vrot.slane %v986_v45, %v6974_v13 }
 0x1c3   :  { %v3618_v60 = vsel %vm10942_vm8, %v3617_v53, %v3613_v43  ;;  %1204 = vadd.xlane.f32.xlu1 %v1203_v47  ;;  %1201 = vadd.xlane.f32.xlu0 %v1200_v49  ;;  %v1227_v47 = vsel %vm527_vm0, %v248_v38, 0.0  ;;  %v1224_v49 = vsel %vm527_vm0, %v247_v39, 0.0  ;;  %v256_v38 = vld [vmem:[%s10937_s0 + $0x788] sm:$0xff]  ;;  %v255_v39 = vld [vmem:[%s10937_s0 + $0x780] sm:$0xff] }
 0x1c4   :  { %v995_v15 = vpop.xlane.xlu1 %994  ;;  %v3623_v62 = vsel %vm2899_vm9, %v3622_v51, %v3618_v60  ;;  %v992_v0 = vpop.xlane.xlu0 %991  ;;  %v249_v60 = vld [vmem:[%s10937_s0 + $0x750] sm:$0xff] }
 0x1c5   :  { %v3632_v18 = vrot.slane %v995_v15, %v6982_v23  ;;  %v3627_v4 = vrot.slane %v992_v0, %v6994_v29 }
 0x1c7   :  { %v3628_v8 = vsel %vm10943_vm10, %v3627_v4, %v3623_v62  ;;  %1210 = vadd.xlane.f32.xlu1 %v1209_v1  ;;  %1207 = vadd.xlane.f32.xlu0 %v1206_v3  ;;  %v1233_v1 = vsel %vm527_vm0, %v250_v55, 0.0  ;;  %v1230_v3 = vsel %vm527_vm0, %v249_v60, 0.0  ;;  %v258_v60 = vld [vmem:[%s10937_s0 + $0x798] sm:$0xff] }
 0x1c8   :  { %v1001_v9 = vpop.xlane.xlu1 %1000  ;;  %v3633_v11 = vsel %vm2913_vm11, %v3632_v18, %v3628_v8  ;;  %v998_v12 = vpop.xlane.xlu0 %997 }
 0x1c9   :  { %v3642_v19 = vrot.slane %v1001_v9, %v7008_v46  ;;  %v3637_v20 = vrot.slane %v998_v12, %v7002_v42 }
 0x1cb   :  { %v3638_v24 = vsel %vm10941_vm12, %v3637_v20, %v3633_v11  ;;  %1216 = vadd.xlane.f32.xlu1 %v1215_v14  ;;  %1213 = vadd.xlane.f32.xlu0 %v1212_v16  ;;  %v1239_v14 = vsel %vm527_vm0, %v252_v5, 0.0  ;;  %v1236_v16 = vsel %vm527_vm0, %v251_v6, 0.0 }
 0x1cc   :  { %v1007_v26 = vpop.xlane.xlu1 %1006  ;;  %v1004_v27 = vpop.xlane.xlu0 %1003  ;;  %v3643_v34 = vsel %vm2927_vm13, %v3642_v19, %v3638_v24 }
 0x1cd   :  { %v3652_v36 = vrot.slane %v1007_v26, %v7027_v61  ;;  %v3647_v37 = vrot.slane %v1004_v27, %v7022_v59 }
 0x1cf   :  { %1222 = vadd.xlane.f32.xlu1 %v1221_v28  ;;  %1219 = vadd.xlane.f32.xlu0 %v1218_v33  ;;  %v3648_v41 = vsel %vm2934_vm14, %v3647_v37, %v3643_v34  ;;  %v1245_v33 = vsel %vm527_vm0, %v254_v21, 0.0  ;;  %v1242_v34 = vsel %vm527_vm0, %v253_v22, 0.0 }
 0x1d0   :  { %v1013_v43 = vpop.xlane.xlu1 %1012  ;;  %v1010_v45 = vpop.xlane.xlu0 %1009  ;;  %v7924_v51 = vsel %vm2941_vm15, %v3652_v36, %v3648_v41 }
 0x1d1   :  { %10954 = vst [vmem:[#allocation9_spill] sm:$0xff] %v7924_v51  ;;  %v3661_v53 = vrot.slane %v1013_v43, %v6907_v32  ;;  %v3657_v54 = vrot.slane %v1010_v45, %v6901_v30 }
 0x1d3   :  { %v3662_v15 = vsel %vm2843_vm1, %v3661_v53, %v3657_v54  ;;  %1228 = vadd.xlane.f32.xlu1 %v1227_v47  ;;  %1225 = vadd.xlane.f32.xlu0 %v1224_v49  ;;  %v1251_v49 = vsel %vm527_vm0, %v256_v38, 0.0  ;;  %v1248_v53 = vsel %vm527_vm0, %v255_v39, 0.0 }
 0x1d4   :  { %v1019_v62 = vpop.xlane.xlu1 %1018  ;;  %v1016_v0 = vpop.xlane.xlu0 %1015 }
 0x1d5   :  { %v3671_v18 = vrot.slane %v1019_v62, %v6904_v31  ;;  %v3666_v4 = vrot.slane %v1016_v0, %v6914_v35 }
 0x1d7   :  { %v3667_v8 = vsel %vm2850_vm2, %v3666_v4, %v3662_v15  ;;  %1234 = vadd.xlane.f32.xlu1 %v1233_v1  ;;  %1231 = vadd.xlane.f32.xlu0 %v1230_v3  ;;  %v257_v15 = vld [vmem:[%s10937_s0 + $0x790] sm:$0xff] }
 0x1d8   :  { %v1025_v9 = vpop.xlane.xlu1 %1024  ;;  %v3672_v11 = vsel %vm2857_vm3, %v3671_v18, %v3667_v8  ;;  %v1022_v12 = vpop.xlane.xlu0 %1021  ;;  %v1257_v18 = vsel %vm527_vm0, %v258_v60, 0.0  ;;  %v1254_v4 = vsel %vm527_vm0, %v257_v15, 0.0  ;;  %v260_v8 = vld [vmem:[%s10937_s0 + $0x7a8] sm:$0xff] }
 0x1d9   :  { %v3681_v19 = vrot.slane %v1025_v9, %v6919_v40  ;;  %v3676_v20 = vrot.slane %v1022_v12, %v6933_v48  ;;  %v259_v9 = vld [vmem:[%s10937_s0 + $0x7a0] sm:$0xff] }
 0x1db   :  { %v3677_v24 = vsel %vm2864_vm4, %v3676_v20, %v3672_v11  ;;  %1240 = vadd.xlane.f32.xlu1 %v1239_v14  ;;  %1237 = vadd.xlane.f32.xlu0 %v1236_v16  ;;  %v1260_v20 = vsel %vm527_vm0, %v259_v9, 0.0  ;;  %v268_v9 = vld [vmem:[%s10937_s0 + $0x7e8] sm:$0xff] }
 0x1dc   :  { %v1031_v26 = vpop.xlane.xlu1 %1030  ;;  %v3682_v27 = vsel %vm2871_vm5, %v3681_v19, %v3677_v24  ;;  %v1028_v28 = vpop.xlane.xlu0 %1027  ;;  %v1263_v19 = vsel %vm527_vm0, %v260_v8, 0.0  ;;  %v262_v24 = vld [vmem:[%s10937_s0 + $0x7b8] sm:$0xff] }
 0x1dd   :  { %v3691_v36 = vrot.slane %v1031_v26, %v6941_v56  ;;  %v3686_v37 = vrot.slane %v1028_v28, %v6944_v57  ;;  %v261_v26 = vld [vmem:[%s10937_s0 + $0x7b0] sm:$0xff] }
 0x1df   :  { %v3687_v41 = vsel %vm2878_vm6, %v3686_v37, %v3682_v27  ;;  %1246 = vadd.xlane.f32.xlu1 %v1245_v33  ;;  %1243 = vadd.xlane.f32.xlu0 %v1242_v34  ;;  %v1266_v37 = vsel %vm527_vm0, %v261_v26, 0.0  ;;  %v270_v26 = vld [vmem:[%s10937_s0 + $0x7f8] sm:$0xff] }
 0x1e0   :  { %v1037_v43 = vpop.xlane.xlu1 %1036  ;;  %v3692_v45 = vsel %vm2885_vm7, %v3691_v36, %v3687_v41  ;;  %v1034_v47 = vpop.xlane.xlu0 %1033  ;;  %v1269_v36 = vsel %vm527_vm0, %v262_v24, 0.0  ;;  %v264_v41 = vld [vmem:[%s10937_s0 + $0x7c8] sm:$0xff] }
 0x1e1   :  { %v3701_v54 = vrot.slane %v1037_v43, %v6962_v7  ;;  %v3696_v55 = vrot.slane %v1034_v47, %v6974_v13  ;;  %v263_v43 = vld [vmem:[%s10937_s0 + $0x7c0] sm:$0xff] }
 0x1e3   :  { %v3697_v62 = vsel %vm10942_vm8, %v3696_v55, %v3692_v45  ;;  %1252 = vadd.xlane.f32.xlu1 %v1251_v49  ;;  %1249 = vadd.xlane.f32.xlu0 %v1248_v53  ;;  %v1275_v53 = vsel %vm527_vm0, %v264_v41, 0.0 }
 0x1e4   :  { %v1043_v0 = vpop.xlane.xlu1 %1042  ;;  %v3702_v1 = vsel %vm2899_vm9, %v3701_v54, %v3697_v62  ;;  %v1040_v3 = vpop.xlane.xlu0 %1039  ;;  %v1272_v54 = vsel %vm527_vm0, %v263_v43, 0.0  ;;  %v266_v62 = vld [vmem:[%s10937_s0 + $0x7d8] sm:$0xff]  ;;  %v272_v43 = vld [vmem:[%s10937_s0 + $0x808] sm:$0xff] }
 0x1e5   :  { %v3711_v5 = vrot.slane %v1043_v0, %v6982_v23  ;;  %v3706_v6 = vrot.slane %v1040_v3, %v6994_v29  ;;  %v265_v0 = vld [vmem:[%s10937_s0 + $0x7d0] sm:$0xff] }
 0x1e7   :  { %v3707_v11 = vsel %vm10943_vm10, %v3706_v6, %v3702_v1  ;;  %1258 = vadd.xlane.f32.xlu1 %v1257_v18  ;;  %1255 = vadd.xlane.f32.xlu0 %v1254_v4  ;;  %v1281_v4 = vsel %vm527_vm0, %v266_v62, 0.0 }
 0x1e8   :  { %v1049_v12 = vpop.xlane.xlu1 %1048  ;;  %v3712_v14 = vsel %vm2913_vm11, %v3711_v5, %v3707_v11  ;;  %v1046_v16 = vpop.xlane.xlu0 %1045  ;;  %v1278_v5 = vsel %vm527_vm0, %v265_v0, 0.0  ;;  %v267_v11 = vld [vmem:[%s10937_s0 + $0x7e0] sm:$0xff] }
 0x1e9   :  { %v3721_v21 = vrot.slane %v1049_v12, %v7008_v46  ;;  %v3716_v22 = vrot.slane %v1046_v16, %v7002_v42 }
 0x1eb   :  { %v3717_v27 = vsel %vm10941_vm12, %v3716_v22, %v3712_v14  ;;  %1264 = vadd.xlane.f32.xlu1 %v1263_v19  ;;  %1261 = vadd.xlane.f32.xlu0 %v1260_v20  ;;  %v1287_v20 = vsel %vm527_vm0, %v268_v9, 0.0 }
 0x1ec   :  { %v1055_v28 = vpop.xlane.xlu1 %1054  ;;  %v3722_v33 = vsel %vm2927_vm13, %v3721_v21, %v3717_v27  ;;  %v1052_v34 = vpop.xlane.xlu0 %1051  ;;  %v1284_v21 = vsel %vm527_vm0, %v267_v11, 0.0  ;;  %v269_v27 = vld [vmem:[%s10937_s0 + $0x7f0] sm:$0xff] }
 0x1ed   :  { %v3731_v38 = vrot.slane %v1055_v28, %v7027_v61  ;;  %v3726_v39 = vrot.slane %v1052_v34, %v7022_v59 }
 0x1ef   :  { %v3727_v45 = vsel %vm2934_vm14, %v3726_v39, %v3722_v33  ;;  %1270 = vadd.xlane.f32.xlu1 %v1269_v36  ;;  %1267 = vadd.xlane.f32.xlu0 %v1266_v37  ;;  %v1293_v37 = vsel %vm527_vm0, %v270_v26, 0.0 }
 0x1f0   :  { %v1061_v47 = vpop.xlane.xlu1 %1060  ;;  %v1058_v49 = vpop.xlane.xlu0 %1057  ;;  %v8021_v55 = vsel %vm2941_vm15, %v3731_v38, %v3727_v45  ;;  %v1290_v38 = vsel %vm527_vm0, %v269_v27, 0.0  ;;  %v271_v45 = vld [vmem:[%s10937_s0 + $0x800] sm:$0xff] }
 0x1f1   :  { %10955 = vst [vmem:[#allocation10_spill] sm:$0xff] %v8021_v55  ;;  %v3740_v60 = vrot.slane %v1061_v47, %v6907_v32  ;;  %v3736_v15 = vrot.slane %v1058_v49, %v6901_v30 }
 0x1f3   :  { %v3741_v1 = vsel %vm2843_vm1, %v3740_v60, %v3736_v15  ;;  %1276 = vadd.xlane.f32.xlu1 %v1275_v53  ;;  %1273 = vadd.xlane.f32.xlu0 %v1272_v54  ;;  %v1299_v60 = vsel %vm527_vm0, %v272_v43, 0.0  ;;  %v1296_v15 = vsel %vm527_vm0, %v271_v45, 0.0 }
 0x1f4   :  { %v1067_v3 = vpop.xlane.xlu1 %1066  ;;  %v1064_v18 = vpop.xlane.xlu0 %1063 }
 0x1f5   :  { %v3750_v6 = vrot.slane %v1067_v3, %v6904_v31  ;;  %v3745_v8 = vrot.slane %v1064_v18, %v6914_v35  ;;  %v273_v3 = vld [vmem:[%s10937_s0 + $0x810] sm:$0xff] }
 0x1f6   :  { %v1302_v9 = vsel %vm527_vm0, %v273_v3, 0.0 }
 0x1f7   :  { %v3746_v12 = vsel %vm2850_vm2, %v3745_v8, %v3741_v1  ;;  %1282 = vadd.xlane.f32.xlu1 %v1281_v4  ;;  %1279 = vadd.xlane.f32.xlu0 %v1278_v5  ;;  %v274_v1 = vld [vmem:[%s10937_s0 + $0x818] sm:$0xff] }
 0x1f8   :  { %v1073_v14 = vpop.xlane.xlu1 %1072  ;;  %v3751_v16 = vsel %vm2857_vm3, %v3750_v6, %v3746_v12  ;;  %v1070_v19 = vpop.xlane.xlu0 %1069  ;;  %v1305_v8 = vsel %vm527_vm0, %v274_v1, 0.0 }
 0x1f9   :  { %v3760_v22 = vrot.slane %v1073_v14, %v6919_v40  ;;  %v3755_v24 = vrot.slane %v1070_v19, %v6933_v48  ;;  %v276_v14 = vld [vmem:[%s10937_s0 + $0x828] sm:$0xff] }
 0x1fb   :  { %v3756_v28 = vsel %vm2864_vm4, %v3755_v24, %v3751_v16  ;;  %1288 = vadd.xlane.f32.xlu1 %v1287_v20  ;;  %1285 = vadd.xlane.f32.xlu0 %v1284_v21  ;;  %v275_v16 = vld [vmem:[%s10937_s0 + $0x820] sm:$0xff]  ;;  %v1311_v24 = vsel %vm527_vm0, %v276_v14, 0.0 }
 0x1fc   :  { %v1079_v33 = vpop.xlane.xlu1 %1078  ;;  %v3761_v34 = vsel %vm2871_vm5, %v3760_v22, %v3756_v28  ;;  %v1076_v36 = vpop.xlane.xlu0 %1075  ;;  %v1308_v26 = vsel %vm527_vm0, %v275_v16, 0.0 }
 0x1fd   :  { %v3770_v39 = vrot.slane %v1079_v33, %v6941_v56  ;;  %v3765_v41 = vrot.slane %v1076_v36, %v6944_v57  ;;  %v278_v33 = vld [vmem:[%s10937_s0 + $0x838] sm:$0xff] }
 0x1ff   :  { %v3766_v47 = vsel %vm2878_vm6, %v3765_v41, %v3761_v34  ;;  %1294 = vadd.xlane.f32.xlu1 %v1293_v37  ;;  %1291 = vadd.xlane.f32.xlu0 %v1290_v38  ;;  %v277_v34 = vld [vmem:[%s10937_s0 + $0x830] sm:$0xff] }
 0x200   :  { %v1085_v49 = vpop.xlane.xlu1 %1084  ;;  %v3771_v53 = vsel %vm2885_vm7, %v3770_v39, %v3766_v47  ;;  %v1082_v54 = vpop.xlane.xlu0 %1081  ;;  %v1317_v39 = vsel %vm527_vm0, %v278_v33, 0.0  ;;  %v1314_v41 = vsel %vm527_vm0, %v277_v34, 0.0 }
 0x201   :  { %v3780_v62 = vrot.slane %v1085_v49, %v6962_v7  ;;  %v3775_v0 = vrot.slane %v1082_v54, %v6974_v13  ;;  %v280_v49 = vld [vmem:[%s10937_s0 + $0x848] sm:$0xff] }
 0x203   :  { %v3776_v18 = vsel %vm10942_vm8, %v3775_v0, %v3771_v53  ;;  %1300 = vadd.xlane.f32.xlu1 %v1299_v60  ;;  %1297 = vadd.xlane.f32.xlu0 %v1296_v15  ;;  %v279_v53 = vld [vmem:[%s10937_s0 + $0x840] sm:$0xff] }
 0x204   :  { %v1091_v4 = vpop.xlane.xlu1 %1090  ;;  %v3781_v5 = vsel %vm2899_vm9, %v3780_v62, %v3776_v18  ;;  %v1088_v6 = vpop.xlane.xlu0 %1087  ;;  %v1323_v62 = vsel %vm527_vm0, %v280_v49, 0.0  ;;  %v1320_v0 = vsel %vm527_vm0, %v279_v53, 0.0 }
 0x205   :  { %v3790_v11 = vrot.slane %v1091_v4, %v6982_v23  ;;  %v3785_v12 = vrot.slane %v1088_v6, %v6994_v29  ;;  %v282_v4 = vld [vmem:[%s10937_s0 + $0x858] sm:$0xff] }
 0x207   :  { %v3786_v19 = vsel %vm10943_vm10, %v3785_v12, %v3781_v5  ;;  %1306 = vadd.xlane.f32.xlu1 %v1305_v8  ;;  %1303 = vadd.xlane.f32.xlu0 %v1302_v9  ;;  %v281_v5 = vld [vmem:[%s10937_s0 + $0x850] sm:$0xff] }
 0x208   :  { %v1097_v20 = vpop.xlane.xlu1 %1096  ;;  %v3791_v21 = vsel %vm2913_vm11, %v3790_v11, %v3786_v19  ;;  %v1094_v22 = vpop.xlane.xlu0 %1093  ;;  %v1329_v11 = vsel %vm527_vm0, %v282_v4, 0.0  ;;  %v1326_v12 = vsel %vm527_vm0, %v281_v5, 0.0  ;;  %v284_v19 = vld [vmem:[%s10937_s0 + $0x868] sm:$0xff] }
 0x209   :  { %v3800_v27 = vrot.slane %v1097_v20, %v7008_v46  ;;  %v3795_v28 = vrot.slane %v1094_v22, %v7002_v42  ;;  %v283_v20 = vld [vmem:[%s10937_s0 + $0x860] sm:$0xff] }
 0x20b   :  { %v3796_v36 = vsel %vm10941_vm12, %v3795_v28, %v3791_v21  ;;  %1312 = vadd.xlane.f32.xlu1 %v1311_v24  ;;  %1309 = vadd.xlane.f32.xlu0 %v1308_v26  ;;  %v1332_v28 = vsel %vm527_vm0, %v283_v20, 0.0 }
 0x20c   :  { %v1103_v37 = vpop.xlane.xlu1 %1102  ;;  %v1100_v38 = vpop.xlane.xlu0 %1099  ;;  %v3801_v43 = vsel %vm2927_vm13, %v3800_v27, %v3796_v36  ;;  %v1335_v27 = vsel %vm527_vm0, %v284_v19, 0.0  ;;  %v286_v36 = vld [vmem:[%s10937_s0 + $0x878] sm:$0xff] }
 0x20d   :  { %v3810_v45 = vrot.slane %v1103_v37, %v7027_v61  ;;  %v3805_v47 = vrot.slane %v1100_v38, %v7022_v59  ;;  %v285_v37 = vld [vmem:[%s10937_s0 + $0x870] sm:$0xff] }
 0x20f   :  { %1318 = vadd.xlane.f32.xlu1 %v1317_v39  ;;  %1315 = vadd.xlane.f32.xlu0 %v1314_v41  ;;  %v3806_v54 = vsel %vm2934_vm14, %v3805_v47, %v3801_v43  ;;  %v1338_v47 = vsel %vm527_vm0, %v285_v37, 0.0 }
 0x210   :  { %v1109_v60 = vpop.xlane.xlu1 %1108  ;;  %v1106_v15 = vpop.xlane.xlu0 %1105  ;;  %v8118_v1 = vsel %vm2941_vm15, %v3810_v45, %v3806_v54  ;;  %v1341_v45 = vsel %vm527_vm0, %v286_v36, 0.0  ;;  %v288_v54 = vld [vmem:[%s10937_s0 + $0x888] sm:$0xff] }
 0x211   :  { %10956 = vst [vmem:[#allocation11_spill] sm:$0xff] %v8118_v1  ;;  %v3819_v3 = vrot.slane %v1109_v60, %v6907_v32  ;;  %v3815_v18 = vrot.slane %v1106_v15, %v6901_v30  ;;  %v287_v60 = vld [vmem:[%s10937_s0 + $0x880] sm:$0xff] }
 0x212   :  { %v1344_v4 = vsel %vm527_vm0, %v287_v60, 0.0 }
 0x213   :  { %v3820_v6 = vsel %vm2843_vm1, %v3819_v3, %v3815_v18  ;;  %1324 = vadd.xlane.f32.xlu1 %v1323_v62  ;;  %1321 = vadd.xlane.f32.xlu0 %v1320_v0  ;;  %v1347_v18 = vsel %vm527_vm0, %v288_v54, 0.0 }
 0x214   :  { %v1115_v8 = vpop.xlane.xlu1 %1114  ;;  %v1112_v9 = vpop.xlane.xlu0 %1111 }
 0x215   :  { %v3829_v14 = vrot.slane %v1115_v8, %v6904_v31  ;;  %v3824_v16 = vrot.slane %v1112_v9, %v6914_v35  ;;  %v290_v8 = vld [vmem:[%s10937_s0 + $0x898] sm:$0xff]  ;;  %v289_v9 = vld [vmem:[%s10937_s0 + $0x890] sm:$0xff] }
 0x216   :  { %v1353_v19 = vsel %vm527_vm0, %v290_v8, 0.0  ;;  %v1350_v20 = vsel %vm527_vm0, %v289_v9, 0.0  ;;  %v2080_v9 = vld [vmem:[%s10938_s1 + $0x80] sm:$0xff] }
 0x217   :  { %v3825_v21 = vsel %vm2850_vm2, %v3824_v16, %v3820_v6  ;;  %1330 = vadd.xlane.f32.xlu1 %v1329_v11  ;;  %1327 = vadd.xlane.f32.xlu0 %v1326_v12 }
 0x218   :  { %v1121_v22 = vpop.xlane.xlu1 %1120  ;;  %v3830_v24 = vsel %vm2857_vm3, %v3829_v14, %v3825_v21  ;;  %v1118_v26 = vpop.xlane.xlu0 %1117 }
 0x219   :  { %v3839_v33 = vrot.slane %v1121_v22, %v6919_v40  ;;  %v3834_v34 = vrot.slane %v1118_v26, %v6933_v48  ;;  %v291_v26 = vld [vmem:[%s10937_s0 + $0x8a0] sm:$0xff] }
 0x21a   :  { %v1356_v37 = vsel %vm527_vm0, %v291_v26, 0.0 }
 0x21b   :  { %v3835_v38 = vsel %vm2864_vm4, %v3834_v34, %v3830_v24  ;;  %1336 = vadd.xlane.f32.xlu1 %v1335_v27  ;;  %1333 = vadd.xlane.f32.xlu0 %v1332_v28  ;;  %v292_v24 = vld [vmem:[%s10937_s0 + $0x8a8] sm:$0xff] }
 0x21c   :  { %v1127_v39 = vpop.xlane.xlu1 %1126  ;;  %v3840_v41 = vsel %vm2871_vm5, %v3839_v33, %v3835_v38  ;;  %v1124_v43 = vpop.xlane.xlu0 %1123  ;;  %v1359_v36 = vsel %vm527_vm0, %v292_v24, 0.0  ;;  %v2065_v24 = vld [vmem:[%s10938_s1 + $0x8] sm:$0xff] }
 0x21d   :  { %v3849_v49 = vrot.slane %v1127_v39, %v6941_v56  ;;  %v3844_v53 = vrot.slane %v1124_v43, %v6944_v57  ;;  %v293_v43 = vld [vmem:[%s10937_s0 + $0x8b0] sm:$0xff] }
 0x21e   :  { %v1362_v60 = vsel %vm527_vm0, %v293_v43, 0.0  ;;  %v300_v43 = vld [vmem:[%s10937_s0 + $0x8e8] sm:$0xff] }
 0x21f   :  { %v3845_v15 = vsel %vm2878_vm6, %v3844_v53, %v3840_v41  ;;  %1342 = vadd.xlane.f32.xlu1 %v1341_v45  ;;  %1339 = vadd.xlane.f32.xlu0 %v1338_v47  ;;  %v294_v41 = vld [vmem:[%s10937_s0 + $0x8b8] sm:$0xff] }
 0x220   :  { %v1133_v62 = vpop.xlane.xlu1 %1132  ;;  %v3850_v0 = vsel %vm2885_vm7, %v3849_v49, %v3845_v15  ;;  %v1130_v3 = vpop.xlane.xlu0 %1129  ;;  %v1365_v54 = vsel %vm527_vm0, %v294_v41, 0.0 }
 0x221   :  { %v3859_v5 = vrot.slane %v1133_v62, %v6962_v7  ;;  %v3854_v6 = vrot.slane %v1130_v3, %v6974_v13  ;;  %v295_v3 = vld [vmem:[%s10937_s0 + $0x8c0] sm:$0xff] }
 0x222   :  { %v1368_v8 = vsel %vm527_vm0, %v295_v3, 0.0  ;;  %v1383_v3 = vsel %vm527_vm0, %v300_v43, 0.0  ;;  %v2070_v43 = vld [vmem:[%s10938_s1 + $0x30] sm:$0xff] }
 0x223   :  { %v3855_v11 = vsel %vm10942_vm8, %v3854_v6, %v3850_v0  ;;  %1348 = vadd.xlane.f32.xlu1 %v1347_v18  ;;  %1345 = vadd.xlane.f32.xlu0 %v1344_v4  ;;  %v296_v0 = vld [vmem:[%s10937_s0 + $0x8c8] sm:$0xff] }
 0x224   :  { %v1139_v12 = vpop.xlane.xlu1 %1138  ;;  %v3860_v14 = vsel %vm2899_vm9, %v3859_v5, %v3855_v11  ;;  %v1136_v16 = vpop.xlane.xlu0 %1135  ;;  %v1371_v6 = vsel %vm527_vm0, %v296_v0, 0.0  ;;  %v2081_v11 = vld [vmem:[%s10938_s1 + $0x88] sm:$0xff] }
 0x225   :  { %v3869_v21 = vrot.slane %v1139_v12, %v6982_v23  ;;  %v3864_v22 = vrot.slane %v1136_v16, %v6994_v29 }
 0x227   :  { %v3865_v27 = vsel %vm10943_vm10, %v3864_v22, %v3860_v14  ;;  %1354 = vadd.xlane.f32.xlu1 %v1353_v19  ;;  %1351 = vadd.xlane.f32.xlu0 %v1350_v20  ;;  %v298_v19 = vld [vmem:[%s10937_s0 + $0x8d8] sm:$0xff]  ;;  %v297_v20 = vld [vmem:[%s10937_s0 + $0x8d0] sm:$0xff]  ;;  %v2064_v22 = vld [vmem:[%s10938_s1] sm:$0xff] }
 0x228   :  { %v1145_v28 = vpop.xlane.xlu1 %1144  ;;  %v3870_v33 = vsel %vm2913_vm11, %v3869_v21, %v3865_v27  ;;  %v1142_v34 = vpop.xlane.xlu0 %1141  ;;  %v6290_v21 = vpack.c.bf16 %v2081_v11, %v2080_v9  ;;  %v6292_v27 = vpack.c.bf16 %v2065_v24, %v2064_v22  ;;  %v302_v9 = vld [vmem:[%s10937_s0 + $0x8f8] sm:$0xff]  ;;  %v301_v11 = vld [vmem:[%s10937_s0 + $0x8f0] sm:$0xff] }
 0x229   :  { %v3879_v38 = vrot.slane %v1145_v28, %v7008_v46  ;;  %v3874_v39 = vrot.slane %v1142_v34, %v7002_v42  ;;  %v1377_v34 = vsel %vm527_vm0, %v298_v19, 0.0  ;;  %v2069_v19 = vld [vmem:[%s10938_s1 + $0x28] sm:$0xff] }
 0x22a   :  { %6291 = vmatprep.subr.bf16.mxu0 %v6290_v21 }
 0x22b   :  { %v3875_v45 = vsel %vm10941_vm12, %v3874_v39, %v3870_v33  ;;  %1360 = vadd.xlane.f32.xlu1 %v1359_v36  ;;  %1357 = vadd.xlane.f32.xlu0 %v1356_v37  ;;  %v1374_v36 = vsel %vm527_vm0, %v297_v20, 0.0  ;;  %v2082_v37 = vld [vmem:[%s10938_s1 + $0x90] sm:$0xff] }
 0x22c   :  { %v1151_v47 = vpop.xlane.xlu1 %1150  ;;  %v3880_v49 = vsel %vm2927_vm13, %v3879_v38, %v3875_v45  ;;  %v1148_v53 = vpop.xlane.xlu0 %1147  ;;  %v2083_v38 = vld [vmem:[%s10938_s1 + $0x98] sm:$0xff]  ;;  %v299_v45 = vld [vmem:[%s10937_s0 + $0x8e0] sm:$0xff]  ;;  %6293 = vmatpush3.bf16.msra.mxu0 %v6292_v27  ;;  %v1389_v27 = vsel %vm527_vm0, %v302_v9, 0.0 }
 0x22d   :  { %v3889_v15 = vrot.slane %v1151_v47, %v7027_v61  ;;  %v3884_v62 = vrot.slane %v1148_v53, %v7022_v59  ;;  %v6294_v47 = vpack.c.bf16 %v2083_v38, %v2082_v37  ;;  %v2067_v53 = vld [vmem:[%s10938_s1 + $0x18] sm:$0xff]  ;;  %v304_v38 = vld [vmem:[%s10937_s0 + $0x908] sm:$0xff]  ;;  %v2072_v9 = vld [vmem:[%s10938_s1 + $0x40] sm:$0xff] }
 0x22f   :  { %v3885_v18 = vsel %vm2934_vm14, %v3884_v62, %v3880_v49  ;;  %1366 = vadd.xlane.f32.xlu1 %v1365_v54  ;;  %1363 = vadd.xlane.f32.xlu0 %v1362_v60  ;;  %v2066_v49 = vld [vmem:[%s10938_s1 + $0x10] sm:$0xff] }
 0x230   :  { %v1157_v4 = vpop.xlane.xlu1 %1156  ;;  %v1154_v5 = vpop.xlane.xlu0 %1153  ;;  %v8221_v12 = vsel %vm2941_vm15, %v3889_v15, %v3885_v18  ;;  %v6296_v60 = vpack.c.bf16 %v2067_v53, %v2066_v49  ;;  %v1380_v18 = vsel %vm527_vm0, %v299_v45, 0.0  ;;  %6295 = vmatprep.subr.bf16.mxu0 %v6294_v47  ;;  %v2071_v45 = vld [vmem:[%s10938_s1 + $0x38] sm:$0xff] }
 0x231   :  { %10957 = vst [vmem:[#allocation12_spill] sm:$0xff] %v8221_v12  ;;  %v3898_v14 = vrot.slane %v1157_v4, %v6907_v32  ;;  %v3894_v16 = vrot.slane %v1154_v5, %v6901_v30  ;;  %v2084_v4 = vld [vmem:[%s10938_s1 + $0xa0] sm:$0xff]  ;;  %v2085_v5 = vld [vmem:[%s10938_s1 + $0xa8] sm:$0xff]  ;;  %v6304_v49 = vpack.c.bf16 %v2071_v45, %v2070_v43 }
 0x232   :  { %6297 = vmatpush3.bf16.msra.mxu0 %v6296_v60  ;;  %v444_v12 = vld [vmem:[%s10937_s0 + $0xd68] sm:$0xff] }
 0x233   :  { %v3899_v26 = vsel %vm2843_vm1, %v3898_v14, %v3894_v16  ;;  %1372 = vadd.xlane.f32.xlu1 %v1371_v6  ;;  %1369 = vadd.xlane.f32.xlu0 %v1368_v8  ;;  %v6298_v14 = vpack.c.bf16 %v2085_v5, %v2084_v4  ;;  %v2068_v16 = vld [vmem:[%s10938_s1 + $0x20] sm:$0xff]  ;;  %v306_v5 = vld [vmem:[%s10937_s0 + $0x918] sm:$0xff]  ;;  %v1815_v51 = vsel %vm527_vm0, %v444_v12, 0.0 }
 0x234   :  { %v1163_v28 = vpop.xlane.xlu1 %1162  ;;  %v1160_v33 = vpop.xlane.xlu0 %1159  ;;  %v6300_v21 = vpack.c.bf16 %v2069_v19, %v2068_v16 }
 0x235   :  { %v3908_v39 = vrot.slane %v1163_v28, %v6904_v31  ;;  %v3903_v41 = vrot.slane %v1160_v33, %v6914_v35  ;;  %v1386_v28 = vsel %vm527_vm0, %v301_v11, 0.0  ;;  %6299 = vmatprep.subr.bf16.mxu0 %v6298_v14  ;;  %v2086_v33 = vld [vmem:[%s10938_s1 + $0xb0] sm:$0xff]  ;;  %v2073_v11 = vld [vmem:[%s10938_s1 + $0x48] sm:$0xff] }
 0x236   :  { %6301 = vmatpush3.bf16.msra.mxu0 %v6300_v21  ;;  %v6308_v16 = vpack.c.bf16 %v2073_v11, %v2072_v9 }
 0x237   :  { %v3904_v54 = vsel %vm2850_vm2, %v3903_v41, %v3899_v26  ;;  %1378 = vadd.xlane.f32.xlu1 %v1377_v34  ;;  %1375 = vadd.xlane.f32.xlu0 %v1374_v36  ;;  %v2087_v34 = vld [vmem:[%s10938_s1 + $0xb8] sm:$0xff] }
 0x238   :  { %v1169_v15 = vpop.xlane.xlu1 %1168  ;;  %v3909_v62 = vsel %vm2857_vm3, %v3908_v39, %v3904_v54  ;;  %v1166_v0 = vpop.xlane.xlu0 %1165  ;;  %v303_v39 = vld [vmem:[%s10937_s0 + $0x900] sm:$0xff]  ;;  %v6302_v41 = vpack.c.bf16 %v2087_v34, %v2086_v33  ;;  %v308_v34 = vld [vmem:[%s10937_s0 + $0x928] sm:$0xff] }
 0x239   :  { %v3918_v6 = vrot.slane %v1169_v15, %v6919_v40  ;;  %v3913_v8 = vrot.slane %v1166_v0, %v6933_v48  ;;  %v1395_v15 = vsel %vm527_vm0, %v304_v38, 0.0  ;;  %v2088_v0 = vld [vmem:[%s10938_s1 + $0xc0] sm:$0xff]  ;;  %v2074_v38 = vld [vmem:[%s10938_s1 + $0x50] sm:$0xff] }
 0x23a   :  { %6303 = vmatprep.subr.bf16.mxu0 %v6302_v41 }
 0x23b   :  { %v3914_v20 = vsel %vm2864_vm4, %v3913_v8, %v3909_v62  ;;  %1384 = vadd.xlane.f32.xlu1 %v1383_v3  ;;  %1381 = vadd.xlane.f32.xlu0 %v1380_v18  ;;  %v1392_v62 = vsel %vm527_vm0, %v303_v39, 0.0  ;;  %v2089_v3 = vld [vmem:[%s10938_s1 + $0xc8] sm:$0xff]  ;;  %v2075_v39 = vld [vmem:[%s10938_s1 + $0x58] sm:$0xff] }
 0x23c   :  { %v1175_v22 = vpop.xlane.xlu1 %1174  ;;  %v3919_v24 = vsel %vm2871_vm5, %v3918_v6, %v3914_v20  ;;  %v1172_v26 = vpop.xlane.xlu0 %1171  ;;  %v305_v6 = vld [vmem:[%s10937_s0 + $0x910] sm:$0xff]  ;;  %6305 = vmatpush3.bf16.msra.mxu0 %v6304_v49  ;;  %v6306_v8 = vpack.c.bf16 %v2089_v3, %v2088_v0  ;;  %v6312_v43 = vpack.c.bf16 %v2075_v39, %v2074_v38  ;;  %v310_v3 = vld [vmem:[%s10937_s0 + $0x938] sm:$0xff] }
 0x23d   :  { %v3928_v36 = vrot.slane %v1175_v22, %v6941_v56  ;;  %v3923_v37 = vrot.slane %v1172_v26, %v6944_v57  ;;  %v1401_v22 = vsel %vm527_vm0, %v306_v5, 0.0  ;;  %v2090_v26 = vld [vmem:[%s10938_s1 + $0xd0] sm:$0xff]  ;;  %v2076_v5 = vld [vmem:[%s10938_s1 + $0x60] sm:$0xff] }
 0x23e   :  { %6307 = vmatprep.subr.bf16.mxu0 %v6306_v8 }
 0x23f   :  { %v3924_v47 = vsel %vm2878_vm6, %v3923_v37, %v3919_v24  ;;  %1390 = vadd.xlane.f32.xlu1 %v1389_v27  ;;  %1387 = vadd.xlane.f32.xlu0 %v1386_v28  ;;  %v1398_v24 = vsel %vm527_vm0, %v305_v6, 0.0  ;;  %v2091_v27 = vld [vmem:[%s10938_s1 + $0xd8] sm:$0xff]  ;;  %v2077_v6 = vld [vmem:[%s10938_s1 + $0x68] sm:$0xff] }
 0x240   :  { %v1181_v53 = vpop.xlane.xlu1 %1180  ;;  %v3929_v54 = vsel %vm2885_vm7, %v3928_v36, %v3924_v47  ;;  %v1178_v60 = vpop.xlane.xlu0 %1177  ;;  %v307_v36 = vld [vmem:[%s10937_s0 + $0x920] sm:$0xff]  ;;  %6309 = vmatpush3.bf16.msra.mxu0 %v6308_v16  ;;  %v6310_v37 = vpack.c.bf16 %v2091_v27, %v2090_v26  ;;  %v6316_v9 = vpack.c.bf16 %v2077_v6, %v2076_v5  ;;  %v1413_v16 = vsel %vm527_vm0, %v310_v3, 0.0  ;;  %v312_v27 = vld [vmem:[%s10937_s0 + $0x948] sm:$0xff] }
 0x241   :  { %v3938_v18 = vrot.slane %v1181_v53, %v6962_v7  ;;  %v3933_v4 = vrot.slane %v1178_v60, %v6974_v13  ;;  %v1407_v53 = vsel %vm527_vm0, %v308_v34, 0.0  ;;  %v2092_v60 = vld [vmem:[%s10938_s1 + $0xe0] sm:$0xff]  ;;  %v2078_v34 = vld [vmem:[%s10938_s1 + $0x70] sm:$0xff]  ;;  %v316_v6 = vld [vmem:[%s10937_s0 + $0x968] sm:$0xff] }
 0x242   :  { %6311 = vmatprep.subr.bf16.mxu0 %v6310_v37 }
 0x243   :  { %v3934_v14 = vsel %vm10942_vm8, %v3933_v4, %v3929_v54  ;;  %1396 = vadd.xlane.f32.xlu1 %v1395_v15  ;;  %1393 = vadd.xlane.f32.xlu0 %v1392_v62  ;;  %v1404_v54 = vsel %vm527_vm0, %v307_v36, 0.0  ;;  %v2093_v15 = vld [vmem:[%s10938_s1 + $0xe8] sm:$0xff]  ;;  %v2079_v36 = vld [vmem:[%s10938_s1 + $0x78] sm:$0xff] }
 0x244   :  { %v1187_v19 = vpop.xlane.xlu1 %1186  ;;  %v3939_v20 = vsel %vm2899_vm9, %v3938_v18, %v3934_v14  ;;  %v1184_v21 = vpop.xlane.xlu0 %1183  ;;  %v309_v18 = vld [vmem:[%s10937_s0 + $0x930] sm:$0xff]  ;;  %6313 = vmatpush3.bf16.msra.mxu0 %v6312_v43  ;;  %v6314_v4 = vpack.c.bf16 %v2093_v15, %v2092_v60  ;;  %v6320_v37 = vpack.c.bf16 %v2079_v36, %v2078_v34  ;;  %v1419_v43 = vsel %vm527_vm0, %v312_v27, 0.0 }
 0x245   :  { %v3948_v28 = vrot.slane %v1187_v19, %v6982_v23  ;;  %v3943_v33 = vrot.slane %v1184_v21, %v6994_v29  ;;  %v1410_v19 = vsel %vm527_vm0, %v309_v18, 0.0  ;;  %v2095_v21 = vld [vmem:[%s10938_s1 + $0xf8] sm:$0xff]  ;;  %v313_v60 = vld [vmem:[%s10937_s0 + $0x950] sm:$0xff] }
 0x246   :  { %6315 = vmatprep.subr.bf16.mxu0 %v6314_v4  ;;  %v1422_v18 = vsel %vm527_vm0, %v313_v60, 0.0 }
 0x247   :  { %v3944_v41 = vsel %vm10943_vm10, %v3943_v33, %v3939_v20  ;;  %1402 = vadd.xlane.f32.xlu1 %v1401_v22  ;;  %1399 = vadd.xlane.f32.xlu0 %v1398_v24  ;;  %v2094_v20 = vld [vmem:[%s10938_s1 + $0xf0] sm:$0xff] }
 0x248   :  { %v1193_v45 = vpop.xlane.xlu1 %1192  ;;  %v3949_v47 = vsel %vm2913_vm11, %v3948_v28, %v3944_v41  ;;  %v1190_v49 = vpop.xlane.xlu0 %1189  ;;  %v311_v28 = vld [vmem:[%s10937_s0 + $0x940] sm:$0xff]  ;;  %6317 = vmatpush3.bf16.msra.mxu0 %v6316_v9  ;;  %v6318_v33 = vpack.c.bf16 %v2095_v21, %v2094_v20 }
 0x249   :  { %v3958_v62 = vrot.slane %v1193_v45, %v7008_v46  ;;  %v3953_v0 = vrot.slane %v1190_v49, %v7002_v42  ;;  %v1416_v45 = vsel %vm527_vm0, %v311_v28, 0.0 }
 0x24a   :  { %6319 = vmatprep.subr.bf16.mxu0 %v6318_v33 }
 0x24b   :  { %v3954_v8 = vsel %vm10941_vm12, %v3953_v0, %v3949_v47  ;;  %1408 = vadd.xlane.f32.xlu1 %v1407_v53  ;;  %1405 = vadd.xlane.f32.xlu0 %v1404_v54  ;;  %v314_v54 = vld [vmem:[%s10937_s0 + $0x958] sm:$0xff] }
 0x24c   :  { %v1199_v11 = vpop.xlane.xlu1 %1198  ;;  %v1196_v14 = vpop.xlane.xlu0 %1195  ;;  %v3959_v22 = vsel %vm2927_vm13, %v3958_v62, %v3954_v8  ;;  %6321 = vmatpush3.bf16.msra.mxu0 %v6320_v37  ;;  %v1425_v3 = vsel %vm527_vm0, %v314_v54, 0.0  ;;  %v315_v8 = vld [vmem:[%s10937_s0 + $0x960] sm:$0xff] }
 0x24d   :  { %v3968_v24 = vrot.slane %v1199_v11, %v7027_v61  ;;  %v3963_v26 = vrot.slane %v1196_v14, %v7022_v59  ;;  %v1428_v20 = vsel %vm527_vm0, %v315_v8, 0.0 }
 0x24f   :  { %1414 = vadd.xlane.f32.xlu1 %v1413_v16  ;;  %1411 = vadd.xlane.f32.xlu0 %v1410_v19  ;;  %v3964_v38 = vsel %vm2934_vm14, %v3963_v26, %v3959_v22  ;;  %v1431_v19 = vsel %vm527_vm0, %v316_v6, 0.0  ;;  %v317_v26 = vld [vmem:[%s10937_s0 + $0x970] sm:$0xff] }
 0x250   :  { %v1205_v39 = vpop.xlane.xlu1 %1204  ;;  %v1202_v41 = vpop.xlane.xlu0 %1201  ;;  %v8408_v47 = vsel %vm2941_vm15, %v3968_v24, %v3964_v38  ;;  %v318_v24 = vld [vmem:[%s10937_s0 + $0x978] sm:$0xff]  ;;  %v1434_v37 = vsel %vm527_vm0, %v317_v26, 0.0 }
 0x251   :  { %10958 = vst [vmem:[#allocation13_spill] sm:$0xff] %v8408_v47  ;;  %v3977_v49 = vrot.slane %v1205_v39, %v6907_v32  ;;  %v3973_v53 = vrot.slane %v1202_v41, %v6901_v30  ;;  %v1437_v36 = vsel %vm527_vm0, %v318_v24, 0.0  ;;  %v320_v41 = vld [vmem:[%s10937_s0 + $0x988] sm:$0xff] }
 0x252   :  { %v1443_v60 = vsel %vm527_vm0, %v320_v41, 0.0 }
 0x253   :  { %v3978_v15 = vsel %vm2843_vm1, %v3977_v49, %v3973_v53  ;;  %1420 = vadd.xlane.f32.xlu1 %v1419_v43  ;;  %1417 = vadd.xlane.f32.xlu0 %v1416_v45  ;;  %v319_v43 = vld [vmem:[%s10937_s0 + $0x980] sm:$0xff] }
 0x254   :  { %v1211_v62 = vpop.xlane.xlu1 %1210  ;;  %v1208_v0 = vpop.xlane.xlu0 %1207 }
 0x255   :  { %v3987_v4 = vrot.slane %v1211_v62, %v6904_v31  ;;  %v3982_v5 = vrot.slane %v1208_v0, %v6914_v35 }
 0x257   :  { %v3983_v9 = vsel %vm2850_vm2, %v3982_v5, %v3978_v15  ;;  %1426 = vadd.xlane.f32.xlu1 %v1425_v3  ;;  %1423 = vadd.xlane.f32.xlu0 %v1422_v18  ;;  %v1440_v15 = vsel %vm527_vm0, %v319_v43, 0.0  ;;  %v322_v3 = vld [vmem:[%s10937_s0 + $0x998] sm:$0xff]  ;;  %v321_v18 = vld [vmem:[%s10937_s0 + $0x990] sm:$0xff] }
 0x258   :  { %v1217_v11 = vpop.xlane.xlu1 %1216  ;;  %v3988_v14 = vsel %vm2857_vm3, %v3987_v4, %v3983_v9  ;;  %v1214_v16 = vpop.xlane.xlu0 %1213  ;;  %v1449_v9 = vsel %vm527_vm0, %v322_v3, 0.0 }
 0x259   :  { %v3997_v21 = vrot.slane %v1217_v11, %v6919_v40  ;;  %v3992_v22 = vrot.slane %v1214_v16, %v6933_v48  ;;  %v1446_v11 = vsel %vm527_vm0, %v321_v18, 0.0 }
 0x25b   :  { %v3993_v27 = vsel %vm2864_vm4, %v3992_v22, %v3988_v14  ;;  %1432 = vadd.xlane.f32.xlu1 %v1431_v19  ;;  %1429 = vadd.xlane.f32.xlu0 %v1428_v20  ;;  %v324_v19 = vld [vmem:[%s10937_s0 + $0x9a8] sm:$0xff]  ;;  %v323_v20 = vld [vmem:[%s10937_s0 + $0x9a0] sm:$0xff] }
 0x25c   :  { %v1223_v28 = vpop.xlane.xlu1 %1222  ;;  %v3998_v33 = vsel %vm2871_vm5, %v3997_v21, %v3993_v27  ;;  %v1220_v34 = vpop.xlane.xlu0 %1219  ;;  %v1455_v27 = vsel %vm527_vm0, %v324_v19, 0.0 }
 0x25d   :  { %v4007_v38 = vrot.slane %v1223_v28, %v6941_v56  ;;  %v4002_v39 = vrot.slane %v1220_v34, %v6944_v57  ;;  %v1452_v28 = vsel %vm527_vm0, %v323_v20, 0.0  ;;  %v2096_v20 = vld [vmem:[%s10938_s1 + $0x100] sm:$0xff] }
 0x25f   :  { %v4003_v45 = vsel %vm2878_vm6, %v4002_v39, %v3998_v33  ;;  %1438 = vadd.xlane.f32.xlu1 %v1437_v36  ;;  %1435 = vadd.xlane.f32.xlu0 %v1434_v37  ;;  %v326_v36 = vld [vmem:[%s10937_s0 + $0x9b8] sm:$0xff]  ;;  %v325_v37 = vld [vmem:[%s10937_s0 + $0x9b0] sm:$0xff] }
 0x260   :  { %v1229_v49 = vpop.xlane.xlu1 %1228  ;;  %v4008_v53 = vsel %vm2885_vm7, %v4007_v38, %v4003_v45  ;;  %v1226_v54 = vpop.xlane.xlu0 %1225  ;;  %v1461_v45 = vsel %vm527_vm0, %v326_v36, 0.0 }
 0x261   :  { %v4017_v62 = vrot.slane %v1229_v49, %v6962_v7  ;;  %v4012_v0 = vrot.slane %v1226_v54, %v6974_v13  ;;  %v1458_v49 = vsel %vm527_vm0, %v325_v37, 0.0 }
 0x263   :  { %v4013_v4 = vsel %vm10942_vm8, %v4012_v0, %v4008_v53  ;;  %1444 = vadd.xlane.f32.xlu1 %v1443_v60  ;;  %1441 = vadd.xlane.f32.xlu0 %v1440_v15  ;;  %v328_v60 = vld [vmem:[%s10937_s0 + $0x9c8] sm:$0xff]  ;;  %v327_v15 = vld [vmem:[%s10937_s0 + $0x9c0] sm:$0xff] }
 0x264   :  { %v1235_v5 = vpop.xlane.xlu1 %1234  ;;  %v4018_v6 = vsel %vm2899_vm9, %v4017_v62, %v4013_v4  ;;  %v1232_v8 = vpop.xlane.xlu0 %1231  ;;  %v1467_v18 = vsel %vm527_vm0, %v328_v60, 0.0  ;;  %v1464_v4 = vsel %vm527_vm0, %v327_v15, 0.0 }
 0x265   :  { %v4027_v14 = vrot.slane %v1235_v5, %v6982_v23  ;;  %v4022_v16 = vrot.slane %v1232_v8, %v6994_v29  ;;  %v330_v5 = vld [vmem:[%s10937_s0 + $0x9d8] sm:$0xff] }
 0x267   :  { %v4023_v21 = vsel %vm10943_vm10, %v4022_v16, %v4018_v6  ;;  %1450 = vadd.xlane.f32.xlu1 %v1449_v9  ;;  %1447 = vadd.xlane.f32.xlu0 %v1446_v11  ;;  %v329_v11 = vld [vmem:[%s10937_s0 + $0x9d0] sm:$0xff]  ;;  %v2113_v16 = vld [vmem:[%s10938_s1 + $0x188] sm:$0xff] }
 0x268   :  { %v1241_v22 = vpop.xlane.xlu1 %1240  ;;  %v4028_v24 = vsel %vm2913_vm11, %v4027_v14, %v4023_v21  ;;  %v1238_v26 = vpop.xlane.xlu0 %1237  ;;  %v2112_v14 = vld [vmem:[%s10938_s1 + $0x180] sm:$0xff] }
 0x269   :  { %v4037_v33 = vrot.slane %v1241_v22, %v7008_v46  ;;  %v4032_v34 = vrot.slane %v1238_v26, %v7002_v42  ;;  %v6322_v19 = vpack.c.bf16 %v2113_v16, %v2112_v14  ;;  %v2097_v22 = vld [vmem:[%s10938_s1 + $0x108] sm:$0xff]  ;;  %v2100_v16 = vld [vmem:[%s10938_s1 + $0x120] sm:$0xff] }
 0x26b   :  { %v4033_v38 = vsel %vm10941_vm12, %v4032_v34, %v4028_v24  ;;  %1456 = vadd.xlane.f32.xlu1 %v1455_v27  ;;  %1453 = vadd.xlane.f32.xlu0 %v1452_v28  ;;  %v1473_v27 = vsel %vm527_vm0, %v330_v5, 0.0  ;;  %v1470_v28 = vsel %vm527_vm0, %v329_v11, 0.0  ;;  %v6324_v34 = vpack.c.bf16 %v2097_v22, %v2096_v20  ;;  %v2117_v11 = vld [vmem:[%s10938_s1 + $0x1a8] sm:$0xff] }
 0x26c   :  { %v1247_v39 = vpop.xlane.xlu1 %1246  ;;  %v4038_v41 = vsel %vm2927_vm13, %v4037_v33, %v4033_v38  ;;  %v1244_v43 = vpop.xlane.xlu0 %1243  ;;  %v332_v33 = vld [vmem:[%s10937_s0 + $0x9e8] sm:$0xff]  ;;  %6323 = vmatprep.subr.bf16.mxu1 %v6322_v19  ;;  %v331_v38 = vld [vmem:[%s10937_s0 + $0x9e0] sm:$0xff] }
 0x26d   :  { %v4047_v53 = vrot.slane %v1247_v39, %v7027_v61  ;;  %v4042_v54 = vrot.slane %v1244_v43, %v7022_v59  ;;  %v2114_v39 = vld [vmem:[%s10938_s1 + $0x190] sm:$0xff]  ;;  %6325 = vmatpush3.bf16.msra.mxu1 %v6324_v34  ;;  %v2101_v20 = vld [vmem:[%s10938_s1 + $0x128] sm:$0xff] }
 0x26f   :  { %v4043_v62 = vsel %vm2934_vm14, %v4042_v54, %v4038_v41  ;;  %1462 = vadd.xlane.f32.xlu1 %v1461_v45  ;;  %1459 = vadd.xlane.f32.xlu0 %v1458_v49  ;;  %v2115_v41 = vld [vmem:[%s10938_s1 + $0x198] sm:$0xff]  ;;  %v2098_v45 = vld [vmem:[%s10938_s1 + $0x110] sm:$0xff] }
 0x270   :  { %v1253_v0 = vpop.xlane.xlu1 %1252  ;;  %v1250_v3 = vpop.xlane.xlu0 %1249  ;;  %v8508_v6 = vsel %vm2941_vm15, %v4047_v53, %v4043_v62  ;;  %v6326_v43 = vpack.c.bf16 %v2115_v41, %v2114_v39  ;;  %v2099_v53 = vld [vmem:[%s10938_s1 + $0x118] sm:$0xff]  ;;  %v1479_v62 = vsel %vm527_vm0, %v332_v33, 0.0  ;;  %v6332_v33 = vpack.c.bf16 %v2101_v20, %v2100_v16 }
 0x271   :  { %10959 = vst [vmem:[#allocation14_spill] sm:$0xff] %v8508_v6  ;;  %v4056_v8 = vrot.slane %v1253_v0, %v6907_v32  ;;  %v4052_v9 = vrot.slane %v1250_v3, %v6901_v30  ;;  %v1476_v0 = vsel %vm527_vm0, %v331_v38, 0.0  ;;  %v334_v3 = vld [vmem:[%s10937_s0 + $0x9f8] sm:$0xff]  ;;  %v2118_v38 = vld [vmem:[%s10938_s1 + $0x1b0] sm:$0xff] }
 0x272   :  { %6327 = vmatprep.subr.bf16.mxu1 %v6326_v43  ;;  %v2119_v39 = vld [vmem:[%s10938_s1 + $0x1b8] sm:$0xff]  ;;  %v2102_v43 = vld [vmem:[%s10938_s1 + $0x130] sm:$0xff] }
 0x273   :  { %v4057_v21 = vsel %vm2843_vm1, %v4056_v8, %v4052_v9  ;;  %1468 = vadd.xlane.f32.xlu1 %v1467_v18  ;;  %1465 = vadd.xlane.f32.xlu0 %v1464_v4  ;;  %v6328_v18 = vpack.c.bf16 %v2099_v53, %v2098_v45  ;;  %v333_v8 = vld [vmem:[%s10937_s0 + $0x9f0] sm:$0xff]  ;;  %v2116_v9 = vld [vmem:[%s10938_s1 + $0x1a0] sm:$0xff]  ;;  %v6334_v41 = vpack.c.bf16 %v2119_v39, %v2118_v38  ;;  %v2123_v38 = vld [vmem:[%s10938_s1 + $0x1d8] sm:$0xff] }
 0x274   :  { %v1259_v24 = vpop.xlane.xlu1 %1258  ;;  %v1256_v26 = vpop.xlane.xlu0 %1255  ;;  %v6330_v14 = vpack.c.bf16 %v2117_v11, %v2116_v9  ;;  %v2121_v9 = vld [vmem:[%s10938_s1 + $0x1c8] sm:$0xff] }
 0x275   :  { %v4066_v36 = vrot.slane %v1259_v24, %v6904_v31  ;;  %v4061_v37 = vrot.slane %v1256_v26, %v6914_v35  ;;  %6329 = vmatpush3.bf16.msra.mxu1 %v6328_v18  ;;  %v1485_v26 = vsel %vm527_vm0, %v334_v3, 0.0 }
 0x276   :  { %6331 = vmatprep.subr.bf16.mxu1 %v6330_v14  ;;  %v2104_v14 = vld [vmem:[%s10938_s1 + $0x140] sm:$0xff] }
 0x277   :  { %v4062_v49 = vsel %vm2850_vm2, %v4061_v37, %v4057_v21  ;;  %1474 = vadd.xlane.f32.xlu1 %v1473_v27  ;;  %1471 = vadd.xlane.f32.xlu0 %v1470_v28  ;;  %v1482_v27 = vsel %vm527_vm0, %v333_v8, 0.0  ;;  %v336_v28 = vld [vmem:[%s10937_s0 + $0xa08] sm:$0xff]  ;;  %v335_v37 = vld [vmem:[%s10937_s0 + $0xa00] sm:$0xff] }
 0x278   :  { %v1265_v54 = vpop.xlane.xlu1 %1264  ;;  %v4067_v60 = vsel %vm2857_vm3, %v4066_v36, %v4062_v49  ;;  %v1262_v15 = vpop.xlane.xlu0 %1261  ;;  %v2103_v49 = vld [vmem:[%s10938_s1 + $0x138] sm:$0xff]  ;;  %v2120_v8 = vld [vmem:[%s10938_s1 + $0x1c0] sm:$0xff] }
 0x279   :  { %v4076_v4 = vrot.slane %v1265_v54, %v6919_v40  ;;  %v4071_v5 = vrot.slane %v1262_v15, %v6933_v48  ;;  %6333 = vmatpush3.bf16.msra.mxu1 %v6332_v33  ;;  %v1491_v15 = vsel %vm527_vm0, %v336_v28, 0.0  ;;  %v6336_v3 = vpack.c.bf16 %v2103_v49, %v2102_v43 }
 0x27a   :  { %6335 = vmatprep.subr.bf16.mxu1 %v6334_v41  ;;  %v6338_v11 = vpack.c.bf16 %v2121_v9, %v2120_v8  ;;  %v2106_v41 = vld [vmem:[%s10938_s1 + $0x150] sm:$0xff]  ;;  %v2125_v8 = vld [vmem:[%s10938_s1 + $0x1e8] sm:$0xff] }
 0x27b   :  { %v4072_v19 = vsel %vm2864_vm4, %v4071_v5, %v4067_v60  ;;  %1480 = vadd.xlane.f32.xlu1 %v1479_v62  ;;  %1477 = vadd.xlane.f32.xlu0 %v1476_v0  ;;  %v1488_v62 = vsel %vm527_vm0, %v335_v37, 0.0  ;;  %v351_v0 = vld [vmem:[%s10937_s0 + $0xa80] sm:$0xff]  ;;  %v337_v5 = vld [vmem:[%s10937_s0 + $0xa10] sm:$0xff] }
 0x27c   :  { %v1271_v21 = vpop.xlane.xlu1 %1270  ;;  %v4077_v22 = vsel %vm2871_vm5, %v4076_v4, %v4072_v19  ;;  %v1268_v24 = vpop.xlane.xlu0 %1267  ;;  %v2105_v19 = vld [vmem:[%s10938_s1 + $0x148] sm:$0xff]  ;;  %v2122_v37 = vld [vmem:[%s10938_s1 + $0x1d0] sm:$0xff] }
 0x27d   :  { %v4086_v34 = vrot.slane %v1271_v21, %v6941_v56  ;;  %v4081_v36 = vrot.slane %v1268_v24, %v6944_v57  ;;  %6337 = vmatpush3.bf16.msra.mxu1 %v6336_v3  ;;  %v1536_v24 = vsel %vm527_vm0, %v351_v0, 0.0  ;;  %v6340_v28 = vpack.c.bf16 %v2105_v19, %v2104_v14 }
 0x27e   :  { %6339 = vmatprep.subr.bf16.mxu1 %v6338_v11  ;;  %v6342_v39 = vpack.c.bf16 %v2123_v38, %v2122_v37  ;;  %v2108_v11 = vld [vmem:[%s10938_s1 + $0x160] sm:$0xff]  ;;  %v2127_v37 = vld [vmem:[%s10938_s1 + $0x1f8] sm:$0xff] }
 0x27f   :  { %v4082_v45 = vsel %vm2878_vm6, %v4081_v36, %v4077_v22  ;;  %1486 = vadd.xlane.f32.xlu1 %v1485_v26  ;;  %1483 = vadd.xlane.f32.xlu0 %v1482_v27  ;;  %v1494_v26 = vsel %vm527_vm0, %v337_v5, 0.0  ;;  %v353_v27 = vld [vmem:[%s10937_s0 + $0xa90] sm:$0xff]  ;;  %v352_v36 = vld [vmem:[%s10937_s0 + $0xa88] sm:$0xff]  ;;  %v2124_v5 = vld [vmem:[%s10938_s1 + $0x1e0] sm:$0xff] }
 0x280   :  { %v1277_v53 = vpop.xlane.xlu1 %1276  ;;  %v4087_v54 = vsel %vm2885_vm7, %v4086_v34, %v4082_v45  ;;  %v1274_v60 = vpop.xlane.xlu0 %1273  ;;  %v2107_v45 = vld [vmem:[%s10938_s1 + $0x158] sm:$0xff]  ;;  %v6346_v9 = vpack.c.bf16 %v2125_v8, %v2124_v5  ;;  %v385_v8 = vld [vmem:[%s10937_s0 + $0xb90] sm:$0xff] }
 0x281   :  { %v4096_v18 = vrot.slane %v1277_v53, %v6962_v7  ;;  %v4091_v4 = vrot.slane %v1274_v60, %v6974_v13  ;;  %6341 = vmatpush3.bf16.msra.mxu1 %v6340_v28  ;;  %v1542_v60 = vsel %vm527_vm0, %v353_v27, 0.0  ;;  %v6344_v0 = vpack.c.bf16 %v2107_v45, %v2106_v41  ;;  %v2111_v41 = vld [vmem:[%s10938_s1 + $0x178] sm:$0xff] }
 0x282   :  { %6343 = vmatprep.subr.bf16.mxu1 %v6342_v39  ;;  %v2110_v39 = vld [vmem:[%s10938_s1 + $0x170] sm:$0xff] }
 0x283   :  { %v4092_v16 = vsel %vm10942_vm8, %v4091_v4, %v4087_v54  ;;  %1492 = vadd.xlane.f32.xlu1 %v1491_v15  ;;  %1489 = vadd.xlane.f32.xlu0 %v1488_v62  ;;  %v1539_v15 = vsel %vm527_vm0, %v352_v36, 0.0  ;;  %v383_v62 = vld [vmem:[%s10937_s0 + $0xb80] sm:$0xff]  ;;  %v354_v4 = vld [vmem:[%s10937_s0 + $0xa98] sm:$0xff]  ;;  %v2126_v36 = vld [vmem:[%s10938_s1 + $0x1f0] sm:$0xff] }
 0x284   :  { %v1283_v20 = vpop.xlane.xlu1 %1282  ;;  %v4097_v21 = vsel %vm2899_vm9, %v4096_v18, %v4092_v16  ;;  %v1280_v22 = vpop.xlane.xlu0 %1279  ;;  %v2109_v16 = vld [vmem:[%s10938_s1 + $0x168] sm:$0xff]  ;;  %v6350_v38 = vpack.c.bf16 %v2127_v37, %v2126_v36 }
 0x285   :  { %v4106_v33 = vrot.slane %v1283_v20, %v6982_v23  ;;  %v4101_v34 = vrot.slane %v1280_v22, %v6994_v29  ;;  %6345 = vmatpush3.bf16.msra.mxu1 %v6344_v0  ;;  %v1545_v22 = vsel %vm527_vm0, %v354_v4, 0.0  ;;  %v355_v0 = vld [vmem:[%s10937_s0 + $0xaa0] sm:$0xff] }
 0x286   :  { %6347 = vmatprep.subr.bf16.mxu1 %v6346_v9  ;;  %v1548_v5 = vsel %vm527_vm0, %v355_v0, 0.0  ;;  %v368_v9 = vld [vmem:[%s10937_s0 + $0xb08] sm:$0xff]  ;;  %v370_v0 = vld [vmem:[%s10937_s0 + $0xb18] sm:$0xff] }
 0x287   :  { %v4102_v43 = vsel %vm10943_vm10, %v4101_v34, %v4097_v21  ;;  %1537 = vadd.xlane.f32.xlu1 %v1536_v24  ;;  %1495 = vadd.xlane.f32.xlu0 %v1494_v26  ;;  %v1632_v21 = vsel %vm527_vm0, %v383_v62, 0.0  ;;  %v338_v24 = vld [vmem:[%s10937_s0 + $0xa18] sm:$0xff]  ;;  %v6348_v26 = vpack.c.bf16 %v2109_v16, %v2108_v11  ;;  %v384_v34 = vld [vmem:[%s10937_s0 + $0xb88] sm:$0xff]  ;;  %v367_v62 = vld [vmem:[%s10937_s0 + $0xb00] sm:$0xff]  ;;  %v1638_v16 = vsel %vm527_vm0, %v385_v8, 0.0 }
 0x288   :  { %v1289_v49 = vpop.xlane.xlu1 %1288  ;;  %v4107_v53 = vsel %vm2913_vm11, %v4106_v33, %v4102_v43  ;;  %v1286_v54 = vpop.xlane.xlu0 %1285  ;;  %v6352_v43 = vpack.c.bf16 %v2111_v41, %v2110_v39  ;;  %v1584_v4 = vsel %vm527_vm0, %v367_v62, 0.0  ;;  %v357_v39 = vld [vmem:[%s10937_s0 + $0xab0] sm:$0xff]  ;;  %v340_v41 = vld [vmem:[%s10937_s0 + $0xa28] sm:$0xff]  ;;  %v387_v62 = vld [vmem:[%s10937_s0 + $0xba0] sm:$0xff] }
 0x289   :  { %v4116_v3 = vrot.slane %v1289_v49, %v7008_v46  ;;  %v4111_v18 = vrot.slane %v1286_v54, %v7002_v42  ;;  %6349 = vmatpush3.bf16.msra.mxu1 %v6348_v26  ;;  %v1497_v54 = vsel %vm527_vm0, %v338_v24, 0.0  ;;  %v1644_v8 = vsel %vm527_vm0, %v387_v62, 0.0 }
 0x28a   :  { %6351 = vmatprep.subr.bf16.mxu1 %v6350_v38 }
 0x28b   :  { %v4112_v14 = vsel %vm10941_vm12, %v4111_v18, %v4107_v53  ;;  %1543 = vadd.xlane.f32.xlu1 %v1542_v60  ;;  %1540 = vadd.xlane.f32.xlu0 %v1539_v15  ;;  %v1635_v60 = vsel %vm527_vm0, %v384_v34, 0.0 }
 0x28c   :  { %v1295_v19 = vpop.xlane.xlu1 %1294  ;;  %v1292_v20 = vpop.xlane.xlu0 %1291  ;;  %v4117_v27 = vsel %vm2927_vm13, %v4116_v3, %v4112_v14 }
 0x28d   :  { %v4126_v28 = vrot.slane %v1295_v19, %v7027_v61  ;;  %v4121_v33 = vrot.slane %v1292_v20, %v7022_v59  ;;  %6353 = vmatpush3.bf16.msra.mxu1 %v6352_v43  ;;  %v1587_v19 = vsel %vm527_vm0, %v368_v9, 0.0  ;;  %v356_v20 = vld [vmem:[%s10937_s0 + $0xaa8] sm:$0xff]  ;;  %v1593_v9 = vsel %vm527_vm0, %v370_v0, 0.0  ;;  %v359_v0 = vld [vmem:[%s10937_s0 + $0xac0] sm:$0xff] }
 0x28e   :  { %v1551_v26 = vsel %vm527_vm0, %v356_v20, 0.0 }
 0x28f   :  { %1633 = vadd.xlane.f32.xlu1 %v1632_v21  ;;  %1546 = vadd.xlane.f32.xlu0 %v1545_v22  ;;  %v4122_v45 = vsel %vm2934_vm14, %v4121_v33, %v4117_v27  ;;  %v339_v21 = vld [vmem:[%s10937_s0 + $0xa20] sm:$0xff]  ;;  %v369_v33 = vld [vmem:[%s10937_s0 + $0xb10] sm:$0xff] }
 0x290   :  { %v8695_v49 = vpop.xlane.xlu1 %1300  ;;  %v8697_v53 = vpop.xlane.xlu0 %1297  ;;  %v8702_v15 = vsel %vm2941_vm15, %v4126_v28, %v4122_v45  ;;  %v1500_v27 = vsel %vm527_vm0, %v339_v21, 0.0  ;;  %v386_v28 = vld [vmem:[%s10937_s0 + $0xb98] sm:$0xff]  ;;  %v1590_v38 = vsel %vm527_vm0, %v369_v33, 0.0  ;;  %v371_v33 = vld [vmem:[%s10937_s0 + $0xb20] sm:$0xff] }
 0x291   :  { %10960 = vst [vmem:[#allocation15_spill] sm:$0xff] %v8702_v15  ;;  %v1641_v37 = vsel %vm527_vm0, %v386_v28, 0.0  ;;  %v388_v28 = vld [vmem:[%s10937_s0 + $0xba8] sm:$0xff] }
 0x293   :  { %1498 = vadd.xlane.f32.xlu1 %v1497_v54  ;;  %1636 = vadd.xlane.f32.xlu0 %v1635_v60  ;;  %v1554_v54 = vsel %vm527_vm0, %v357_v39, 0.0  ;;  %v1503_v60 = vsel %vm527_vm0, %v340_v41, 0.0 }
 0x294   :  { %v8710_v3 = vpop.xlane.xlu1 %1306  ;;  %v8712_v18 = vpop.xlane.xlu0 %1303 }
 0x295   :  { %v4140_v62 = vrot.slane %v8712_v18, %v6914_v35 }
 0x297   :  { %1585 = vadd.xlane.f32.xlu1 %v1584_v4  ;;  %1549 = vadd.xlane.f32.xlu0 %v1548_v5 }
 0x298   :  { %v8722_v11 = vpop.xlane.xlu1 %1312  ;;  %v8724_v14 = vpop.xlane.xlu0 %1309 }
 0x29b   :  { %1639 = vadd.xlane.f32.xlu1 %v1638_v16  ;;  %1588 = vadd.xlane.f32.xlu0 %v1587_v19  ;;  %v358_v16 = vld [vmem:[%s10937_s0 + $0xab8] sm:$0xff]  ;;  %v341_v19 = vld [vmem:[%s10937_s0 + $0xa30] sm:$0xff] }
 0x29c   :  { %v8734_v22 = vpop.xlane.xlu1 %1318  ;;  %v8736_v24 = vpop.xlane.xlu0 %1315 }
 0x29f   :  { %1552 = vadd.xlane.f32.xlu1 %v1551_v26  ;;  %1501 = vadd.xlane.f32.xlu0 %v1500_v27  ;;  %v1557_v26 = vsel %vm527_vm0, %v358_v16, 0.0  ;;  %v1506_v27 = vsel %vm527_vm0, %v341_v19, 0.0  ;;  %v4145_v16 = vrot.slane %v8710_v3, %v6904_v31  ;;  %v372_v3 = vld [vmem:[%s10937_s0 + $0xb28] sm:$0xff] }
 0x2a0   :  { %v8746_v34 = vpop.xlane.xlu1 %1324  ;;  %v8748_v36 = vpop.xlane.xlu0 %1321 }
 0x2a3   :  { %1642 = vadd.xlane.f32.xlu1 %v1641_v37  ;;  %1591 = vadd.xlane.f32.xlu0 %v1590_v38  ;;  %v4135_v37 = vrot.slane %v8695_v49, %v6907_v32  ;;  %v4131_v38 = vrot.slane %v8697_v53, %v6901_v30  ;;  %v342_v49 = vld [vmem:[%s10937_s0 + $0xa38] sm:$0xff] }
 0x2a4   :  { %v8758_v43 = vpop.xlane.xlu1 %1330  ;;  %v8760_v45 = vpop.xlane.xlu0 %1327 }
 0x2a7   :  { %1555 = vadd.xlane.f32.xlu1 %v1554_v54  ;;  %1504 = vadd.xlane.f32.xlu0 %v1503_v60  ;;  %v1647_v54 = vsel %vm527_vm0, %v388_v28, 0.0  ;;  %v1596_v60 = vsel %vm527_vm0, %v371_v33, 0.0  ;;  %v4150_v33 = vrot.slane %v8724_v14, %v6933_v48  ;;  %v4155_v14 = vrot.slane %v8722_v11, %v6919_v40  ;;  %v343_v11 = vld [vmem:[%s10937_s0 + $0xa40] sm:$0xff] }
 0x2a8   :  { %v8770_v4 = vpop.xlane.xlu1 %1336  ;;  %v8772_v5 = vpop.xlane.xlu0 %1333 }
 0x2ab   :  { %1645 = vadd.xlane.f32.xlu1 %v1644_v8  ;;  %1594 = vadd.xlane.f32.xlu0 %v1593_v9  ;;  %v4136_v9 = vsel %vm2843_vm1, %v4135_v37, %v4131_v38  ;;  %v389_v37 = vld [vmem:[%s10937_s0 + $0xbb0] sm:$0xff] }
 0x2ac   :  { %v8782_v20 = vpop.xlane.xlu1 %1342  ;;  %v8784_v21 = vpop.xlane.xlu0 %1339  ;;  %v4141_v28 = vsel %vm2850_vm2, %v4140_v62, %v4136_v9  ;;  %v1599_v9 = vsel %vm527_vm0, %v372_v3, 0.0  ;;  %v1512_v3 = vsel %vm527_vm0, %v343_v11, 0.0  ;;  %v4180_v11 = vrot.slane %v8760_v45, %v6994_v29 }
 0x2ad   :  { %v4185_v45 = vrot.slane %v8758_v43, %v6982_v23  ;;  %v374_v43 = vld [vmem:[%s10937_s0 + $0xb38] sm:$0xff] }
 0x2af   :  { %1558 = vadd.xlane.f32.xlu1 %v1557_v26  ;;  %1507 = vadd.xlane.f32.xlu0 %v1506_v27  ;;  %v1560_v26 = vsel %vm527_vm0, %v359_v0, 0.0  ;;  %v1509_v27 = vsel %vm527_vm0, %v342_v49, 0.0  ;;  %v1650_v49 = vsel %vm527_vm0, %v389_v37, 0.0 }
 0x2b0   :  { %v1349_v39 = vpop.xlane.xlu1 %1348  ;;  %v1346_v41 = vpop.xlane.xlu0 %1345 }
 0x2b1   :  { %v4214_v8 = vrot.slane %v1349_v39, %v6907_v32  ;;  %v4210_v53 = vrot.slane %v1346_v41, %v6901_v30 }
 0x2b3   :  { %1648 = vadd.xlane.f32.xlu1 %v1647_v54  ;;  %1597 = vadd.xlane.f32.xlu0 %v1596_v60  ;;  %v4215_v38 = vsel %vm2843_vm1, %v4214_v8, %v4210_v53  ;;  %v4146_v60 = vsel %vm2857_vm3, %v4145_v16, %v4141_v28  ;;  %v4160_v8 = vrot.slane %v8736_v24, %v6944_v57 }
 0x2b4   :  { %v1355_v18 = vpop.xlane.xlu1 %1354  ;;  %v1352_v19 = vpop.xlane.xlu0 %1351  ;;  %v4165_v24 = vrot.slane %v8734_v22, %v6941_v56  ;;  %v373_v22 = vld [vmem:[%s10937_s0 + $0xb30] sm:$0xff] }
 0x2b5   :  { %v4219_v39 = vrot.slane %v1352_v19, %v6914_v35  ;;  %v4224_v41 = vrot.slane %v1355_v18, %v6904_v31  ;;  %v4151_v19 = vsel %vm2864_vm4, %v4150_v33, %v4146_v60  ;;  %v360_v18 = vld [vmem:[%s10937_s0 + $0xac8] sm:$0xff]  ;;  %v390_v60 = vld [vmem:[%s10937_s0 + $0xbb8] sm:$0xff] }
 0x2b6   :  { %v4156_v28 = vsel %vm2871_vm5, %v4155_v14, %v4151_v19  ;;  %v1563_v37 = vsel %vm527_vm0, %v360_v18, 0.0 }
 0x2b7   :  { %v4220_v54 = vsel %vm2850_vm2, %v4219_v39, %v4215_v38  ;;  %1561 = vadd.xlane.f32.xlu1 %v1560_v26  ;;  %1510 = vadd.xlane.f32.xlu0 %v1509_v27  ;;  %v4161_v38 = vsel %vm2878_vm6, %v4160_v8, %v4156_v28  ;;  %v1653_v8 = vsel %vm527_vm0, %v390_v60, 0.0 }
 0x2b8   :  { %v1361_v62 = vpop.xlane.xlu1 %1360  ;;  %v1358_v0 = vpop.xlane.xlu0 %1357  ;;  %v4225_v26 = vsel %vm2857_vm3, %v4224_v41, %v4220_v54  ;;  %v4170_v41 = vrot.slane %v8748_v36, %v6974_v13  ;;  %v4175_v36 = vrot.slane %v8746_v34, %v6962_v7  ;;  %v344_v34 = vld [vmem:[%s10937_s0 + $0xa48] sm:$0xff] }
 0x2b9   :  { %v4229_v53 = vrot.slane %v1358_v0, %v6933_v48  ;;  %v4234_v16 = vrot.slane %v1361_v62, %v6919_v40 }
 0x2bb   :  { %v4230_v27 = vsel %vm2864_vm4, %v4229_v53, %v4225_v26  ;;  %1651 = vadd.xlane.f32.xlu1 %v1650_v49  ;;  %1600 = vadd.xlane.f32.xlu0 %v1599_v9  ;;  %v4166_v49 = vsel %vm2885_vm7, %v4165_v24, %v4161_v38  ;;  %v1602_v53 = vsel %vm527_vm0, %v373_v22, 0.0  ;;  %v361_v26 = vld [vmem:[%s10937_s0 + $0xad0] sm:$0xff]  ;;  %v1515_v38 = vsel %vm527_vm0, %v344_v34, 0.0  ;;  %v391_v22 = vld [vmem:[%s10937_s0 + $0xbc0] sm:$0xff] }
 0x2bc   :  { %v1367_v33 = vpop.xlane.xlu1 %1366  ;;  %v1364_v39 = vpop.xlane.xlu0 %1363  ;;  %v4235_v62 = vsel %vm2871_vm5, %v4234_v16, %v4230_v27  ;;  %v4171_v18 = vsel %vm10942_vm8, %v4170_v41, %v4166_v49 }
 0x2bd   :  { %v4239_v54 = vrot.slane %v1364_v39, %v6944_v57  ;;  %v4244_v14 = vrot.slane %v1367_v33, %v6941_v56  ;;  %v4176_v33 = vsel %vm2899_vm9, %v4175_v36, %v4171_v18  ;;  %v4200_v18 = vrot.slane %v8784_v21, %v7022_v59 }
 0x2be   :  { %v4181_v41 = vsel %vm10943_vm10, %v4180_v11, %v4176_v33  ;;  %v4205_v21 = vrot.slane %v8782_v20, %v7027_v61  ;;  %v375_v20 = vld [vmem:[%s10937_s0 + $0xb40] sm:$0xff] }
 0x2bf   :  { %v4240_v0 = vsel %vm2878_vm6, %v4239_v54, %v4235_v62  ;;  %1564 = vadd.xlane.f32.xlu1 %v1563_v37  ;;  %1513 = vadd.xlane.f32.xlu0 %v1512_v3  ;;  %v1566_v3 = vsel %vm527_vm0, %v361_v26, 0.0  ;;  %v4190_v54 = vrot.slane %v8772_v5, %v7002_v42  ;;  %v4195_v5 = vrot.slane %v8770_v4, %v7008_v46  ;;  %v345_v4 = vld [vmem:[%s10937_s0 + $0xa50] sm:$0xff] }
 0x2c0   :  { %v1373_v9 = vpop.xlane.xlu1 %1372  ;;  %v1370_v19 = vpop.xlane.xlu0 %1369  ;;  %v4245_v24 = vsel %vm2885_vm7, %v4244_v14, %v4240_v0  ;;  %v4186_v36 = vsel %vm2913_vm11, %v4185_v45, %v4181_v41  ;;  %v1518_v33 = vsel %vm527_vm0, %v345_v4, 0.0 }
 0x2c1   :  { %v4249_v16 = vrot.slane %v1370_v19, %v6974_v13  ;;  %v4254_v27 = vrot.slane %v1373_v9, %v6962_v7  ;;  %v1656_v19 = vsel %vm527_vm0, %v391_v22, 0.0 }
 0x2c3   :  { %v4250_v28 = vsel %vm10942_vm8, %v4249_v16, %v4245_v24  ;;  %1654 = vadd.xlane.f32.xlu1 %v1653_v8  ;;  %1603 = vadd.xlane.f32.xlu0 %v1602_v53  ;;  %v1605_v8 = vsel %vm527_vm0, %v374_v43, 0.0  ;;  %v4191_v53 = vsel %vm10941_vm12, %v4190_v54, %v4186_v36  ;;  %v362_v16 = vld [vmem:[%s10937_s0 + $0xad8] sm:$0xff] }
 0x2c4   :  { %v1379_v39 = vpop.xlane.xlu1 %1378  ;;  %v1376_v37 = vpop.xlane.xlu0 %1375  ;;  %v4255_v62 = vsel %vm2899_vm9, %v4254_v27, %v4250_v28  ;;  %v1569_v45 = vsel %vm527_vm0, %v362_v16, 0.0  ;;  %v376_v16 = vld [vmem:[%s10937_s0 + $0xb48] sm:$0xff] }
 0x2c5   :  { %v4259_v60 = vrot.slane %v1376_v37, %v6994_v29  ;;  %v4264_v14 = vrot.slane %v1379_v39, %v6982_v23  ;;  %v4196_v39 = vsel %vm2927_vm13, %v4195_v5, %v4191_v53 }
 0x2c6   :  { %v4201_v41 = vsel %vm2934_vm14, %v4200_v18, %v4196_v39  ;;  %v394_v39 = vld [vmem:[%s10937_s0 + $0xbd8] sm:$0xff] }
 0x2c7   :  { %v4260_v0 = vsel %vm10943_vm10, %v4259_v60, %v4255_v62  ;;  %1567 = vadd.xlane.f32.xlu1 %v1566_v3  ;;  %1516 = vadd.xlane.f32.xlu0 %v1515_v38  ;;  %v392_v38 = vld [vmem:[%s10937_s0 + $0xbc8] sm:$0xff]  ;;  %v4206_v5 = vsel %vm2941_vm15, %v4205_v21, %v4201_v41  ;;  %v347_v21 = vld [vmem:[%s10937_s0 + $0xa60] sm:$0xff] }
 0x2c8   :  { %v1385_v49 = vpop.xlane.xlu1 %1384  ;;  %v1382_v9 = vpop.xlane.xlu0 %1381  ;;  %v4265_v34 = vsel %vm2913_vm11, %v4264_v14, %v4260_v0  ;;  %v1659_v62 = vsel %vm527_vm0, %v392_v38, 0.0  ;;  %v1608_v0 = vsel %vm527_vm0, %v375_v20, 0.0  ;;  %v1665_v20 = vsel %vm527_vm0, %v394_v39, 0.0  ;;  %v2146_v39 = vld [vmem:[%s10938_s1 + $0x290] sm:$0xff] }
 0x2c9   :  { %v4269_v11 = vrot.slane %v1382_v9, %v7002_v42  ;;  %v4274_v26 = vrot.slane %v1385_v49, %v7008_v46  ;;  %v363_v49 = vld [vmem:[%s10937_s0 + $0xae0] sm:$0xff]  ;;  %v346_v9 = vld [vmem:[%s10937_s0 + $0xa58] sm:$0xff] }
 0x2ca   :  { %v1521_v18 = vsel %vm527_vm0, %v346_v9, 0.0  ;;  %v2144_v9 = vld [vmem:[%s10938_s1 + $0x280] sm:$0xff] }
 0x2cb   :  { %v4270_v27 = vsel %vm10941_vm12, %v4269_v11, %v4265_v34  ;;  %1657 = vadd.xlane.f32.xlu1 %v1656_v19  ;;  %1606 = vadd.xlane.f32.xlu0 %v1605_v8  ;;  %vm5392_vm12 = vcmask 1041409   ;;  %v393_v11 = vld [vmem:[%s10937_s0 + $0xbd0] sm:$0xff]  ;;  %v1611_v34 = vsel %vm527_vm0, %v376_v16, 0.0 }
 0x2cc   :  { %v1391_v24 = vpop.xlane.xlu1 %1390  ;;  %v1388_v28 = vpop.xlane.xlu0 %1387  ;;  %v4275_v54 = vsel %vm2927_vm13, %v4274_v26, %v4270_v27  ;;  %v5393_v19 = vsel %vm5392_vm12, %v4206_v5, %v7051_v17  ;;  %v1662_v26 = vsel %vm527_vm0, %v393_v11, 0.0  ;;  %v364_v27 = vld [vmem:[%s10937_s0 + $0xae8] sm:$0xff] }
 0x2cd   :  { %v4284_v37 = vrot.slane %v1391_v24, %v7027_v61  ;;  %v4279_v3 = vrot.slane %v1388_v28, %v7022_v59 }
 0x2cf   :  { %1570 = vadd.xlane.f32.xlu1 %v1569_v45  ;;  %1519 = vadd.xlane.f32.xlu0 %v1518_v33  ;;  %v4280_v60 = vsel %vm2934_vm14, %v4279_v3, %v4275_v54  ;;  %v1575_v45 = vsel %vm527_vm0, %v364_v27, 0.0  ;;  %v1524_v33 = vsel %vm527_vm0, %v347_v21, 0.0  ;;  %v365_v54 = vld [vmem:[%s10937_s0 + $0xaf0] sm:$0xff]  ;;  %v2129_v27 = vld [vmem:[%s10938_s1 + $0x208] sm:$0xff]  ;;  %v366_v21 = vld [vmem:[%s10937_s0 + $0xaf8] sm:$0xff] }
 0x2d0   :  { %v8934_v22 = vpop.xlane.xlu1 %1396  ;;  %v8936_v43 = vpop.xlane.xlu0 %1393  ;;  %v4285_v14 = vsel %vm2941_vm15, %v4284_v37, %v4280_v60  ;;  %v377_v37 = vld [vmem:[%s10937_s0 + $0xb50] sm:$0xff]  ;;  %v348_v60 = vld [vmem:[%s10937_s0 + $0xa68] sm:$0xff] }
 0x2d1   :  { %v5394_v36 = vsel %vm5392_vm12, %v4285_v14, %v7148_v63  ;;  %v1572_v63 = vsel %vm527_vm0, %v363_v49, 0.0  ;;  %v1614_v41 = vsel %vm527_vm0, %v377_v37, 0.0  ;;  %v1527_v5 = vsel %vm527_vm0, %v348_v60, 0.0  ;;  %v378_v49 = vld [vmem:[%s10937_s0 + $0xb58] sm:$0xff] }
 0x2d2   :  { %5489 = vmatprep.mubr.f32.mxu0 %v5394_v36  ;;  %v395_v36 = vld [vmem:[%s10937_s0 + $0xbe0] sm:$0xff]  ;;  %v1617_v16 = vsel %vm527_vm0, %v378_v49, 0.0  ;;  %v2147_v37 = vld [vmem:[%s10938_s1 + $0x298] sm:$0xff] }
 0x2d3   :  { %1660 = vadd.xlane.f32.xlu1 %v1659_v62  ;;  %1609 = vadd.xlane.f32.xlu0 %v1608_v0  ;;  %v1578_v0 = vsel %vm527_vm0, %v365_v54, 0.0  ;;  %v1668_v11 = vsel %vm527_vm0, %v395_v36, 0.0  ;;  %v1581_v54 = vsel %vm527_vm0, %v366_v21, 0.0  ;;  %v2130_v36 = vld [vmem:[%s10938_s1 + $0x210] sm:$0xff]  ;;  %v2131_v49 = vld [vmem:[%s10938_s1 + $0x218] sm:$0xff]  ;;  %v4289_v21 = vrot.slane %v8936_v43, %v6901_v30 }
 0x2d4   :  { %5490 = vmatmul.mubr.f32.vlgmr.msra.gmra.mrb[0].mxu0 %v5393_v19  ;;  %v8952_v8 = vpop.xlane.xlu1 %1402  ;;  %v8954_v53 = vpop.xlane.xlu0 %1399  ;;  %v2145_v19 = vld [vmem:[%s10938_s1 + $0x288] sm:$0xff] }
 0x2d5   :  { %v4298_v43 = vrot.slane %v8954_v53, %v6914_v35  ;;  %v2150_v53 = vld [vmem:[%s10938_s1 + $0x2b0] sm:$0xff] }
 0x2d7   :  { %1573 = vadd.xlane.f32.xlu1 %v1572_v63  ;;  %1522 = vadd.xlane.f32.xlu0 %v1521_v18 }
 0x2d8   :  { %v8964_v17 = vpop.xlane.xlu1 %1408  ;;  %v8966_v4 = vpop.xlane.xlu0 %1405 }
 0x2db   :  { %1663 = vadd.xlane.f32.xlu1 %v1662_v26  ;;  %1612 = vadd.xlane.f32.xlu0 %v1611_v34  ;;  %v6354_v26 = vpack.c.bf16 %v2145_v19, %v2144_v9  ;;  %v2128_v34 = vld [vmem:[%s10938_s1 + $0x200] sm:$0xff]  ;;  %v6360_v19 = vpack.c.bf16 %v2131_v49, %v2130_v36  ;;  %v2177_v36 = vld [vmem:[%s10938_s1 + $0x388] sm:$0xff] }
 0x2dc   :  { %v8976_v24 = vpop.xlane.xlu1 %1414  ;;  %v8978_v28 = vpop.xlane.xlu0 %1411  ;;  %v379_v9 = vld [vmem:[%s10937_s0 + $0xb60] sm:$0xff] }
 0x2dd   :  { %6355 = vmatprep.subr.bf16.mxu0 %v6354_v26  ;;  %v2148_v26 = vld [vmem:[%s10938_s1 + $0x2a0] sm:$0xff] }
 0x2df   :  { %1576 = vadd.xlane.f32.xlu1 %v1575_v45  ;;  %1525 = vadd.xlane.f32.xlu0 %v1524_v33  ;;  %v349_v45 = vld [vmem:[%s10937_s0 + $0xa70] sm:$0xff]  ;;  %v6356_v33 = vpack.c.bf16 %v2129_v27, %v2128_v34  ;;  %v2149_v34 = vld [vmem:[%s10938_s1 + $0x2a8] sm:$0xff]  ;;  %v4293_v27 = vrot.slane %v8934_v22, %v6907_v32  ;;  %v2176_v22 = vld [vmem:[%s10938_s1 + $0x380] sm:$0xff] }
 0x2e0   :  { %v8988_v3 = vpop.xlane.xlu1 %1420  ;;  %v8990_v38 = vpop.xlane.xlu0 %1417  ;;  %v1530_v60 = vsel %vm527_vm0, %v349_v45, 0.0 }
 0x2e1   :  { %6357 = vmatpush3.bf16.msra.mxu0 %v6356_v33 }
 0x2e3   :  { %1666 = vadd.xlane.f32.xlu1 %v1665_v20  ;;  %1615 = vadd.xlane.f32.xlu0 %v1614_v41 }
 0x2e4   :  { %v9000_v14 = vpop.xlane.xlu1 %1426  ;;  %v9002_v62 = vpop.xlane.xlu0 %1423 }
 0x2e7   :  { %1579 = vadd.xlane.f32.xlu1 %v1578_v0  ;;  %1528 = vadd.xlane.f32.xlu0 %v1527_v5  ;;  %v396_v0 = vld [vmem:[%s10937_s0 + $0xbe8] sm:$0xff]  ;;  %v6358_v5 = vpack.c.bf16 %v2147_v37, %v2146_v39  ;;  %v1620_v39 = vsel %vm527_vm0, %v379_v9, 0.0  ;;  %v6362_v37 = vpack.c.bf16 %v2149_v34, %v2148_v26  ;;  %v2151_v34 = vld [vmem:[%s10938_s1 + $0x2b8] sm:$0xff] }
 0x2e8   :  { %v9018_v63 = vpop.xlane.xlu1 %1432  ;;  %v9020_v18 = vpop.xlane.xlu0 %1429 }
 0x2e9   :  { %6359 = vmatprep.subr.bf16.mxu0 %v6358_v5 }
 0x2ea   :  { %6361 = vmatpush3.bf16.msra.mxu0 %v6360_v19  ;;  %v6386_v19 = vpack.c.bf16 %v2177_v36, %v2176_v22 }
 0x2eb   :  { %1669 = vadd.xlane.f32.xlu1 %v1668_v11  ;;  %1618 = vadd.xlane.f32.xlu0 %v1617_v16  ;;  %v1671_v11 = vsel %vm527_vm0, %v396_v0, 0.0  ;;  %v380_v16 = vld [vmem:[%s10937_s0 + $0xb68] sm:$0xff]  ;;  %v350_v0 = vld [vmem:[%s10937_s0 + $0xa78] sm:$0xff] }
 0x2ec   :  { %v9042_v20 = vpop.xlane.xlu1 %1438  ;;  %v9044_v41 = vpop.xlane.xlu0 %1435  ;;  %6363 = vmatprep.subr.bf16.mxu0 %v6362_v37  ;;  %v1623_v26 = vsel %vm527_vm0, %v380_v16, 0.0  ;;  %v381_v16 = vld [vmem:[%s10937_s0 + $0xb70] sm:$0xff]  ;;  %6387 = vmatprep.subr.bf16.mxu1 %v6386_v19 }
 0x2ef   :  { %1582 = vadd.xlane.f32.xlu1 %v1581_v54  ;;  %1531 = vadd.xlane.f32.xlu0 %v1530_v60  ;;  %v2132_v54 = vld [vmem:[%s10938_s1 + $0x220] sm:$0xff]  ;;  %v2133_v60 = vld [vmem:[%s10938_s1 + $0x228] sm:$0xff] }
 0x2f0   :  { %v1445_v45 = vpop.xlane.xlu1 %1444  ;;  %v1442_v33 = vpop.xlane.xlu0 %1441  ;;  %v6364_v5 = vpack.c.bf16 %v2133_v60, %v2132_v54  ;;  %v4294_v54 = vsel %vm2843_vm1, %v4293_v27, %v4289_v21  ;;  %v2134_v60 = vld [vmem:[%s10938_s1 + $0x230] sm:$0xff]  ;;  %v2135_v27 = vld [vmem:[%s10938_s1 + $0x238] sm:$0xff]  ;;  %v4308_v21 = vrot.slane %v8966_v4, %v6933_v48  ;;  %v2152_v4 = vld [vmem:[%s10938_s1 + $0x2c0] sm:$0xff] }
 0x2f1   :  { %v4372_v49 = vrot.slane %v1445_v45, %v6907_v32  ;;  %v4368_v9 = vrot.slane %v1442_v33, %v6901_v30  ;;  %v4303_v45 = vrot.slane %v8952_v8, %v6904_v31  ;;  %v4299_v8 = vsel %vm2850_vm2, %v4298_v43, %v4294_v54 }
 0x2f2   :  { %6365 = vmatpush3.bf16.msra.mxu0 %v6364_v5  ;;  %v6368_v5 = vpack.c.bf16 %v2135_v27, %v2134_v60  ;;  %v1626_v43 = vsel %vm527_vm0, %v381_v16, 0.0  ;;  %v2136_v16 = vld [vmem:[%s10938_s1 + $0x240] sm:$0xff]  ;;  %v398_v27 = vld [vmem:[%s10937_s0 + $0xbf8] sm:$0xff] }
 0x2f3   :  { %1672 = vadd.xlane.f32.xlu1 %v1671_v11  ;;  %1621 = vadd.xlane.f32.xlu0 %v1620_v39  ;;  %v1533_v11 = vsel %vm527_vm0, %v350_v0, 0.0  ;;  %v6366_v39 = vpack.c.bf16 %v2151_v34, %v2150_v53  ;;  %v397_v0 = vld [vmem:[%s10937_s0 + $0xbf0] sm:$0xff]  ;;  %v4373_v36 = vsel %vm2843_vm1, %v4372_v49, %v4368_v9  ;;  %v2153_v34 = vld [vmem:[%s10938_s1 + $0x2c8] sm:$0xff]  ;;  %v4313_v49 = vrot.slane %v8964_v17, %v6919_v40 }
 0x2f4   :  { %v1451_v33 = vpop.xlane.xlu1 %1450  ;;  %v1448_v37 = vpop.xlane.xlu0 %1447  ;;  %v4304_v9 = vsel %vm2857_vm3, %v4303_v45, %v4299_v8  ;;  %v2137_v17 = vld [vmem:[%s10938_s1 + $0x248] sm:$0xff] }
 0x2f5   :  { %v4377_v22 = vrot.slane %v1448_v37, %v6914_v35  ;;  %v4382_v19 = vrot.slane %v1451_v33, %v6904_v31  ;;  %6367 = vmatprep.subr.bf16.mxu0 %v6366_v39  ;;  %v382_v37 = vld [vmem:[%s10937_s0 + $0xb78] sm:$0xff]  ;;  %v4309_v45 = vsel %vm2864_vm4, %v4308_v21, %v4304_v9  ;;  %v4318_v39 = vrot.slane %v8978_v28, %v6944_v57  ;;  %v2154_v28 = vld [vmem:[%s10938_s1 + $0x2d0] sm:$0xff]  ;;  %v416_v9 = vld [vmem:[%s10937_s0 + $0xc88] sm:$0xff] }
 0x2f6   :  { %6369 = vmatpush3.bf16.msra.mxu0 %v6368_v5  ;;  %v6372_v8 = vpack.c.bf16 %v2137_v17, %v2136_v16  ;;  %v1629_v21 = vsel %vm527_vm0, %v382_v37, 0.0 }
 0x2f7   :  { %v4378_v53 = vsel %vm2850_vm2, %v4377_v22, %v4373_v36  ;;  %1624 = vadd.xlane.f32.xlu1 %v1623_v26  ;;  %1534 = vadd.xlane.f32.xlu0 %v1533_v11  ;;  %v1674_v26 = vsel %vm527_vm0, %v397_v0, 0.0  ;;  %v6370_v11 = vpack.c.bf16 %v2153_v34, %v2152_v4  ;;  %v2155_v36 = vld [vmem:[%s10938_s1 + $0x2d8] sm:$0xff]  ;;  %v4323_v4 = vrot.slane %v8976_v24, %v6941_v56 }
 0x2f8   :  { %v1457_v54 = vpop.xlane.xlu1 %1456  ;;  %v1454_v33 = vpop.xlane.xlu0 %1453  ;;  %v4383_v0 = vsel %vm2857_vm3, %v4382_v19, %v4378_v53  ;;  %v4314_v19 = vsel %vm2871_vm5, %v4313_v49, %v4309_v45  ;;  %v2139_v24 = vld [vmem:[%s10938_s1 + $0x258] sm:$0xff] }
 0x2f9   :  { %v4387_v60 = vrot.slane %v1454_v33, %v6933_v48  ;;  %v4392_v22 = vrot.slane %v1457_v54, %v6919_v40  ;;  %6371 = vmatprep.subr.bf16.mxu0 %v6370_v11  ;;  %v6374_v54 = vpack.c.bf16 %v2155_v36, %v2154_v28  ;;  %v2138_v33 = vld [vmem:[%s10938_s1 + $0x250] sm:$0xff]  ;;  %v4319_v49 = vsel %vm2878_vm6, %v4318_v39, %v4314_v19  ;;  %v415_v11 = vld [vmem:[%s10937_s0 + $0xc80] sm:$0xff]  ;;  %v400_v28 = vld [vmem:[%s10937_s0 + $0xc08] sm:$0xff] }
 0x2fa   :  { %6373 = vmatpush3.bf16.msra.mxu0 %v6372_v8  ;;  %v6376_v16 = vpack.c.bf16 %v2139_v24, %v2138_v33  ;;  %v1731_v39 = vsel %vm527_vm0, %v416_v9, 0.0  ;;  %v4333_v8 = vrot.slane %v8988_v3, %v6962_v7  ;;  %v2140_v19 = vld [vmem:[%s10938_s1 + $0x260] sm:$0xff]  ;;  %v2141_v3 = vld [vmem:[%s10938_s1 + $0x268] sm:$0xff] }
 0x2fb   :  { %v4388_v5 = vsel %vm2864_vm4, %v4387_v60, %v4383_v0  ;;  %1627 = vadd.xlane.f32.xlu1 %v1626_v43  ;;  %1675 = vadd.xlane.f32.xlu0 %v1674_v26  ;;  %v1677_v43 = vsel %vm527_vm0, %v398_v27, 0.0  ;;  %v4328_v26 = vrot.slane %v8990_v38, %v6974_v13  ;;  %v2156_v38 = vld [vmem:[%s10938_s1 + $0x2e0] sm:$0xff]  ;;  %v2157_v27 = vld [vmem:[%s10938_s1 + $0x2e8] sm:$0xff]  ;;  %v6380_v9 = vpack.c.bf16 %v2141_v3, %v2140_v19 }
 0x2fc   :  { %v1463_v53 = vpop.xlane.xlu1 %1462  ;;  %v1460_v34 = vpop.xlane.xlu0 %1459  ;;  %v4393_v45 = vsel %vm2871_vm5, %v4392_v22, %v4388_v5  ;;  %6375 = vmatprep.subr.bf16.mxu0 %v6374_v54  ;;  %v4324_v22 = vsel %vm2885_vm7, %v4323_v4, %v4319_v49  ;;  %v6378_v36 = vpack.c.bf16 %v2157_v27, %v2156_v38  ;;  %v1683_v49 = vsel %vm527_vm0, %v400_v28, 0.0  ;;  %v2143_v38 = vld [vmem:[%s10938_s1 + $0x278] sm:$0xff] }
 0x2fd   :  { %v4397_v37 = vrot.slane %v1460_v34, %v6944_v57  ;;  %v4402_v17 = vrot.slane %v1463_v53, %v6941_v56  ;;  %v4329_v4 = vsel %vm10942_vm8, %v4328_v26, %v4324_v22  ;;  %v4338_v53 = vrot.slane %v9002_v62, %v6994_v29  ;;  %v2158_v62 = vld [vmem:[%s10938_s1 + $0x2f0] sm:$0xff]  ;;  %v2159_v26 = vld [vmem:[%s10938_s1 + $0x2f8] sm:$0xff] }
 0x2fe   :  { %6377 = vmatpush3.bf16.msra.mxu0 %v6376_v16  ;;  %v401_v22 = vld [vmem:[%s10937_s0 + $0xc10] sm:$0xff] }
 0x2ff   :  { %v4398_v60 = vsel %vm2878_vm6, %v4397_v37, %v4393_v45  ;;  %1630 = vadd.xlane.f32.xlu1 %v1629_v21  ;;  %1678 = vadd.xlane.f32.xlu0 %v1677_v43  ;;  %v1728_v21 = vsel %vm527_vm0, %v415_v11, 0.0  ;;  %v399_v43 = vld [vmem:[%s10937_s0 + $0xc00] sm:$0xff]  ;;  %v4343_v37 = vrot.slane %v9000_v14, %v6982_v23  ;;  %v4334_v11 = vsel %vm2899_vm9, %v4333_v8, %v4329_v4 }
 0x300   :  { %v1469_v0 = vpop.xlane.xlu1 %1468  ;;  %v1466_v5 = vpop.xlane.xlu0 %1465  ;;  %v4403_v33 = vsel %vm2885_vm7, %v4402_v17, %v4398_v60  ;;  %6379 = vmatprep.subr.bf16.mxu0 %v6378_v36  ;;  %v1680_v45 = vsel %vm527_vm0, %v399_v43, 0.0  ;;  %v6382_v60 = vpack.c.bf16 %v2159_v26, %v2158_v62  ;;  %v4339_v27 = vsel %vm10943_vm10, %v4338_v53, %v4334_v11 }
 0x301   :  { %v4407_v34 = vrot.slane %v1466_v5, %v6974_v13  ;;  %v4412_v54 = vrot.slane %v1469_v0, %v6962_v7  ;;  %v4348_v14 = vrot.slane %v9020_v18, %v7002_v42  ;;  %v417_v0 = vld [vmem:[%s10937_s0 + $0xc90] sm:$0xff]  ;;  %v4353_v18 = vrot.slane %v9018_v63, %v7008_v46  ;;  %v447_v63 = vld [vmem:[%s10937_s0 + $0xd80] sm:$0xff] }
 0x302   :  { %6381 = vmatpush3.bf16.msra.mxu0 %v6380_v9  ;;  %v4344_v19 = vsel %vm2913_vm11, %v4343_v37, %v4339_v27  ;;  %v1686_v53 = vsel %vm527_vm0, %v401_v22, 0.0  ;;  %v4358_v9 = vrot.slane %v9044_v41, %v7022_v59  ;;  %v4363_v41 = vrot.slane %v9042_v20, %v7027_v61  ;;  %v448_v20 = vld [vmem:[%s10937_s0 + $0xd88] sm:$0xff] }
 0x303   :  { %v4408_v24 = vsel %vm10942_vm8, %v4407_v34, %v4403_v33  ;;  %1732 = vadd.xlane.f32.xlu1 %v1731_v39  ;;  %1729 = vadd.xlane.f32.xlu0 %v1728_v21  ;;  %v2142_v39 = vld [vmem:[%s10938_s1 + $0x270] sm:$0xff]  ;;  %v1734_v34 = vsel %vm527_vm0, %v417_v0, 0.0  ;;  %vm10961_vm8 = vcmask 851712   ;;  %v418_v33 = vld [vmem:[%s10937_s0 + $0xc98] sm:$0xff]  ;;  %v1824_v11 = vsel %vm527_vm0, %v447_v63, 0.0 }
 0x304   :  { %v1475_v16 = vpop.xlane.xlu1 %1474  ;;  %v1472_v17 = vpop.xlane.xlu0 %1471  ;;  %v6384_v5 = vpack.c.bf16 %v2143_v38, %v2142_v39  ;;  %v4413_v28 = vsel %vm2899_vm9, %v4412_v54, %v4408_v24  ;;  %6383 = vmatprep.subr.bf16.mxu0 %v6382_v60  ;;  %v4349_v43 = vsel %vm10961_vm8, %v4348_v14, %v4344_v19  ;;  %v402_v39 = vld [vmem:[%s10937_s0 + $0xc18] sm:$0xff]  ;;  %v2160_v14 = vld [vmem:[%s10938_s1 + $0x300] sm:$0xff]  ;;  %v2178_v0 = vld [vmem:[%s10938_s1 + $0x390] sm:$0xff]  ;;  %v1827_v19 = vsel %vm527_vm0, %v448_v20, 0.0 }
 0x305   :  { %v4417_v8 = vrot.slane %v1472_v17, %v6994_v29  ;;  %v4422_v21 = vrot.slane %v1475_v16, %v6982_v23  ;;  %v1737_v16 = vsel %vm527_vm0, %v418_v33, 0.0  ;;  %v4354_v17 = vsel %vm2927_vm13, %v4353_v18, %v4349_v43  ;;  %v431_v43 = vld [vmem:[%s10937_s0 + $0xd00] sm:$0xff]  ;;  %v2162_v33 = vld [vmem:[%s10938_s1 + $0x310] sm:$0xff] }
 0x306   :  { %6385 = vmatpush3.bf16.msra.mxu0 %v6384_v5  ;;  %v4359_v38 = vsel %vm2934_vm14, %v4358_v9, %v4354_v17  ;;  %v2179_v5 = vld [vmem:[%s10938_s1 + $0x398] sm:$0xff]  ;;  %v1689_v18 = vsel %vm527_vm0, %v402_v39, 0.0  ;;  %v419_v9 = vld [vmem:[%s10937_s0 + $0xca0] sm:$0xff] }
 0x307   :  { %v4418_v36 = vsel %vm10943_vm10, %v4417_v8, %v4413_v28  ;;  %1684 = vadd.xlane.f32.xlu1 %v1683_v49  ;;  %1681 = vadd.xlane.f32.xlu0 %v1680_v45  ;;  %vm10962_vm10 = vmmov %vm10961_vm8  ;;  %v2161_v8 = vld [vmem:[%s10938_s1 + $0x308] sm:$0xff]  ;;  %v6390_v63 = vpack.c.bf16 %v2179_v5, %v2178_v0  ;;  %v2164_v20 = vld [vmem:[%s10938_s1 + $0x320] sm:$0xff]  ;;  %vm10963_vm8 = vcmask 589312  }
 0x308   :  { %v1481_v3 = vpop.xlane.xlu1 %1480  ;;  %v1478_v4 = vpop.xlane.xlu0 %1477  ;;  %v4423_v49 = vsel %vm2913_vm11, %v4422_v21, %v4418_v36 }
 0x309   :  { %v4427_v54 = vrot.slane %v1478_v4, %v7002_v42  ;;  %v4432_v24 = vrot.slane %v1481_v3, %v7008_v46  ;;  %v4364_v3 = vsel %vm2941_vm15, %v4363_v41, %v4359_v38  ;;  %v2181_v41 = vld [vmem:[%s10938_s1 + $0x3a8] sm:$0xff] }
 0x30a   :  { %v2165_v38 = vld [vmem:[%s10938_s1 + $0x328] sm:$0xff] }
 0x30b   :  { %v4428_v62 = vsel %vm10962_vm10, %v4427_v54, %v4423_v49  ;;  %1687 = vadd.xlane.f32.xlu1 %v1686_v53  ;;  %1735 = vadd.xlane.f32.xlu0 %v1734_v34  ;;  %v6388_v54 = vpack.c.bf16 %v2161_v8, %v2160_v14  ;;  %v5395_v49 = vsel %vm5392_vm12, %v4364_v3, %v7245_v44  ;;  %v449_v44 = vld [vmem:[%s10937_s0 + $0xd90] sm:$0xff]  ;;  %v2183_v8 = vld [vmem:[%s10938_s1 + $0x3b8] sm:$0xff]  ;;  %v403_v3 = vld [vmem:[%s10937_s0 + $0xc20] sm:$0xff]  ;;  %vm10964_vm10 = vcmask 720512  }
 0x30c   :  { %v1487_v26 = vpop.xlane.xlu1 %1486  ;;  %v1484_v37 = vpop.xlane.xlu0 %1483  ;;  %v4433_v27 = vsel %vm2927_vm13, %v4432_v24, %v4428_v62  ;;  %v2163_v24 = vld [vmem:[%s10938_s1 + $0x318] sm:$0xff]  ;;  %v2180_v62 = vld [vmem:[%s10938_s1 + $0x3a0] sm:$0xff]  ;;  %v2182_v14 = vld [vmem:[%s10938_s1 + $0x3b0] sm:$0xff]  ;;  %v1830_v5 = vsel %vm527_vm0, %v449_v44, 0.0 }
 0x30d   :  { %v4442_v45 = vrot.slane %v1487_v26, %v7027_v61  ;;  %v4437_v60 = vrot.slane %v1484_v37, %v7022_v59  ;;  %v6394_v39 = vpack.c.bf16 %v2181_v41, %v2180_v62  ;;  %v1692_v62 = vsel %vm527_vm0, %v403_v3, 0.0  ;;  %v2169_v44 = vld [vmem:[%s10938_s1 + $0x348] sm:$0xff]  ;;  %v2171_v3 = vld [vmem:[%s10938_s1 + $0x358] sm:$0xff] }
 0x30f   :  { %1825 = vadd.xlane.f32.xlu1 %v1824_v11  ;;  %1738 = vadd.xlane.f32.xlu0 %v1737_v16  ;;  %v4438_v22 = vsel %vm2934_vm14, %v4437_v60, %v4433_v27  ;;  %v1776_v11 = vsel %vm527_vm0, %v431_v43, 0.0  ;;  %v1740_v16 = vsel %vm527_vm0, %v419_v9, 0.0  ;;  %v6392_v60 = vpack.c.bf16 %v2163_v24, %v2162_v33  ;;  %v2167_v43 = vld [vmem:[%s10938_s1 + $0x338] sm:$0xff] }
 0x310   :  { %v1493_v21 = vpop.xlane.xlu1 %1492  ;;  %v1490_v28 = vpop.xlane.xlu0 %1489  ;;  %v4443_v36 = vsel %vm2941_vm15, %v4442_v45, %v4438_v22  ;;  %v432_v45 = vld [vmem:[%s10937_s0 + $0xd08] sm:$0xff] }
 0x311   :  { %v4451_v4 = vrot.slane %v1493_v21, %v6907_v32  ;;  %v4447_v53 = vrot.slane %v1490_v28, %v6901_v30  ;;  %v5396_v34 = vsel %vm5392_vm12, %v4443_v36, %v7342_v25  ;;  %v1779_v21 = vsel %vm527_vm0, %v432_v45, 0.0 }
 0x312   :  { %5559 = vmatprep.mubr.f32.mxu1 %v5396_v34  ;;  %v2166_v34 = vld [vmem:[%s10938_s1 + $0x330] sm:$0xff] }
 0x313   :  { %v4452_v25 = vsel %vm2843_vm1, %v4451_v4, %v4447_v53  ;;  %1690 = vadd.xlane.f32.xlu1 %v1689_v18  ;;  %1828 = vadd.xlane.f32.xlu0 %v1827_v19  ;;  %v420_v19 = vld [vmem:[%s10937_s0 + $0xca8] sm:$0xff]  ;;  %v6396_v4 = vpack.c.bf16 %v2165_v38, %v2164_v20  ;;  %v6398_v53 = vpack.c.bf16 %v2183_v8, %v2182_v14 }
 0x314   :  { %5560 = vmatmul.mubr.f32.vlgmr.msra.gmra.mrb[0].mxu1 %v5395_v49  ;;  %v1538_v26 = vpop.xlane.xlu1 %1537  ;;  %v1496_v37 = vpop.xlane.xlu0 %1495  ;;  %v1743_v49 = vsel %vm527_vm0, %v420_v19, 0.0  ;;  %v2170_v19 = vld [vmem:[%s10938_s1 + $0x350] sm:$0xff] }
 0x315   :  { %v4456_v17 = vrot.slane %v1496_v37, %v6914_v35  ;;  %6389 = vmatpush3.bf16.msra.mxu1 %v6388_v54  ;;  %v4526_v28 = vrot.slane %v1538_v26, %v6901_v30  ;;  %v2184_v54 = vld [vmem:[%s10938_s1 + $0x3c0] sm:$0xff]  ;;  %v450_v26 = vld [vmem:[%s10937_s0 + $0xd98] sm:$0xff]  ;;  %v433_v37 = vld [vmem:[%s10937_s0 + $0xd10] sm:$0xff] }
 0x316   :  { %6391 = vmatprep.subr.bf16.mxu1 %v6390_v63  ;;  %v2185_v63 = vld [vmem:[%s10938_s1 + $0x3c8] sm:$0xff]  ;;  %v1833_v14 = vsel %vm527_vm0, %v450_v26, 0.0  ;;  %v1782_v8 = vsel %vm527_vm0, %v433_v37, 0.0 }
 0x317   :  { %v4457_v27 = vsel %vm2850_vm2, %v4456_v17, %v4452_v25  ;;  %1777 = vadd.xlane.f32.xlu1 %v1776_v11  ;;  %1741 = vadd.xlane.f32.xlu0 %v1740_v16  ;;  %v6400_v11 = vpack.c.bf16 %v2167_v43, %v2166_v34  ;;  %v6402_v16 = vpack.c.bf16 %v2185_v63, %v2184_v54  ;;  %v2168_v17 = vld [vmem:[%s10938_s1 + $0x340] sm:$0xff]  ;;  %v2189_v43 = vld [vmem:[%s10938_s1 + $0x3e8] sm:$0xff] }
 0x318   :  { %v1544_v22 = vpop.xlane.xlu1 %1543  ;;  %v1541_v0 = vpop.xlane.xlu0 %1540  ;;  %v2188_v34 = vld [vmem:[%s10938_s1 + $0x3e0] sm:$0xff]  ;;  %v2173_v26 = vld [vmem:[%s10938_s1 + $0x368] sm:$0xff] }
 0x319   :  { %v4535_v36 = vrot.slane %v1544_v22, %v6914_v35  ;;  %v4530_v18 = vrot.slane %v1541_v0, %v6907_v32  ;;  %6393 = vmatpush3.bf16.msra.mxu1 %v6392_v60  ;;  %v2186_v60 = vld [vmem:[%s10938_s1 + $0x3d0] sm:$0xff] }
 0x31a   :  { %6395 = vmatprep.subr.bf16.mxu1 %v6394_v39  ;;  %v2187_v39 = vld [vmem:[%s10938_s1 + $0x3d8] sm:$0xff] }
 0x31b   :  { %v4531_v9 = vsel %vm2843_vm1, %v4530_v18, %v4526_v28  ;;  %1831 = vadd.xlane.f32.xlu1 %v1830_v5  ;;  %1780 = vadd.xlane.f32.xlu0 %v1779_v21  ;;  %v421_v21 = vld [vmem:[%s10937_s0 + $0xcb0] sm:$0xff]  ;;  %v404_v28 = vld [vmem:[%s10937_s0 + $0xc28] sm:$0xff]  ;;  %v6406_v18 = vpack.c.bf16 %v2187_v39, %v2186_v60 }
 0x31c   :  { %v1634_v33 = vpop.xlane.xlu1 %1633  ;;  %v4536_v24 = vsel %vm2850_vm2, %v4535_v36, %v4531_v9  ;;  %v1547_v25 = vpop.xlane.xlu0 %1546  ;;  %v6404_v36 = vpack.c.bf16 %v2169_v44, %v2168_v17  ;;  %v1746_v63 = vsel %vm527_vm0, %v421_v21, 0.0  ;;  %v2175_v21 = vld [vmem:[%s10938_s1 + $0x378] sm:$0xff] }
 0x31d   :  { %v4540_v41 = vrot.slane %v1547_v25, %v6904_v31  ;;  %6397 = vmatpush3.bf16.msra.mxu1 %v6396_v4  ;;  %v4684_v22 = vrot.slane %v1634_v33, %v6901_v30  ;;  %v1695_v33 = vsel %vm527_vm0, %v404_v28, 0.0  ;;  %v434_v25 = vld [vmem:[%s10937_s0 + $0xd18] sm:$0xff] }
 0x31e   :  { %6399 = vmatprep.subr.bf16.mxu1 %v6398_v53  ;;  %v1785_v39 = vsel %vm527_vm0, %v434_v25, 0.0 }
 0x31f   :  { %v4541_v45 = vsel %vm2857_vm3, %v4540_v41, %v4536_v24  ;;  %1744 = vadd.xlane.f32.xlu1 %v1743_v49  ;;  %1693 = vadd.xlane.f32.xlu0 %v1692_v62  ;;  %v451_v24 = vld [vmem:[%s10937_s0 + $0xda0] sm:$0xff]  ;;  %v6408_v49 = vpack.c.bf16 %v2171_v3, %v2170_v19  ;;  %v6410_v62 = vpack.c.bf16 %v2189_v43, %v2188_v34 }
 0x320   :  { %v1499_v20 = vpop.xlane.xlu1 %1498  ;;  %v1637_v38 = vpop.xlane.xlu0 %1636  ;;  %v2172_v41 = vld [vmem:[%s10938_s1 + $0x360] sm:$0xff]  ;;  %v1836_v60 = vsel %vm527_vm0, %v451_v24, 0.0 }
 0x321   :  { %v4461_v0 = vrot.slane %v1499_v20, %v6904_v31  ;;  %v4688_v5 = vrot.slane %v1637_v38, %v6907_v32  ;;  %6401 = vmatpush3.bf16.msra.mxu1 %v6400_v11  ;;  %v2190_v11 = vld [vmem:[%s10938_s1 + $0x3f0] sm:$0xff] }
 0x322   :  { %6403 = vmatprep.subr.bf16.mxu1 %v6402_v16  ;;  %v2191_v16 = vld [vmem:[%s10938_s1 + $0x3f8] sm:$0xff] }
 0x323   :  { %v4462_v4 = vsel %vm2857_vm3, %v4461_v0, %v4457_v27  ;;  %v4689_v53 = vsel %vm2843_vm1, %v4688_v5, %v4684_v22  ;;  %1834 = vadd.xlane.f32.xlu1 %v1833_v14  ;;  %1783 = vadd.xlane.f32.xlu0 %v1782_v8  ;;  %v422_v14 = vld [vmem:[%s10937_s0 + $0xcb8] sm:$0xff]  ;;  %v405_v8 = vld [vmem:[%s10937_s0 + $0xc30] sm:$0xff]  ;;  %v6412_v22 = vpack.c.bf16 %v2173_v26, %v2172_v41 }
 0x324   :  { %v1586_v9 = vpop.xlane.xlu1 %1585  ;;  %v1550_v54 = vpop.xlane.xlu0 %1549  ;;  %v6414_v0 = vpack.c.bf16 %v2191_v16, %v2190_v11  ;;  %v2174_v5 = vld [vmem:[%s10938_s1 + $0x370] sm:$0xff]  ;;  %v1749_v3 = vsel %vm527_vm0, %v422_v14, 0.0  ;;  %v1698_v34 = vsel %vm527_vm0, %v405_v8, 0.0  ;;  %v423_v11 = vld [vmem:[%s10937_s0 + $0xcc0] sm:$0xff] }
 0x325   :  { %v4545_v27 = vrot.slane %v1550_v54, %v6933_v48  ;;  %6405 = vmatpush3.bf16.msra.mxu1 %v6404_v36  ;;  %v4605_v20 = vrot.slane %v1586_v9, %v6901_v30  ;;  %v452_v54 = vld [vmem:[%s10937_s0 + $0xda8] sm:$0xff] }
 0x326   :  { %6407 = vmatprep.subr.bf16.mxu1 %v6406_v18 }
 0x327   :  { %v4546_v37 = vsel %vm2864_vm4, %v4545_v27, %v4541_v45  ;;  %1747 = vadd.xlane.f32.xlu1 %v1746_v63  ;;  %1696 = vadd.xlane.f32.xlu0 %v1695_v33  ;;  %v6416_v63 = vpack.c.bf16 %v2175_v21, %v2174_v5 }
 0x328   :  { %v1640_v17 = vpop.xlane.xlu1 %1639  ;;  %v1589_v44 = vpop.xlane.xlu0 %1588 }
 0x329   :  { %v4693_v45 = vrot.slane %v1640_v17, %v6914_v35  ;;  %v4609_v38 = vrot.slane %v1589_v44, %v6907_v32  ;;  %6409 = vmatpush3.bf16.msra.mxu1 %v6408_v49  ;;  %v1839_v49 = vsel %vm527_vm0, %v452_v54, 0.0 }
 0x32a   :  { %6411 = vmatprep.subr.bf16.mxu1 %v6410_v62 }
 0x32b   :  { %v4694_v28 = vsel %vm2850_vm2, %v4693_v45, %v4689_v53  ;;  %v4610_v36 = vsel %vm2843_vm1, %v4609_v38, %v4605_v20  ;;  %1837 = vadd.xlane.f32.xlu1 %v1836_v60  ;;  %1786 = vadd.xlane.f32.xlu0 %v1785_v39  ;;  %v435_v53 = vld [vmem:[%s10937_s0 + $0xd20] sm:$0xff]  ;;  %v1752_v60 = vsel %vm527_vm0, %v423_v11, 0.0  ;;  %v453_v45 = vld [vmem:[%s10937_s0 + $0xdb0] sm:$0xff]  ;;  %v436_v38 = vld [vmem:[%s10937_s0 + $0xd28] sm:$0xff] }
 0x32c   :  { %v1553_v18 = vpop.xlane.xlu1 %1552  ;;  %v1502_v19 = vpop.xlane.xlu0 %1501  ;;  %v1788_v62 = vsel %vm527_vm0, %v435_v53, 0.0  ;;  %v1791_v5 = vsel %vm527_vm0, %v436_v38, 0.0  ;;  %v454_v53 = vld [vmem:[%s10937_s0 + $0xdb8] sm:$0xff]  ;;  %v408_v11 = vld [vmem:[%s10937_s0 + $0xc48] sm:$0xff] }
 0x32d   :  { %v4550_v43 = vrot.slane %v1553_v18, %v6919_v40  ;;  %v4466_v9 = vrot.slane %v1502_v19, %v6933_v48  ;;  %6413 = vmatpush3.bf16.msra.mxu1 %v6412_v22  ;;  %v407_v18 = vld [vmem:[%s10937_s0 + $0xc40] sm:$0xff] }
 0x32e   :  { %6415 = vmatprep.subr.bf16.mxu1 %v6414_v0  ;;  %v1842_v0 = vsel %vm527_vm0, %v453_v45, 0.0  ;;  %v1704_v54 = vsel %vm527_vm0, %v407_v18, 0.0  ;;  %v438_v45 = vld [vmem:[%s10937_s0 + $0xd38] sm:$0xff] }
 0x32f   :  { %v9465_v33 = vsel %vm2871_vm5, %v4550_v43, %v4546_v37  ;;  %v4467_v27 = vsel %vm2864_vm4, %v4466_v9, %v4462_v4  ;;  %1750 = vadd.xlane.f32.xlu1 %v1749_v3  ;;  %1699 = vadd.xlane.f32.xlu0 %v1698_v34  ;;  %v406_v4 = vld [vmem:[%s10937_s0 + $0xc38] sm:$0xff] }
 0x330   :  { %v1643_v24 = vpop.xlane.xlu1 %1642  ;;  %v1592_v25 = vpop.xlane.xlu0 %1591  ;;  %v1701_v39 = vsel %vm527_vm0, %v406_v4, 0.0 }
 0x331   :  { %v4698_v41 = vrot.slane %v1643_v24, %v6904_v31  ;;  %v4614_v26 = vrot.slane %v1592_v25, %v6914_v35  ;;  %6417 = vmatpush3.bf16.msra.mxu1 %v6416_v63  ;;  %v437_v63 = vld [vmem:[%s10937_s0 + $0xd30] sm:$0xff]  ;;  %v1845_v25 = vsel %vm527_vm0, %v454_v53, 0.0 }
 0x333   :  { %v4699_v37 = vsel %vm2857_vm3, %v4698_v41, %v4694_v28  ;;  %v4615_v16 = vsel %vm2850_vm2, %v4614_v26, %v4610_v36  ;;  %1840 = vadd.xlane.f32.xlu1 %v1839_v49  ;;  %1789 = vadd.xlane.f32.xlu0 %v1788_v62  ;;  %v424_v36 = vld [vmem:[%s10937_s0 + $0xcc8] sm:$0xff]  ;;  %v1794_v49 = vsel %vm527_vm0, %v437_v63, 0.0  ;;  %v425_v26 = vld [vmem:[%s10937_s0 + $0xcd0] sm:$0xff] }
 0x334   :  { %v9480_v17 = vpop.xlane.xlu1 %1555  ;;  %v1505_v44 = vpop.xlane.xlu0 %1504  ;;  %v1755_v9 = vsel %vm527_vm0, %v424_v36, 0.0 }
 0x335   :  { %v4471_v20 = vrot.slane %v1505_v44, %v6919_v40 }
 0x337   :  { %v9492_v14 = vsel %vm2871_vm5, %v4471_v20, %v4467_v27  ;;  %1753 = vadd.xlane.f32.xlu1 %v1752_v60  ;;  %1702 = vadd.xlane.f32.xlu0 %v1701_v39  ;;  %v1758_v60 = vsel %vm527_vm0, %v425_v26, 0.0  ;;  %v1707_v39 = vsel %vm527_vm0, %v408_v11, 0.0  ;;  %v455_v20 = vld [vmem:[%s10937_s0 + $0xdc0] sm:$0xff]  ;;  %v457_v11 = vld [vmem:[%s10937_s0 + $0xdd0] sm:$0xff] }
 0x338   :  { %v1646_v8 = vpop.xlane.xlu1 %1645  ;;  %v1595_v22 = vpop.xlane.xlu0 %1594 }
 0x339   :  { %v4703_v21 = vrot.slane %v1646_v8, %v6933_v48  ;;  %v4619_v28 = vrot.slane %v1595_v22, %v6904_v31  ;;  %v1848_v22 = vsel %vm527_vm0, %v455_v20, 0.0 }
 0x33b   :  { %v4704_v19 = vsel %vm2864_vm4, %v4703_v21, %v4699_v37  ;;  %v4620_v3 = vsel %vm2857_vm3, %v4619_v28, %v4615_v16  ;;  %1843 = vadd.xlane.f32.xlu1 %v1842_v0  ;;  %1792 = vadd.xlane.f32.xlu0 %v1791_v5  ;;  %v1797_v0 = vsel %vm527_vm0, %v438_v45, 0.0  ;;  %v426_v5 = vld [vmem:[%s10937_s0 + $0xcd8] sm:$0xff]  ;;  %v409_v21 = vld [vmem:[%s10937_s0 + $0xc50] sm:$0xff]  ;;  %v1854_v45 = vsel %vm527_vm0, %v457_v11, 0.0  ;;  %v412_v11 = vld [vmem:[%s10937_s0 + $0xc68] sm:$0xff] }
 0x33c   :  { %v9506_v34 = vpop.xlane.xlu1 %1558  ;;  %v9508_v43 = vpop.xlane.xlu0 %1507  ;;  %v1761_v18 = vsel %vm527_vm0, %v426_v5, 0.0  ;;  %v411_v5 = vld [vmem:[%s10937_s0 + $0xc60] sm:$0xff] }
 0x33d   :  { %v4560_v47 = vrot.slane %v9506_v34, %v6941_v56 }
 0x33f   :  { %1756 = vadd.xlane.f32.xlu1 %v1755_v9  ;;  %1705 = vadd.xlane.f32.xlu0 %v1704_v54  ;;  %v439_v9 = vld [vmem:[%s10937_s0 + $0xd40] sm:$0xff] }
 0x340   :  { %v1649_v27 = vpop.xlane.xlu1 %1648  ;;  %v1598_v24 = vpop.xlane.xlu0 %1597 }
 0x341   :  { %v4708_v62 = vrot.slane %v1649_v27, %v6919_v40  ;;  %v4624_v41 = vrot.slane %v1598_v24, %v6933_v48  ;;  %v1800_v27 = vsel %vm527_vm0, %v439_v9, 0.0  ;;  %v427_v24 = vld [vmem:[%s10937_s0 + $0xce0] sm:$0xff]  ;;  %v458_v9 = vld [vmem:[%s10937_s0 + $0xdd8] sm:$0xff] }
 0x343   :  { %v9529_v4 = vsel %vm2871_vm5, %v4708_v62, %v4704_v19  ;;  %v9532_v37 = vsel %vm2864_vm4, %v4624_v41, %v4620_v3  ;;  %1846 = vadd.xlane.f32.xlu1 %v1845_v25  ;;  %1795 = vadd.xlane.f32.xlu0 %v1794_v49  ;;  %v1710_v19 = vsel %vm527_vm0, %v409_v21, 0.0  ;;  %v456_v3 = vld [vmem:[%s10937_s0 + $0xdc8] sm:$0xff]  ;;  %v410_v25 = vld [vmem:[%s10937_s0 + $0xc58] sm:$0xff]  ;;  %v1764_v41 = vsel %vm527_vm0, %v427_v24, 0.0 }
 0x344   :  { %v9534_v16 = vpop.xlane.xlu1 %1561  ;;  %v9536_v44 = vpop.xlane.xlu0 %1510  ;;  %v1851_v63 = vsel %vm527_vm0, %v456_v3, 0.0  ;;  %v1713_v26 = vsel %vm527_vm0, %v410_v25, 0.0  ;;  %v1716_v3 = vsel %vm527_vm0, %v411_v5, 0.0  ;;  %v1857_v25 = vsel %vm527_vm0, %v458_v9, 0.0  ;;  %v459_v5 = vld [vmem:[%s10937_s0 + $0xde0] sm:$0xff]  ;;  %v2209_v9 = vld [vmem:[%s10938_s1 + $0x488] sm:$0xff] }
 0x345   :  { %v4565_v1 = vrot.slane %v9534_v16, %v6974_v13 }
 0x347   :  { %1759 = vadd.xlane.f32.xlu1 %v1758_v60  ;;  %1708 = vadd.xlane.f32.xlu0 %v1707_v39  ;;  %v440_v60 = vld [vmem:[%s10937_s0 + $0xd48] sm:$0xff] }
 0x348   :  { %v9546_v38 = vpop.xlane.xlu1 %1651  ;;  %v9548_v8 = vpop.xlane.xlu0 %1600 }
 0x34b   :  { %1849 = vadd.xlane.f32.xlu1 %v1848_v22  ;;  %1798 = vadd.xlane.f32.xlu0 %v1797_v0  ;;  %v1803_v22 = vsel %vm527_vm0, %v440_v60, 0.0  ;;  %v428_v0 = vld [vmem:[%s10937_s0 + $0xce8] sm:$0xff] }
 0x34c   :  { %v9558_v28 = vpop.xlane.xlu1 %1564  ;;  %v9560_v36 = vpop.xlane.xlu0 %1513 }
 0x34d   :  { %v4570_v34 = vrot.slane %v9558_v28, %v6962_v7 }
 0x34f   :  { %1762 = vadd.xlane.f32.xlu1 %v1761_v18  ;;  %1711 = vadd.xlane.f32.xlu0 %v1710_v19  ;;  %v1767_v19 = vsel %vm527_vm0, %v428_v0, 0.0  ;;  %v1719_v0 = vsel %vm527_vm0, %v412_v11, 0.0 }
 0x350   :  { %v9570_v54 = vpop.xlane.xlu1 %1654  ;;  %v9572_v53 = vpop.xlane.xlu0 %1603 }
 0x353   :  { %1852 = vadd.xlane.f32.xlu1 %v1851_v63  ;;  %1801 = vadd.xlane.f32.xlu0 %v1800_v27  ;;  %v441_v63 = vld [vmem:[%s10937_s0 + $0xd50] sm:$0xff] }
 0x354   :  { %v9582_v49 = vpop.xlane.xlu1 %1567  ;;  %v9584_v62 = vpop.xlane.xlu0 %1516 }
 0x355   :  { %v4575_v12 = vrot.slane %v9582_v49, %v6994_v29 }
 0x357   :  { %1765 = vadd.xlane.f32.xlu1 %v1764_v41  ;;  %1714 = vadd.xlane.f32.xlu0 %v1713_v26  ;;  %v1806_v41 = vsel %vm527_vm0, %v441_v63, 0.0  ;;  %v429_v26 = vld [vmem:[%s10937_s0 + $0xcf0] sm:$0xff] }
 0x358   :  { %v9594_v39 = vpop.xlane.xlu1 %1657  ;;  %v9596_v20 = vpop.xlane.xlu0 %1606 }
 0x35b   :  { %1855 = vadd.xlane.f32.xlu1 %v1854_v45  ;;  %1804 = vadd.xlane.f32.xlu0 %v1803_v22  ;;  %v1770_v22 = vsel %vm527_vm0, %v429_v26, 0.0 }
 0x35c   :  { %v9606_v21 = vpop.xlane.xlu1 %1570  ;;  %v9608_v18 = vpop.xlane.xlu0 %1519 }
 0x35f   :  { %1768 = vadd.xlane.f32.xlu1 %v1767_v19  ;;  %1717 = vadd.xlane.f32.xlu0 %v1716_v3  ;;  %v442_v19 = vld [vmem:[%s10937_s0 + $0xd58] sm:$0xff]  ;;  %v2208_v3 = vld [vmem:[%s10938_s1 + $0x480] sm:$0xff] }
 0x360   :  { %v9618_v27 = vpop.xlane.xlu1 %1660  ;;  %v9620_v24 = vpop.xlane.xlu0 %1609  ;;  %v1809_v26 = vsel %vm527_vm0, %v442_v19, 0.0  ;;  %v6418_v11 = vpack.c.bf16 %v2209_v9, %v2208_v3  ;;  %v460_v3 = vld [vmem:[%s10937_s0 + $0xde8] sm:$0xff]  ;;  %v443_v9 = vld [vmem:[%s10937_s0 + $0xd60] sm:$0xff] }
 0x362   :  { %6419 = vmatprep.subr.bf16.mxu0 %v6418_v11  ;;  %v1863_v11 = vsel %vm527_vm0, %v460_v3, 0.0  ;;  %v4555_v3 = vrot.slane %v9480_v17, %v6944_v57  ;;  %v445_v17 = vld [vmem:[%s10937_s0 + $0xd70] sm:$0xff] }
 0x363   :  { %1858 = vadd.xlane.f32.xlu1 %v1857_v25  ;;  %1807 = vadd.xlane.f32.xlu0 %v1806_v41  ;;  %v1860_v41 = vsel %vm527_vm0, %v459_v5, 0.0  ;;  %v1818_v28 = vsel %vm527_vm0, %v445_v17, 0.0 }
 0x364   :  { %v9630_v60 = vpop.xlane.xlu1 %1573  ;;  %v9632_v45 = vpop.xlane.xlu0 %1522  ;;  %v4556_v16 = vsel %vm2878_vm6, %v4555_v3, %v9465_v33  ;;  %v462_v33 = vld [vmem:[%s10937_s0 + $0xdf8] sm:$0xff]  ;;  %v480_v3 = vld [vmem:[%s10937_s0 + $0xe88] sm:$0xff] }
 0x365   :  { %v4585_v49 = vrot.slane %v9630_v60, %v7002_v42 }
 0x367   :  { %1771 = vadd.xlane.f32.xlu1 %v1770_v22  ;;  %1720 = vadd.xlane.f32.xlu0 %v1719_v0  ;;  %v430_v22 = vld [vmem:[%s10937_s0 + $0xcf8] sm:$0xff]  ;;  %v413_v0 = vld [vmem:[%s10937_s0 + $0xc70] sm:$0xff] }
 0x368   :  { %v9648_v63 = vpop.xlane.xlu1 %1663  ;;  %v9650_v25 = vpop.xlane.xlu0 %1612  ;;  %v1773_v5 = vsel %vm527_vm0, %v430_v22, 0.0  ;;  %v1722_v19 = vsel %vm527_vm0, %v413_v0, 0.0  ;;  %v1812_v22 = vsel %vm527_vm0, %v443_v9, 0.0  ;;  %v2240_v0 = vld [vmem:[%s10938_s1 + $0x580] sm:$0xff] }
 0x36b   :  { %1861 = vadd.xlane.f32.xlu1 %v1860_v41  ;;  %1810 = vadd.xlane.f32.xlu0 %v1809_v26 }
 0x36c   :  { %v9660_v15 = vpop.xlane.xlu1 %1576  ;;  %v9662_v6 = vpop.xlane.xlu0 %1525 }
 0x36d   :  { %v4590_v60 = vrot.slane %v9660_v15, %v7008_v46 }
 0x36f   :  { %1774 = vadd.xlane.f32.xlu1 %v1773_v5  ;;  %1723 = vadd.xlane.f32.xlu0 %v1722_v19  ;;  %v414_v5 = vld [vmem:[%s10937_s0 + $0xc78] sm:$0xff]  ;;  %v2241_v19 = vld [vmem:[%s10938_s1 + $0x588] sm:$0xff] }
 0x370   :  { %v9672_v41 = vpop.xlane.xlu1 %1666  ;;  %v9674_v26 = vpop.xlane.xlu0 %1615  ;;  %v6450_v9 = vpack.c.bf16 %v2241_v19, %v2240_v0  ;;  %v1725_v48 = vsel %vm527_vm0, %v414_v5, 0.0  ;;  %v4476_v0 = vrot.slane %v9508_v43, %v6944_v57  ;;  %v4580_v5 = vrot.slane %v9606_v21, %v6982_v23  ;;  %v446_v19 = vld [vmem:[%s10937_s0 + $0xd78] sm:$0xff] }
 0x371   :  { %v4481_v43 = vrot.slane %v9536_v44, %v6941_v56  ;;  %v4486_v44 = vrot.slane %v9560_v36, %v6974_v13  ;;  %v1923_v36 = vsel %vm527_vm0, %v480_v3, 0.0  ;;  %v4506_v3 = vrot.slane %v9662_v6, %v7002_v42 }
 0x372   :  { %6451 = vmatprep.subr.bf16.mxu1 %v6450_v9  ;;  %v4477_v31 = vsel %vm2878_vm6, %v4476_v0, %v9492_v14  ;;  %v464_v0 = vld [vmem:[%s10937_s0 + $0xe08] sm:$0xff] }
 0x373   :  { %1864 = vadd.xlane.f32.xlu1 %v1863_v11  ;;  %1813 = vadd.xlane.f32.xlu0 %v1812_v22  ;;  %v461_v11 = vld [vmem:[%s10937_s0 + $0xdf0] sm:$0xff]  ;;  %v4561_v22 = vsel %vm2885_vm7, %v4560_v47, %v4556_v16  ;;  %v1821_v16 = vsel %vm527_vm0, %v446_v19, 0.0  ;;  %v4482_v15 = vsel %vm2885_vm7, %v4481_v43, %v4477_v31 }
 0x374   :  { %v1580_v55 = vpop.xlane.xlu1 %1579  ;;  %v9696_v50 = vpop.xlane.xlu0 %1528  ;;  %v4566_v47 = vsel %vm10963_vm8, %v4565_v1, %v4561_v22  ;;  %v1866_v21 = vsel %vm527_vm0, %v461_v11, 0.0  ;;  %v479_v1 = vld [vmem:[%s10937_s0 + $0xe80] sm:$0xff]  ;;  %v1869_v22 = vsel %vm527_vm0, %v462_v33, 0.0  ;;  %vm10965_vm8 = vcmask 851712  }
 0x375   :  { %v4571_v9 = vsel %vm2899_vm9, %v4570_v34, %v4566_v47  ;;  %v4595_v11 = vrot.slane %v1580_v55, %v7022_v59  ;;  %v1920_v34 = vsel %vm527_vm0, %v479_v1, 0.0  ;;  %v4713_v55 = vrot.slane %v9546_v38, %v6944_v57 }
 0x376   :  { %v4576_v17 = vsel %vm10964_vm10, %v4575_v12, %v4571_v9  ;;  %v4629_v12 = vrot.slane %v9548_v8, %v6919_v40  ;;  %vm10966_vm10 = vcmask 589312   ;;  %v4718_v8 = vrot.slane %v9570_v54, %v6941_v56  ;;  %v463_v9 = vld [vmem:[%s10937_s0 + $0xe00] sm:$0xff] }
 0x377   :  { %1816 = vadd.xlane.f32.xlu1 %v1815_v51  ;;  %1726 = vadd.xlane.f32.xlu0 %v1725_v48  ;;  %v4581_v35 = vsel %vm2913_vm11, %v4580_v5, %v4576_v17  ;;  %v4487_v5 = vsel %vm10966_vm10, %v4486_v44, %v4482_v15  ;;  %v4496_v47 = vrot.slane %v9608_v18, %v6994_v29  ;;  %v1875_v54 = vsel %vm527_vm0, %v464_v0, 0.0  ;;  %v2192_v15 = vld [vmem:[%s10938_s1 + $0x400] sm:$0xff] }
 0x378   :  { %v9729_v51 = vpop.xlane.xlu1 %1669  ;;  %v9731_v48 = vpop.xlane.xlu0 %1618  ;;  %v4586_v19 = vsel %vm10965_vm8, %v4585_v49, %v4581_v35  ;;  %v4634_v35 = vrot.slane %v9572_v53, %v6944_v57  ;;  %v4723_v49 = vrot.slane %v9594_v39, %v6974_v13  ;;  %v4639_v53 = vrot.slane %v9596_v20, %v6941_v56 }
 0x379   :  { %v4591_v31 = vsel %vm2927_vm13, %v4590_v60, %v4586_v19  ;;  %v4728_v18 = vrot.slane %v9618_v27, %v6962_v7  ;;  %v4714_v20 = vsel %vm2878_vm6, %v4713_v55, %v9529_v4  ;;  %v4630_v27 = vsel %vm2871_vm5, %v4629_v12, %v9532_v37 }
 0x37a   :  { %v4596_v43 = vsel %vm2934_vm14, %v4595_v11, %v4591_v31  ;;  %v4511_v6 = vrot.slane %v9696_v50, %v7008_v46  ;;  %v4719_v60 = vsel %vm2885_vm7, %v4718_v8, %v4714_v20  ;;  %vm10967_vm8 = vcmask 720512   ;;  %v2211_v8 = vld [vmem:[%s10938_s1 + $0x498] sm:$0xff] }
 0x37b   :  { %1819 = vadd.xlane.f32.xlu1 %v1818_v28  ;;  %1867 = vadd.xlane.f32.xlu0 %v1866_v21  ;;  %v4491_v28 = vrot.slane %v9584_v62, %v6962_v7  ;;  %v4501_v62 = vrot.slane %v9632_v45, %v6982_v23  ;;  %v4644_v4 = vrot.slane %v9620_v24, %v6974_v13  ;;  %v2193_v24 = vld [vmem:[%s10938_s1 + $0x408] sm:$0xff] }
 0x37c   :  { %v1583_v33 = vpop.xlane.xlu1 %1582  ;;  %v1532_v14 = vpop.xlane.xlu0 %1531  ;;  %v4635_v37 = vsel %vm2878_vm6, %v4634_v35, %v4630_v27  ;;  %v4733_v0 = vrot.slane %v9648_v63, %v6994_v29  ;;  %v4654_v63 = vrot.slane %v9674_v26, %v6994_v29  ;;  %v2195_v26 = vld [vmem:[%s10938_s1 + $0x418] sm:$0xff] }
 0x37d   :  { %v4600_v38 = vrot.slane %v1583_v33, %v7027_v61  ;;  %v4492_v44 = vsel %vm2899_vm9, %v4491_v28, %v4487_v5  ;;  %v4516_v11 = vrot.slane %v1532_v14, %v7022_v59  ;;  %v4640_v55 = vsel %vm2885_vm7, %v4639_v53, %v4635_v37  ;;  %v2194_v53 = vld [vmem:[%s10938_s1 + $0x410] sm:$0xff] }
 0x37e   :  { %v4497_v17 = vsel %vm10967_vm8, %v4496_v47, %v4492_v44  ;;  %vm10968_vm8 = vcmask 851712   ;;  %v4649_v5 = vrot.slane %v9650_v25, %v6962_v7  ;;  %v4645_v35 = vsel %vm10966_vm10, %v4644_v4, %v4640_v55 }
 0x37f   :  { %1822 = vadd.xlane.f32.xlu1 %v1821_v16  ;;  %1870 = vadd.xlane.f32.xlu0 %v1869_v22  ;;  %v4601_v21 = vsel %vm2941_vm15, %v4600_v38, %v4596_v43  ;;  %v4724_v16 = vsel %vm10966_vm10, %v4723_v49, %v4719_v60  ;;  %v4502_v50 = vsel %vm2913_vm11, %v4501_v62, %v4497_v17  ;;  %v1872_v22 = vsel %vm527_vm0, %v463_v9, 0.0  ;;  %v2210_v38 = vld [vmem:[%s10938_s1 + $0x490] sm:$0xff] }
 0x380   :  { %v9787_v1 = vpop.xlane.xlu1 %1672  ;;  %v9789_v39 = vpop.xlane.xlu0 %1621  ;;  %v5398_v45 = vsel %vm5392_vm12, %v4601_v21, %v7536_v2  ;;  %v465_v2 = vld [vmem:[%s10937_s0 + $0xe10] sm:$0xff]  ;;  %v4729_v12 = vsel %vm2899_vm9, %v4728_v18, %v4724_v16  ;;  %v4507_v19 = vsel %vm10968_vm8, %v4506_v3, %v4502_v50  ;;  %v6420_v25 = vpack.c.bf16 %v2193_v24, %v2192_v15  ;;  %v2196_v16 = vld [vmem:[%s10938_s1 + $0x420] sm:$0xff]  ;;  %v2197_v50 = vld [vmem:[%s10938_s1 + $0x428] sm:$0xff] }
 0x381   :  { %5629 = vmatprep.mubr.f32.mxu0 %v5398_v45  ;;  %v4512_v28 = vsel %vm2927_vm13, %v4511_v6, %v4507_v19  ;;  %v4738_v43 = vrot.slane %v9672_v41, %v6982_v23  ;;  %v4659_v49 = vrot.slane %v9731_v48, %v6982_v23  ;;  %v4743_v41 = vrot.slane %v9729_v51, %v7002_v42  ;;  %v511_v45 = vld [vmem:[%s10937_s0 + $0xf80] sm:$0xff]  ;;  %v2213_v6 = vld [vmem:[%s10938_s1 + $0x4a8] sm:$0xff]  ;;  %v466_v19 = vld [vmem:[%s10937_s0 + $0xe18] sm:$0xff] }
 0x382   :  { %v4517_v47 = vsel %vm2934_vm14, %v4516_v11, %v4512_v28  ;;  %v4664_v48 = vrot.slane %v9789_v39, %v7002_v42  ;;  %v6422_v9 = vpack.c.bf16 %v2211_v8, %v2210_v38  ;;  %vm10969_vm8 = vcmask 720512   ;;  %v482_v39 = vld [vmem:[%s10937_s0 + $0xe98] sm:$0xff]  ;;  %v2214_v38 = vld [vmem:[%s10938_s1 + $0x4b0] sm:$0xff] }
 0x383   :  { %1924 = vadd.xlane.f32.xlu1 %v1923_v36  ;;  %1921 = vadd.xlane.f32.xlu0 %v1920_v34  ;;  %v1878_v36 = vsel %vm527_vm0, %v465_v2, 0.0  ;;  %v481_v34 = vld [vmem:[%s10937_s0 + $0xe90] sm:$0xff]  ;;  %v4734_v20 = vsel %vm10969_vm8, %v4733_v0, %v4729_v12  ;;  %v4650_v27 = vsel %vm2899_vm9, %v4649_v5, %v4645_v35  ;;  %v4748_v51 = vrot.slane %v9787_v1, %v7008_v46  ;;  %vm10970_vm10 = vmmov %vm10969_vm8  ;;  %v2215_v8 = vld [vmem:[%s10938_s1 + $0x4b8] sm:$0xff] }
 0x384   :  { %v1625_v33 = vpop.xlane.xlu1 %1624  ;;  %v1535_v14 = vpop.xlane.xlu0 %1534  ;;  %v1926_v21 = vsel %vm527_vm0, %v481_v34, 0.0  ;;  %v4655_v2 = vsel %vm10970_vm10, %v4654_v63, %v4650_v27  ;;  %v6424_v17 = vpack.c.bf16 %v2195_v26, %v2194_v53  ;;  %v4739_v4 = vsel %vm2913_vm11, %v4738_v43, %v4734_v20  ;;  %v2243_v43 = vld [vmem:[%s10938_s1 + $0x598] sm:$0xff]  ;;  %v2198_v26 = vld [vmem:[%s10938_s1 + $0x430] sm:$0xff] }
 0x385   :  { %v4521_v31 = vrot.slane %v1535_v14, %v7027_v61  ;;  %v4669_v44 = vrot.slane %v1625_v33, %v7008_v46  ;;  %v4660_v11 = vsel %vm2913_vm11, %v4659_v49, %v4655_v2  ;;  %v2016_v37 = vsel %vm527_vm0, %v511_v45, 0.0  ;;  %v512_v33 = vld [vmem:[%s10937_s0 + $0xf88] sm:$0xff]  ;;  %v495_v45 = vld [vmem:[%s10937_s0 + $0xf00] sm:$0xff] }
 0x386   :  { %vm10971_vm8 = vcmask 851712   ;;  %v1929_v12 = vsel %vm527_vm0, %v482_v39, 0.0  ;;  %v2019_v53 = vsel %vm527_vm0, %v512_v33, 0.0  ;;  %v6430_v27 = vpack.c.bf16 %v2215_v8, %v2214_v38  ;;  %v2227_v39 = vld [vmem:[%s10938_s1 + $0x518] sm:$0xff] }
 0x387   :  { %1876 = vadd.xlane.f32.xlu1 %v1875_v54  ;;  %1873 = vadd.xlane.f32.xlu0 %v1872_v22  ;;  %v4522_v62 = vsel %vm2941_vm15, %v4521_v31, %v4517_v47  ;;  %v4744_v22 = vsel %vm10971_vm8, %v4743_v41, %v4739_v4  ;;  %vm10972_vm10 = vmmov %vm10971_vm8  ;;  %v2225_v31 = vld [vmem:[%s10938_s1 + $0x508] sm:$0xff]  ;;  %v6428_v47 = vpack.c.bf16 %v2197_v50, %v2196_v16  ;;  %v2199_v41 = vld [vmem:[%s10938_s1 + $0x438] sm:$0xff]  ;;  %v1968_v50 = vsel %vm527_vm0, %v495_v45, 0.0 }
 0x388   :  { %v1628_v54 = vpop.xlane.xlu1 %1627  ;;  %v1676_v18 = vpop.xlane.xlu0 %1675  ;;  %v5397_v3 = vsel %vm5392_vm12, %v4522_v62, %v7439_v10  ;;  %v2212_v10 = vld [vmem:[%s10938_s1 + $0x4a0] sm:$0xff]  ;;  %v4665_v15 = vsel %vm10972_vm10, %v4664_v48, %v4660_v11  ;;  %v4749_v34 = vsel %vm2927_vm13, %v4748_v51, %v4744_v22  ;;  %v2226_v51 = vld [vmem:[%s10938_s1 + $0x510] sm:$0xff]  ;;  %v6432_v2 = vpack.c.bf16 %v2199_v41, %v2198_v26  ;;  %v2201_v11 = vld [vmem:[%s10938_s1 + $0x448] sm:$0xff] }
 0x389   :  { %5630 = vmatmul.mubr.f32.vlgmr.msra.gmra.mrb[2].mxu0 %v5397_v3  ;;  %v4674_v60 = vrot.slane %v1628_v54, %v7022_v59  ;;  %v4753_v1 = vrot.slane %v1676_v18, %v7022_v59  ;;  %v6426_v14 = vpack.c.bf16 %v2213_v6, %v2212_v10  ;;  %v4670_v0 = vsel %vm2927_vm13, %v4669_v44, %v4665_v15  ;;  %v2216_v10 = vld [vmem:[%s10938_s1 + $0x4c0] sm:$0xff]  ;;  %v2217_v6 = vld [vmem:[%s10938_s1 + $0x4c8] sm:$0xff]  ;;  %v513_v15 = vld [vmem:[%s10937_s0 + $0xf90] sm:$0xff] }
 0x38a   :  { %6421 = vmatpush3.bf16.msra.mxu0 %v6420_v25  ;;  %v2242_v25 = vld [vmem:[%s10938_s1 + $0x590] sm:$0xff]  ;;  %v2200_v4 = vld [vmem:[%s10938_s1 + $0x440] sm:$0xff]  ;;  %v2247_v38 = vld [vmem:[%s10938_s1 + $0x5b8] sm:$0xff]  ;;  %vm10976_vm8 = vcmask 589312   ;;  %vm10977_vm10 = vcmask 720512  }
 0x38b   :  { %1879 = vadd.xlane.f32.xlu1 %v1878_v36  ;;  %1927 = vadd.xlane.f32.xlu0 %v1926_v21  ;;  %v2224_v36 = vld [vmem:[%s10938_s1 + $0x500] sm:$0xff]  ;;  %v4675_v35 = vsel %vm2934_vm14, %v4674_v60, %v4670_v0  ;;  %v4754_v63 = vsel %vm2934_vm14, %v4753_v1, %v4749_v34  ;;  %v1881_v21 = vsel %vm527_vm0, %v466_v19, 0.0  ;;  %v2245_v1 = vld [vmem:[%s10938_s1 + $0x5a8] sm:$0xff]  ;;  %v2218_v0 = vld [vmem:[%s10938_s1 + $0x4d0] sm:$0xff] }
 0x38c   :  { %v1631_v24 = vpop.xlane.xlu1 %1630  ;;  %v1679_v55 = vpop.xlane.xlu0 %1678  ;;  %6423 = vmatprep.subr.bf16.mxu0 %v6422_v9  ;;  %v483_v9 = vld [vmem:[%s10937_s0 + $0xea0] sm:$0xff]  ;;  %v6452_v20 = vpack.c.bf16 %v2225_v31, %v2224_v36  ;;  %v2229_v34 = vld [vmem:[%s10938_s1 + $0x528] sm:$0xff]  ;;  %v2246_v31 = vld [vmem:[%s10938_s1 + $0x5b0] sm:$0xff] }
 0x38d   :  { %v4679_v5 = vrot.slane %v1631_v24, %v7027_v61  ;;  %v4758_v28 = vrot.slane %v1679_v55, %v7027_v61  ;;  %v2244_v60 = vld [vmem:[%s10938_s1 + $0x5a0] sm:$0xff]  ;;  %v1932_v22 = vsel %vm527_vm0, %v483_v9, 0.0  ;;  %v496_v24 = vld [vmem:[%s10937_s0 + $0xf08] sm:$0xff]  ;;  %v6456_v55 = vpack.c.bf16 %v2227_v39, %v2226_v51  ;;  %v2230_v41 = vld [vmem:[%s10938_s1 + $0x530] sm:$0xff] }
 0x38e   :  { %6425 = vmatpush3.bf16.msra.mxu0 %v6424_v17  ;;  %v2228_v19 = vld [vmem:[%s10938_s1 + $0x520] sm:$0xff]  ;;  %v6458_v36 = vpack.c.bf16 %v2245_v1, %v2244_v60  ;;  %v2231_v45 = vld [vmem:[%s10938_s1 + $0x538] sm:$0xff] }
 0x38f   :  { %2017 = vadd.xlane.f32.xlu1 %v2016_v37  ;;  %1930 = vadd.xlane.f32.xlu0 %v1929_v12  ;;  %v4759_v49 = vsel %vm2941_vm15, %v4758_v28, %v4754_v63  ;;  %v4680_v62 = vsel %vm2941_vm15, %v4679_v5, %v4675_v35  ;;  %v6434_v12 = vpack.c.bf16 %v2217_v6, %v2216_v10  ;;  %v2219_v5 = vld [vmem:[%s10938_s1 + $0x4d8] sm:$0xff]  ;;  %v2202_v35 = vld [vmem:[%s10938_s1 + $0x450] sm:$0xff]  ;;  %v2220_v9 = vld [vmem:[%s10938_s1 + $0x4e0] sm:$0xff] }
 0x390   :  { %v1733_v48 = vpop.xlane.xlu1 %1732  ;;  %v1730_v54 = vpop.xlane.xlu0 %1729  ;;  %v5400_v18 = vsel %vm5392_vm12, %v4759_v49, %v7730_v52  ;;  %v5399_v3 = vsel %vm5392_vm12, %v4680_v62, %v7633_v58  ;;  %6427 = vmatprep.subr.bf16.mxu0 %v6426_v14  ;;  %v6454_v58 = vpack.c.bf16 %v2243_v43, %v2242_v25  ;;  %v6436_v28 = vpack.c.bf16 %v2201_v11, %v2200_v4  ;;  %v2203_v63 = vld [vmem:[%s10938_s1 + $0x458] sm:$0xff]  ;;  %v484_v62 = vld [vmem:[%s10937_s0 + $0xea8] sm:$0xff]  ;;  %v2248_v51 = vld [vmem:[%s10938_s1 + $0x5c0] sm:$0xff] }
 0x391   :  { %v4846_v52 = vrot.slane %v1733_v48, %v6907_v32  ;;  %v4842_v44 = vrot.slane %v1730_v54, %v6901_v30  ;;  %5699 = vmatprep.mubr.f32.mxu1 %v5400_v18  ;;  %v2022_v43 = vsel %vm527_vm0, %v513_v15, 0.0  ;;  %v1971_v49 = vsel %vm527_vm0, %v496_v24, 0.0  ;;  %v10973_v48 = vld [vmem:[#allocation6_spill] sm:$0xff]  ;;  %v2204_v39 = vld [vmem:[%s10938_s1 + $0x460] sm:$0xff] }
 0x392   :  { %5700 = vmatmul.mubr.f32.vlgmr.msra.gmra.mrb[2].mxu1 %v5399_v3  ;;  %6429 = vmatpush3.bf16.msra.mxu0 %v6428_v47  ;;  %v6438_v26 = vpack.c.bf16 %v2219_v5, %v2218_v0  ;;  %v6462_v3 = vpack.c.bf16 %v2247_v38, %v2246_v31  ;;  %v2205_v10 = vld [vmem:[%s10938_s1 + $0x468] sm:$0xff]  ;;  %v1935_v60 = vsel %vm527_vm0, %v484_v62, 0.0  ;;  %v497_v4 = vld [vmem:[%s10937_s0 + $0xf10] sm:$0xff]  ;;  %v6464_v11 = vpack.c.bf16 %v2231_v45, %v2230_v41  ;;  %v2207_v0 = vld [vmem:[%s10938_s1 + $0x478] sm:$0xff] }
 0x393   :  { %v4847_v17 = vsel %vm2843_vm1, %v4846_v52, %v4842_v44  ;;  %1882 = vadd.xlane.f32.xlu1 %v1881_v21  ;;  %2020 = vadd.xlane.f32.xlu0 %v2019_v53  ;;  %v467_v21 = vld [vmem:[%s10937_s0 + $0xe20] sm:$0xff]  ;;  %v6460_v53 = vpack.c.bf16 %v2229_v34, %v2228_v19  ;;  %v2249_v52 = vld [vmem:[%s10938_s1 + $0x5c8] sm:$0xff]  ;;  %v6444_v19 = vpack.c.bf16 %v2205_v10, %v2204_v39  ;;  %v2206_v34 = vld [vmem:[%s10938_s1 + $0x470] sm:$0xff]  ;;  %v1974_v38 = vsel %vm527_vm0, %v497_v4, 0.0 }
 0x394   :  { %v1685_v37 = vpop.xlane.xlu1 %1684  ;;  %v1682_v16 = vpop.xlane.xlu0 %1681  ;;  %6453 = vmatpush3.bf16.msra.mxu1 %v6452_v20  ;;  %6431 = vmatprep.subr.bf16.mxu0 %v6430_v27  ;;  %v2221_v20 = vld [vmem:[%s10938_s1 + $0x4e8] sm:$0xff]  ;;  %v6440_v27 = vpack.c.bf16 %v2203_v63, %v2202_v35  ;;  %v1884_v1 = vsel %vm527_vm0, %v467_v21, 0.0  ;;  %v6466_v15 = vpack.c.bf16 %v2249_v52, %v2248_v51  ;;  %v2234_v21 = vld [vmem:[%s10938_s1 + $0x550] sm:$0xff]  ;;  %v2252_v41 = vld [vmem:[%s10938_s1 + $0x5e0] sm:$0xff] }
 0x395   :  { %v4767_v33 = vrot.slane %v1685_v37, %v6907_v32  ;;  %v4763_v14 = vrot.slane %v1682_v16, %v6901_v30  ;;  %6455 = vmatprep.subr.bf16.mxu1 %v6454_v58  ;;  %v6442_v37 = vpack.c.bf16 %v2221_v20, %v2220_v9  ;;  %v2232_v16 = vld [vmem:[%s10938_s1 + $0x540] sm:$0xff]  ;;  %v2233_v24 = vld [vmem:[%s10938_s1 + $0x548] sm:$0xff] }
 0x396   :  { %6433 = vmatpush3.bf16.msra.mxu0 %v6432_v2  ;;  %v6468_v35 = vpack.c.bf16 %v2233_v24, %v2232_v16  ;;  %v515_v51 = vld [vmem:[%s10937_s0 + $0xfa0] sm:$0xff] }
 0x397   :  { %v4768_v8 = vsel %vm2843_vm1, %v4767_v33, %v4763_v14  ;;  %1969 = vadd.xlane.f32.xlu1 %v1968_v50  ;;  %1933 = vadd.xlane.f32.xlu0 %v1932_v22  ;;  %v10974_v50 = vld [vmem:[#allocation5_spill] sm:$0xff]  ;;  %v2250_v33 = vld [vmem:[%s10938_s1 + $0x5d0] sm:$0xff]  ;;  %v2251_v14 = vld [vmem:[%s10938_s1 + $0x5d8] sm:$0xff]  ;;  %v2028_v16 = vsel %vm527_vm0, %v515_v51, 0.0 }
 0x398   :  { %v1688_v47 = vpop.xlane.xlu1 %1687  ;;  %v1736_v25 = vpop.xlane.xlu0 %1735  ;;  %6457 = vmatpush3.bf16.msra.mxu1 %v6456_v55  ;;  %6435 = vmatprep.subr.bf16.mxu0 %v6434_v12  ;;  %v2222_v55 = vld [vmem:[%s10938_s1 + $0x4f0] sm:$0xff]  ;;  %v2223_v12 = vld [vmem:[%s10938_s1 + $0x4f8] sm:$0xff]  ;;  %v6470_v62 = vpack.c.bf16 %v2251_v14, %v2250_v33 }
 0x399   :  { %v4772_v54 = vrot.slane %v1688_v47, %v10973_v48  ;;  %v4851_v18 = vrot.slane %v1736_v25, %v10973_v48  ;;  %6459 = vmatprep.subr.bf16.mxu1 %v6458_v36  ;;  %v6446_v63 = vpack.c.bf16 %v2223_v12, %v2222_v55  ;;  %v469_v33 = vld [vmem:[%s10937_s0 + $0xe30] sm:$0xff] }
 0x39a   :  { %6437 = vmatpush3.bf16.msra.mxu0 %v6436_v28 }
 0x39b   :  { %v4773_v44 = vsel %vm2850_vm2, %v4772_v54, %v4768_v8  ;;  %v4852_v58 = vsel %vm2850_vm2, %v4851_v18, %v4847_v17  ;;  %2023 = vadd.xlane.f32.xlu1 %v2022_v43  ;;  %1972 = vadd.xlane.f32.xlu0 %v1971_v49  ;;  %v514_v17 = vld [vmem:[%s10937_s0 + $0xf98] sm:$0xff]  ;;  %v485_v8 = vld [vmem:[%s10937_s0 + $0xeb0] sm:$0xff]  ;;  %v468_v49 = vld [vmem:[%s10937_s0 + $0xe28] sm:$0xff] }
 0x39c   :  { %v1826_v6 = vpop.xlane.xlu1 %1825  ;;  %v1739_v2 = vpop.xlane.xlu0 %1738  ;;  %6461 = vmatpush3.bf16.msra.mxu1 %v6460_v53  ;;  %6439 = vmatprep.subr.bf16.mxu0 %v6438_v26  ;;  %v2025_v31 = vsel %vm527_vm0, %v514_v17, 0.0  ;;  %v2235_v53 = vld [vmem:[%s10938_s1 + $0x558] sm:$0xff]  ;;  %v6448_v26 = vpack.c.bf16 %v2207_v0, %v2206_v34  ;;  %v2253_v54 = vld [vmem:[%s10938_s1 + $0x5e8] sm:$0xff]  ;;  %v1938_v20 = vsel %vm527_vm0, %v485_v8, 0.0 }
 0x39d   :  { %v4856_v22 = vrot.slane %v1739_v2, %v10974_v50  ;;  %6463 = vmatprep.subr.bf16.mxu1 %v6462_v3  ;;  %v5000_v47 = vrot.slane %v1826_v6, %v6901_v30  ;;  %v6472_v52 = vpack.c.bf16 %v2235_v53, %v2234_v21  ;;  %v6474_v10 = vpack.c.bf16 %v2253_v54, %v2252_v41  ;;  %v2236_v6 = vld [vmem:[%s10938_s1 + $0x560] sm:$0xff]  ;;  %v2237_v2 = vld [vmem:[%s10938_s1 + $0x568] sm:$0xff]  ;;  %v2239_v34 = vld [vmem:[%s10938_s1 + $0x578] sm:$0xff] }
 0x39e   :  { %6441 = vmatpush3.bf16.msra.mxu0 %v6440_v27  ;;  %v1887_v27 = vsel %vm527_vm0, %v468_v49, 0.0  ;;  %v6476_v24 = vpack.c.bf16 %v2237_v2, %v2236_v6  ;;  %v499_v49 = vld [vmem:[%s10937_s0 + $0xf20] sm:$0xff]  ;;  %v517_v6 = vld [vmem:[%s10937_s0 + $0xfb0] sm:$0xff]  ;;  %v500_v2 = vld [vmem:[%s10937_s0 + $0xf28] sm:$0xff] }
 0x39f   :  { %v4857_v36 = vsel %vm2857_vm3, %v4856_v22, %v4852_v58  ;;  %1936 = vadd.xlane.f32.xlu1 %v1935_v60  ;;  %1885 = vadd.xlane.f32.xlu0 %v1884_v1  ;;  %v10975_v58 = vld [vmem:[#allocation7_spill] sm:$0xff]  ;;  %v1980_v54 = vsel %vm527_vm0, %v499_v49, 0.0 }
 0x3a0   :  { %v1691_v5 = vpop.xlane.xlu1 %1690  ;;  %v1829_v28 = vpop.xlane.xlu0 %1828  ;;  %6465 = vmatpush3.bf16.msra.mxu1 %v6464_v11  ;;  %6443 = vmatprep.subr.bf16.mxu0 %v6442_v37  ;;  %v2254_v60 = vld [vmem:[%s10938_s1 + $0x5f0] sm:$0xff]  ;;  %v2255_v1 = vld [vmem:[%s10938_s1 + $0x5f8] sm:$0xff] }
 0x3a1   :  { %v4777_v25 = vrot.slane %v1691_v5, %v10974_v50  ;;  %v5004_v43 = vrot.slane %v1829_v28, %v6907_v32  ;;  %6467 = vmatprep.subr.bf16.mxu1 %v6466_v15  ;;  %v486_v15 = vld [vmem:[%s10937_s0 + $0xeb8] sm:$0xff]  ;;  %v6478_v14 = vpack.c.bf16 %v2255_v1, %v2254_v60 }
 0x3a2   :  { %6445 = vmatpush3.bf16.msra.mxu0 %v6444_v19  ;;  %v1941_v8 = vsel %vm527_vm0, %v486_v15, 0.0  ;;  %v471_v15 = vld [vmem:[%s10937_s0 + $0xe40] sm:$0xff] }
 0x3a3   :  { %v4778_v18 = vsel %vm2857_vm3, %v4777_v25, %v4773_v44  ;;  %v5005_v3 = vsel %vm2843_vm1, %v5004_v43, %v5000_v47  ;;  %2026 = vadd.xlane.f32.xlu1 %v2025_v31  ;;  %1975 = vadd.xlane.f32.xlu0 %v1974_v38  ;;  %v498_v44 = vld [vmem:[%s10937_s0 + $0xf18] sm:$0xff]  ;;  %v516_v43 = vld [vmem:[%s10937_s0 + $0xfa8] sm:$0xff] }
 0x3a4   :  { %v1778_v45 = vpop.xlane.xlu1 %1777  ;;  %v1742_v9 = vpop.xlane.xlu0 %1741  ;;  %6469 = vmatpush3.bf16.msra.mxu1 %v6468_v35  ;;  %6447 = vmatprep.subr.bf16.mxu0 %v6446_v63  ;;  %v1977_v22 = vsel %vm527_vm0, %v498_v44, 0.0  ;;  %v1890_v35 = vsel %vm527_vm0, %v469_v33, 0.0  ;;  %v2031_v41 = vsel %vm527_vm0, %v516_v43, 0.0 }
 0x3a5   :  { %v4861_v39 = vrot.slane %v1742_v9, %v10975_v58  ;;  %6471 = vmatprep.subr.bf16.mxu1 %v6470_v62  ;;  %v4921_v0 = vrot.slane %v1778_v45, %v6901_v30  ;;  %v487_v9 = vld [vmem:[%s10937_s0 + $0xec0] sm:$0xff] }
 0x3a6   :  { %6449 = vmatpush3.bf16.msra.mxu0 %v6448_v26 }
 0x3a7   :  { %v4862_v17 = vsel %vm2864_vm4, %v4861_v39, %v4857_v36  ;;  %v6042_v4 = vpop.f32.mrb[0].mxu0  ;;  %1939 = vadd.xlane.f32.xlu1 %v1938_v20  ;;  %1888 = vadd.xlane.f32.xlu0 %v1887_v27  ;;  %v2238_v36 = vld [vmem:[%s10938_s1 + $0x570] sm:$0xff]  ;;  %v470_v20 = vld [vmem:[%s10937_s0 + $0xe38] sm:$0xff]  ;;  %v1944_v39 = vsel %vm527_vm0, %v487_v9, 0.0 }
 0x3a8   :  { %v6043_v11 = vpop.f32.mrb[1].mxu0  ;;  %v1832_v37 = vpop.xlane.xlu1 %1831  ;;  %6473 = vmatpush3.bf16.msra.mxu1 %v6472_v52  ;;  %v6480_v63 = vpack.c.bf16 %v2239_v34, %v2238_v36  ;;  %v1893_v44 = vsel %vm527_vm0, %v470_v20, 0.0  ;;  %v1896_v36 = vsel %vm527_vm0, %v471_v15, 0.0 }
 0x3a9   :  { %v10128_v55 = vadd.f32 %v6043_v11, %v6042_v4  ;;  %v5009_v12 = vrot.slane %v1832_v37, %v10973_v48  ;;  %v1781_v19 = vpop.xlane.xlu0 %1780  ;;  %6475 = vmatprep.subr.bf16.mxu1 %v6474_v10  ;;  %v2034_v4 = vsel %vm527_vm0, %v517_v6, 0.0  ;;  %v1983_v11 = vsel %vm527_vm0, %v500_v2, 0.0  ;;  %v520_v2 = vld [vmem:[%s10937_s0 + $0xfc8] sm:$0xff] }
 0x3aa   :  { %v4925_v5 = vrot.slane %v1781_v19, %v6907_v32 }
 0x3ab   :  { %v5010_v28 = vsel %vm2850_vm2, %v5009_v12, %v5005_v3  ;;  %2029 = vadd.xlane.f32.xlu1 %v2028_v16  ;;  %1978 = vadd.xlane.f32.xlu0 %v1977_v22  ;;  %v488_v22 = vld [vmem:[%s10937_s0 + $0xec8] sm:$0xff] }
 0x3ac   :  { %v4926_v31 = vsel %vm2843_vm1, %v4925_v5, %v4921_v0  ;;  %v1745_v38 = vpop.xlane.xlu1 %1744  ;;  %6477 = vmatpush3.bf16.msra.mxu1 %v6476_v24  ;;  %v518_v0 = vld [vmem:[%s10937_s0 + $0xfb8] sm:$0xff]  ;;  %v501_v5 = vld [vmem:[%s10937_s0 + $0xf30] sm:$0xff] }
 0x3ad   :  { %v4866_v47 = vrot.slane %v1745_v38, %v6919_v40  ;;  %v1694_v25 = vpop.xlane.xlu0 %1693  ;;  %6479 = vmatprep.subr.bf16.mxu1 %v6478_v14  ;;  %v1947_v14 = vsel %vm527_vm0, %v488_v22, 0.0  ;;  %v1986_v38 = vsel %vm527_vm0, %v501_v5, 0.0  ;;  %v474_v22 = vld [vmem:[%s10937_s0 + $0xe58] sm:$0xff] }
 0x3ae   :  { %v4782_v62 = vrot.slane %v1694_v25, %v10975_v58 }
 0x3af   :  { %v10155_v21 = vsel %vm2871_vm5, %v4866_v47, %v4862_v17  ;;  %1942 = vadd.xlane.f32.xlu1 %v1941_v8  ;;  %1891 = vadd.xlane.f32.xlu0 %v1890_v35  ;;  %v472_v47 = vld [vmem:[%s10937_s0 + $0xe48] sm:$0xff] }
 0x3b0   :  { %v4783_v53 = vsel %vm2864_vm4, %v4782_v62, %v4778_v18  ;;  %v1835_v26 = vpop.xlane.xlu1 %1834  ;;  %6481 = vmatpush3.bf16.msra.mxu1 %v6480_v63  ;;  %v489_v63 = vld [vmem:[%s10937_s0 + $0xed0] sm:$0xff] }
 0x3b1   :  { %v5014_v3 = vrot.slane %v1835_v26, %v10974_v50  ;;  %v1784_v45 = vpop.xlane.xlu0 %1783  ;;  %v1899_v26 = vsel %vm527_vm0, %v472_v47, 0.0 }
 0x3b2   :  { %v4930_v27 = vrot.slane %v1784_v45, %v10973_v48 }
 0x3b3   :  { %v5015_v18 = vsel %vm2857_vm3, %v5014_v3, %v5010_v28  ;;  %2032 = vadd.xlane.f32.xlu1 %v2031_v41  ;;  %1981 = vadd.xlane.f32.xlu0 %v1980_v54  ;;  %v519_v54 = vld [vmem:[%s10937_s0 + $0xfc0] sm:$0xff]  ;;  %v502_v3 = vld [vmem:[%s10937_s0 + $0xf38] sm:$0xff] }
 0x3b4   :  { %v4931_v51 = vsel %vm2850_vm2, %v4930_v27, %v4926_v31  ;;  %v10170_v52 = vpop.xlane.xlu1 %1747  ;;  %v2037_v31 = vsel %vm527_vm0, %v518_v0, 0.0  ;;  %v2040_v9 = vsel %vm527_vm0, %v519_v54, 0.0  ;;  %v1989_v20 = vsel %vm527_vm0, %v502_v3, 0.0 }
 0x3b5   :  { %v1697_v10 = vpop.xlane.xlu0 %1696 }
 0x3b6   :  { %v4787_v60 = vrot.slane %v1697_v10, %v6919_v40 }
 0x3b7   :  { %1945 = vadd.xlane.f32.xlu1 %v1944_v39  ;;  %1894 = vadd.xlane.f32.xlu0 %v1893_v44 }
 0x3b8   :  { %v10182_v1 = vsel %vm2871_vm5, %v4787_v60, %v4783_v53  ;;  %v1838_v17 = vpop.xlane.xlu1 %1837  ;;  %v1950_v53 = vsel %vm527_vm0, %v489_v63, 0.0  ;;  %v503_v60 = vld [vmem:[%s10937_s0 + $0xf40] sm:$0xff] }
 0x3b9   :  { %v5019_v37 = vrot.slane %v1838_v17, %v10975_v58  ;;  %v1787_v16 = vpop.xlane.xlu0 %1786 }
 0x3ba   :  { %v4935_v24 = vrot.slane %v1787_v16, %v10974_v50  ;;  %v491_v16 = vld [vmem:[%s10937_s0 + $0xee0] sm:$0xff] }
 0x3bb   :  { %v5020_v12 = vsel %vm2864_vm4, %v5019_v37, %v5015_v18  ;;  %2035 = vadd.xlane.f32.xlu1 %v2034_v4  ;;  %1984 = vadd.xlane.f32.xlu0 %v1983_v11  ;;  %v490_v18 = vld [vmem:[%s10937_s0 + $0xed8] sm:$0xff]  ;;  %v2043_v4 = vsel %vm527_vm0, %v520_v2, 0.0  ;;  %v1992_v11 = vsel %vm527_vm0, %v503_v60, 0.0 }
 0x3bc   :  { %v4936_v19 = vsel %vm2857_vm3, %v4935_v24, %v4931_v51  ;;  %v10196_v33 = vpop.xlane.xlu1 %1750  ;;  %v473_v51 = vld [vmem:[%s10937_s0 + $0xe50] sm:$0xff]  ;;  %v1953_v44 = vsel %vm527_vm0, %v490_v18, 0.0  ;;  %v1956_v24 = vsel %vm527_vm0, %v491_v16, 0.0 }
 0x3bd   :  { %v10200_v34 = vpop.xlane.xlu0 %1699  ;;  %v1902_v10 = vsel %vm527_vm0, %v473_v51, 0.0  ;;  %v493_v18 = vld [vmem:[%s10937_s0 + $0xef0] sm:$0xff]  ;;  %v476_v51 = vld [vmem:[%s10937_s0 + $0xe68] sm:$0xff] }
 0x3be   :  { %v1911_v2 = vsel %vm527_vm0, %v476_v51, 0.0  ;;  %v524_v51 = vld [vmem:[%s10937_s0 + $0xfe8] sm:$0xff] }
 0x3bf   :  { %1948 = vadd.xlane.f32.xlu1 %v1947_v14  ;;  %1897 = vadd.xlane.f32.xlu0 %v1896_v36  ;;  %v521_v14 = vld [vmem:[%s10937_s0 + $0xfd0] sm:$0xff]  ;;  %v504_v36 = vld [vmem:[%s10937_s0 + $0xf48] sm:$0xff] }
 0x3c0   :  { %v1841_v28 = vpop.xlane.xlu1 %1840  ;;  %v2046_v5 = vsel %vm527_vm0, %v521_v14, 0.0 }
 0x3c1   :  { %v5024_v8 = vrot.slane %v1841_v28, %v6919_v40  ;;  %v1790_v35 = vpop.xlane.xlu0 %1789  ;;  %v1995_v28 = vsel %vm527_vm0, %v504_v36, 0.0 }
 0x3c2   :  { %v4940_v25 = vrot.slane %v1790_v35, %v10975_v58 }
 0x3c3   :  { %v10219_v43 = vsel %vm2871_vm5, %v5024_v8, %v5020_v12  ;;  %2038 = vadd.xlane.f32.xlu1 %v2037_v31  ;;  %1987 = vadd.xlane.f32.xlu0 %v1986_v38  ;;  %v1905_v12 = vsel %vm527_vm0, %v474_v22, 0.0  ;;  %v492_v38 = vld [vmem:[%s10937_s0 + $0xee8] sm:$0xff]  ;;  %v475_v8 = vld [vmem:[%s10937_s0 + $0xe60] sm:$0xff] }
 0x3c4   :  { %v10222_v49 = vsel %vm2864_vm4, %v4940_v25, %v4936_v19  ;;  %v10224_v62 = vpop.xlane.xlu1 %1753  ;;  %v1959_v63 = vsel %vm527_vm0, %v492_v38, 0.0  ;;  %v1908_v47 = vsel %vm527_vm0, %v475_v8, 0.0  ;;  %v2272_v22 = vld [vmem:[%s10938_s1 + $0x680] sm:$0xff] }
 0x3c5   :  { %v10228_v41 = vpop.xlane.xlu0 %1702 }
 0x3c7   :  { %1951 = vadd.xlane.f32.xlu1 %v1950_v53  ;;  %1900 = vadd.xlane.f32.xlu0 %v1899_v26  ;;  %v522_v53 = vld [vmem:[%s10937_s0 + $0xfd8] sm:$0xff]  ;;  %v505_v26 = vld [vmem:[%s10937_s0 + $0xf50] sm:$0xff] }
 0x3c8   :  { %v10236_v45 = vpop.xlane.xlu1 %1843  ;;  %v2049_v3 = vsel %vm527_vm0, %v522_v53, 0.0 }
 0x3c9   :  { %v10240_v27 = vpop.xlane.xlu0 %1792 }
 0x3cb   :  { %2041 = vadd.xlane.f32.xlu1 %v2040_v9  ;;  %1990 = vadd.xlane.f32.xlu0 %v1989_v20  ;;  %v1998_v9 = vsel %vm527_vm0, %v505_v26, 0.0 }
 0x3cc   :  { %v10248_v39 = vpop.xlane.xlu1 %1756 }
 0x3cd   :  { %v10252_v6 = vpop.xlane.xlu0 %1705 }
 0x3cf   :  { %1954 = vadd.xlane.f32.xlu1 %v1953_v44  ;;  %1903 = vadd.xlane.f32.xlu0 %v1902_v10  ;;  %v1962_v10 = vsel %vm527_vm0, %v493_v18, 0.0 }
 0x3d0   :  { %v10260_v17 = vpop.xlane.xlu1 %1846 }
 0x3d1   :  { %v10264_v37 = vpop.xlane.xlu0 %1795 }
 0x3d3   :  { %2044 = vadd.xlane.f32.xlu1 %v2043_v4  ;;  %1993 = vadd.xlane.f32.xlu0 %v1992_v11  ;;  %v523_v4 = vld [vmem:[%s10937_s0 + $0xfe0] sm:$0xff]  ;;  %v506_v11 = vld [vmem:[%s10937_s0 + $0xf58] sm:$0xff] }
 0x3d4   :  { %v10272_v15 = vpop.xlane.xlu1 %1759  ;;  %v2052_v36 = vsel %vm527_vm0, %v523_v4, 0.0 }
 0x3d5   :  { %v10276_v19 = vpop.xlane.xlu0 %1708 }
 0x3d7   :  { %1957 = vadd.xlane.f32.xlu1 %v1956_v24  ;;  %1906 = vadd.xlane.f32.xlu0 %v1905_v12  ;;  %v2273_v24 = vld [vmem:[%s10938_s1 + $0x688] sm:$0xff] }
 0x3d8   :  { %v10284_v0 = vpop.xlane.xlu1 %1849 }
 0x3d9   :  { %v10288_v31 = vpop.xlane.xlu0 %1798 }
 0x3db   :  { %2047 = vadd.xlane.f32.xlu1 %v2046_v5  ;;  %1996 = vadd.xlane.f32.xlu0 %v1995_v28  ;;  %v2001_v5 = vsel %vm527_vm0, %v506_v11, 0.0  ;;  %v6482_v28 = vpack.c.bf16 %v2273_v24, %v2272_v22  ;;  %v2304_v11 = vld [vmem:[%s10938_s1 + $0x780] sm:$0xff]  ;;  %v508_v22 = vld [vmem:[%s10937_s0 + $0xf68] sm:$0xff]  ;;  %v478_v24 = vld [vmem:[%s10937_s0 + $0xe78] sm:$0xff] }
 0x3dc   :  { %v10296_v35 = vpop.xlane.xlu1 %1762 }
 0x3dd   :  { %v10300_v25 = vpop.xlane.xlu0 %1711  ;;  %6483 = vmatprep.subr.bf16.mxu0 %v6482_v28  ;;  %v4876_v28 = vrot.slane %v10196_v33, %v6941_v56  ;;  %v525_v33 = vld [vmem:[%s10937_s0 + $0xff0] sm:$0xff] }
 0x3df   :  { %1960 = vadd.xlane.f32.xlu1 %v1959_v63  ;;  %1909 = vadd.xlane.f32.xlu0 %v1908_v47  ;;  %v494_v63 = vld [vmem:[%s10937_s0 + $0xef8] sm:$0xff]  ;;  %v477_v47 = vld [vmem:[%s10937_s0 + $0xe70] sm:$0xff] }
 0x3e0   :  { %v10308_v54 = vpop.xlane.xlu1 %1852 }
 0x3e1   :  { %v10312_v20 = vpop.xlane.xlu0 %1801 }
 0x3e3   :  { %2050 = vadd.xlane.f32.xlu1 %v2049_v3  ;;  %1999 = vadd.xlane.f32.xlu0 %v1998_v9  ;;  %v1965_v3 = vsel %vm527_vm0, %v494_v63, 0.0  ;;  %v1914_v9 = vsel %vm527_vm0, %v477_v47, 0.0  ;;  %v2007_v47 = vsel %vm527_vm0, %v508_v22, 0.0 }
 0x3e4   :  { %v10320_v44 = vpop.xlane.xlu1 %1765 }
 0x3e5   :  { %v10324_v60 = vpop.xlane.xlu0 %1714 }
 0x3e7   :  { %v6077_v16 = vpop.f32.mrb[0].mxu1  ;;  %1963 = vadd.xlane.f32.xlu1 %v1962_v10  ;;  %1912 = vadd.xlane.f32.xlu0 %v1911_v2  ;;  %v507_v10 = vld [vmem:[%s10937_s0 + $0xf60] sm:$0xff]  ;;  %v2055_v2 = vsel %vm527_vm0, %v524_v51, 0.0 }
 0x3e8   :  { %v6078_v12 = vpop.f32.mrb[1].mxu1  ;;  %v10338_v14 = vpop.xlane.xlu1 %1855  ;;  %v2004_v4 = vsel %vm527_vm0, %v507_v10, 0.0  ;;  %v4891_v10 = vrot.slane %v10272_v15, %v6994_v29  ;;  %v2058_v15 = vsel %vm527_vm0, %v525_v33, 0.0 }
 0x3e9   :  { %v6079_v38 = vadd.f32 %v6078_v12, %v6077_v16  ;;  %v10342_v8 = vpop.xlane.xlu0 %1804  ;;  %v2305_v12 = vld [vmem:[%s10938_s1 + $0x788] sm:$0xff] }
 0x3eb   :  { %v10351_v53 = vadd.f32 %v6079_v38, %v10128_v55  ;;  %2053 = vadd.xlane.f32.xlu1 %v2052_v36  ;;  %2002 = vadd.xlane.f32.xlu0 %v2001_v5  ;;  %v4871_v36 = vrot.slane %v10170_v52, %v6944_v57  ;;  %v6514_v5 = vpack.c.bf16 %v2305_v12, %v2304_v11 }
 0x3ec   :  { %v1769_v26 = vpop.xlane.xlu1 %1768  ;;  %v4881_v38 = vrot.slane %v10224_v62, %v6974_v13  ;;  %v4886_v52 = vrot.slane %v10248_v39, %v6962_v7  ;;  %v4792_v11 = vrot.slane %v10200_v34, %v6944_v57  ;;  %v4797_v12 = vrot.slane %v10228_v41, %v6941_v56  ;;  %v510_v34 = vld [vmem:[%s10937_s0 + $0xf78] sm:$0xff] }
 0x3ed   :  { %v10355_v18 = vpop.xlane.xlu0 %1717  ;;  %6515 = vmatprep.subr.bf16.mxu1 %v6514_v5  ;;  %v4872_v62 = vsel %vm2878_vm6, %v4871_v36, %v10155_v21  ;;  %v4901_v21 = vrot.slane %v10320_v44, %v7002_v42  ;;  %v4906_v36 = vrot.slane %v1769_v26, %v7008_v46  ;;  %v526_v44 = vld [vmem:[%s10937_s0 + $0xff8] sm:$0xff] }
 0x3ee   :  { %v4793_v26 = vsel %vm2878_vm6, %v4792_v11, %v10182_v1  ;;  %v5029_v1 = vrot.slane %v10236_v45, %v6944_v57  ;;  %v4950_v45 = vrot.slane %v10264_v37, %v6944_v57 }
 0x3ef   :  { %1966 = vadd.xlane.f32.xlu1 %v1965_v3  ;;  %1915 = vadd.xlane.f32.xlu0 %v1914_v9  ;;  %v1917_v3 = vsel %vm527_vm0, %v478_v24, 0.0  ;;  %v509_v9 = vld [vmem:[%s10937_s0 + $0xf70] sm:$0xff]  ;;  %v4798_v33 = vsel %vm2885_vm7, %v4797_v12, %v4793_v26  ;;  %v10979_v12 = vld [vmem:[#allocation9_spill] sm:$0xff] }
 0x3f0   :  { %v10363_v55 = vpop.xlane.xlu1 %1858  ;;  %v2010_v39 = vsel %vm527_vm0, %v509_v9, 0.0  ;;  %v2013_v9 = vsel %vm527_vm0, %v510_v34, 0.0  ;;  %v4960_v34 = vrot.slane %v10312_v20, %v6974_v13  ;;  %v2256_v20 = vld [vmem:[%s10938_s1 + $0x600] sm:$0xff] }
 0x3f1   :  { %v10370_v16 = vpop.xlane.xlu0 %1807 }
 0x3f3   :  { %2056 = vadd.xlane.f32.xlu1 %v2055_v2  ;;  %2005 = vadd.xlane.f32.xlu0 %v2004_v4  ;;  %v4877_v2 = vsel %vm2885_vm7, %v4876_v28, %v4872_v62  ;;  %v4896_v4 = vrot.slane %v10296_v35, %v6982_v23  ;;  %v4802_v62 = vrot.slane %v10252_v6, %v6974_v13 }
 0x3f4   :  { %v1772_v63 = vpop.xlane.xlu1 %1771  ;;  %v4882_v22 = vsel %vm10976_vm8, %v4881_v38, %v4877_v2  ;;  %vm10978_vm8 = vcmask 851712   ;;  %v4812_v6 = vrot.slane %v10300_v25, %v6994_v29 }
 0x3f5   :  { %v10394_v51 = vpop.xlane.xlu0 %1720  ;;  %v4887_v35 = vsel %vm2899_vm9, %v4886_v52, %v4882_v22  ;;  %v4911_v38 = vrot.slane %v1772_v63, %v7022_v59  ;;  %v2061_v52 = vsel %vm527_vm0, %v526_v44, 0.0  ;;  %v5034_v22 = vrot.slane %v10260_v17, %v6941_v56 }
 0x3f6   :  { %v4892_v28 = vsel %vm10977_vm10, %v4891_v10, %v4887_v35  ;;  %vm10980_vm0 = vcmask 589312   ;;  %v4955_v35 = vrot.slane %v10288_v31, %v6941_v56  ;;  %v4827_v44 = vrot.slane %v10394_v51, %v7008_v46 }
 0x3f7   :  { %2008 = vadd.xlane.f32.xlu1 %v2007_v47  ;;  %1918 = vadd.xlane.f32.xlu0 %v1917_v3  ;;  %v4897_v41 = vsel %vm2913_vm11, %v4896_v4, %v4892_v28  ;;  %v4945_v4 = vrot.slane %v10240_v27, %v6919_v40  ;;  %v5039_v27 = vrot.slane %v10284_v0, %v6974_v13 }
 0x3f8   :  { %v10412_v24 = vpop.xlane.xlu1 %1861  ;;  %v4902_v47 = vsel %vm10978_vm8, %v4901_v21, %v4897_v41  ;;  %v4803_v25 = vsel %vm10980_vm0, %v4802_v62, %v4798_v33  ;;  %v5030_v0 = vsel %vm2878_vm6, %v5029_v1, %v10219_v43  ;;  %vm10981_vm8 = vmmov %vm10980_vm0  ;;  %vm10982_vm0 = vcmask 851712   ;;  %v2274_v62 = vld [vmem:[%s10938_s1 + $0x690] sm:$0xff] }
 0x3f9   :  { %v10419_v5 = vpop.xlane.xlu0 %1810  ;;  %v4907_v63 = vsel %vm2927_vm13, %v4906_v36, %v4902_v47  ;;  %v4822_v36 = vrot.slane %v10355_v18, %v7002_v42  ;;  %v4946_v28 = vsel %vm2871_vm5, %v4945_v4, %v10222_v49  ;;  %v5035_v31 = vsel %vm2885_vm7, %v5034_v22, %v5030_v0  ;;  %v2257_v49 = vld [vmem:[%s10938_s1 + $0x608] sm:$0xff] }
 0x3fa   :  { %v4912_v11 = vsel %vm2934_vm14, %v4911_v38, %v4907_v63  ;;  %v4951_v41 = vsel %vm2878_vm6, %v4950_v45, %v4946_v28  ;;  %v5040_v43 = vsel %vm10981_vm8, %v5039_v27, %v5035_v31  ;;  %v2275_v63 = vld [vmem:[%s10938_s1 + $0x698] sm:$0xff]  ;;  %v5049_v1 = vrot.slane %v10338_v14, %v6994_v29  ;;  %v2258_v27 = vld [vmem:[%s10938_s1 + $0x610] sm:$0xff] }
 0x3fb   :  { %2011 = vadd.xlane.f32.xlu1 %v2010_v39  ;;  %2059 = vadd.xlane.f32.xlu0 %v2058_v15  ;;  %v4807_v39 = vrot.slane %v10276_v19, %v6962_v7  ;;  %v4817_v19 = vrot.slane %v10324_v60, %v6982_v23  ;;  %v4956_v51 = vsel %vm2885_vm7, %v4955_v35, %v4951_v41  ;;  %v2259_v14 = vld [vmem:[%s10938_s1 + $0x618] sm:$0xff]  ;;  %v2276_v35 = vld [vmem:[%s10938_s1 + $0x6a0] sm:$0xff] }
 0x3fc   :  { %v1775_v3 = vpop.xlane.xlu1 %1774  ;;  %v4975_v4 = vrot.slane %v10419_v5, %v6982_v23  ;;  %v5054_v22 = vrot.slane %v10363_v55, %v6982_v23  ;;  %v6486_v45 = vpack.c.bf16 %v2275_v63, %v2274_v62  ;;  %v6488_v31 = vpack.c.bf16 %v2259_v14, %v2258_v27  ;;  %v2263_v27 = vld [vmem:[%s10938_s1 + $0x638] sm:$0xff]  ;;  %v2290_v14 = vld [vmem:[%s10938_s1 + $0x710] sm:$0xff] }
 0x3fd   :  { %v4916_v10 = vrot.slane %v1775_v3, %v7027_v61  ;;  %v1724_v2 = vpop.xlane.xlu0 %1723  ;;  %v4808_v60 = vsel %vm2899_vm9, %v4807_v39, %v4803_v25  ;;  %v5044_v3 = vrot.slane %v10308_v54, %v6962_v7 }
 0x3fe   :  { %v4813_v18 = vsel %vm10977_vm10, %v4812_v6, %v4808_v60  ;;  %v4832_v38 = vrot.slane %v1724_v2, %v7022_v59  ;;  %vm10983_vm10 = vmmov %vm10981_vm8  ;;  %v4970_v2 = vrot.slane %v10370_v16, %v6994_v29  ;;  %vm10985_vm8 = vcmask 720512  }
 0x3ff   :  { %2014 = vadd.xlane.f32.xlu1 %v2013_v9  ;;  %2062 = vadd.xlane.f32.xlu0 %v2061_v52  ;;  %v4917_v21 = vsel %vm2941_vm15, %v4916_v10, %v4912_v11  ;;  %v4818_v26 = vsel %vm2913_vm11, %v4817_v19, %v4813_v18  ;;  %v4965_v9 = vrot.slane %v10342_v8, %v6962_v7 }
 0x400   :  { %v10458_v15 = vpop.xlane.xlu1 %1864  ;;  %v5402_v17 = vsel %vm5392_vm12, %v4917_v21, %v10979_v12  ;;  %v4823_v52 = vsel %vm10982_vm0, %v4822_v36, %v4818_v26  ;;  %v4961_v10 = vsel %vm10983_vm10, %v4960_v34, %v4956_v51  ;;  %v6484_v11 = vpack.c.bf16 %v2257_v49, %v2256_v20  ;;  %v2277_v36 = vld [vmem:[%s10938_s1 + $0x6a8] sm:$0xff]  ;;  %vm10986_vm0 = vmmov %vm10985_vm8 }
 0x401   :  { %v1814_v37 = vpop.xlane.xlu0 %1813  ;;  %5769 = vmatprep.mubr.f32.mxu0 %v5402_v17  ;;  %v4828_v54 = vsel %vm2927_vm13, %v4827_v44, %v4823_v52  ;;  %v4966_v5 = vsel %vm2899_vm9, %v4965_v9, %v4961_v10  ;;  %v5059_v19 = vrot.slane %v10412_v24, %v7002_v42  ;;  %v10984_v17 = vld [vmem:[#allocation8_spill] sm:$0xff]  ;;  %v5064_v24 = vrot.slane %v10458_v15, %v7008_v46  ;;  %v2261_v26 = vld [vmem:[%s10938_s1 + $0x628] sm:$0xff]  ;;  %v2278_v52 = vld [vmem:[%s10938_s1 + $0x6b0] sm:$0xff] }
 0x402   :  { %v4833_v39 = vsel %vm2934_vm14, %v4832_v38, %v4828_v54  ;;  %v4980_v6 = vrot.slane %v1814_v37, %v7002_v42  ;;  %v5045_v37 = vsel %vm2899_vm9, %v5044_v3, %v5040_v43  ;;  %v4971_v0 = vsel %vm10985_vm8, %v4970_v2, %v4966_v5  ;;  %v2260_v15 = vld [vmem:[%s10938_s1 + $0x620] sm:$0xff]  ;;  %v2289_v9 = vld [vmem:[%s10938_s1 + $0x708] sm:$0xff]  ;;  %v2306_v2 = vld [vmem:[%s10938_s1 + $0x790] sm:$0xff] }
 0x403   :  { %v5050_v34 = vsel %vm10986_vm0, %v5049_v1, %v5045_v37  ;;  %v4976_v44 = vsel %vm2913_vm11, %v4975_v4, %v4971_v0  ;;  %vm10987_vm10 = vcmask 851712   ;;  %v6490_v43 = vpack.c.bf16 %v2277_v36, %v2276_v35  ;;  %v2307_v54 = vld [vmem:[%s10938_s1 + $0x798] sm:$0xff]  ;;  %v2280_v35 = vld [vmem:[%s10938_s1 + $0x6c0] sm:$0xff]  ;;  %v2281_v36 = vld [vmem:[%s10938_s1 + $0x6c8] sm:$0xff] }
 0x404   :  { %v1817_v47 = vpop.xlane.xlu1 %1816  ;;  %v5055_v18 = vsel %vm2913_vm11, %v5054_v22, %v5050_v34  ;;  %v4981_v38 = vsel %vm10987_vm10, %v4980_v6, %v4976_v44  ;;  %vm10988_vm8 = vmmov %vm10987_vm10  ;;  %v6492_v4 = vpack.c.bf16 %v2261_v26, %v2260_v15  ;;  %v10989_v22 = vld [vmem:[#allocation10_spill] sm:$0xff]  ;;  %v2308_v0 = vld [vmem:[%s10938_s1 + $0x7a0] sm:$0xff] }
 0x405   :  { %v1727_v33 = vpop.xlane.xlu0 %1726  ;;  %v4985_v55 = vrot.slane %v1817_v47, %v7008_v46  ;;  %v2288_v47 = vld [vmem:[%s10938_s1 + $0x700] sm:$0xff]  ;;  %v5060_v20 = vsel %vm10988_vm8, %v5059_v19, %v5055_v18 }
 0x406   :  { %v4837_v8 = vrot.slane %v1727_v33, %v7027_v61  ;;  %v2279_v33 = vld [vmem:[%s10938_s1 + $0x6b8] sm:$0xff]  ;;  %v5065_v62 = vsel %vm2927_vm13, %v5064_v24, %v5060_v20  ;;  %v2309_v24 = vld [vmem:[%s10938_s1 + $0x7a8] sm:$0xff]  ;;  %v2264_v18 = vld [vmem:[%s10938_s1 + $0x640] sm:$0xff] }
 0x407   :  { %v4986_v49 = vsel %vm2927_vm13, %v4985_v55, %v4981_v38  ;;  %v10990_v55 = vld [vmem:[#allocation11_spill] sm:$0xff]  ;;  %v2265_v38 = vld [vmem:[%s10938_s1 + $0x648] sm:$0xff]  ;;  %v6522_v26 = vpack.c.bf16 %v2309_v24, %v2308_v0 }
 0x408   :  { %v4838_v16 = vsel %vm2941_vm15, %v4837_v8, %v4833_v39  ;;  %v1820_v21 = vpop.xlane.xlu1 %1819  ;;  %v2282_v20 = vld [vmem:[%s10938_s1 + $0x6d0] sm:$0xff]  ;;  %v2297_v0 = vld [vmem:[%s10938_s1 + $0x748] sm:$0xff] }
 0x409   :  { %v1868_v12 = vpop.xlane.xlu0 %1867  ;;  %v5401_v25 = vsel %vm5392_vm12, %v4838_v16, %v10984_v17  ;;  %v4990_v60 = vrot.slane %v1820_v21, %v7022_v59  ;;  %v6516_v16 = vpack.c.bf16 %v2289_v9, %v2288_v47  ;;  %v6494_v21 = vpack.c.bf16 %v2279_v33, %v2278_v52  ;;  %v2293_v47 = vld [vmem:[%s10938_s1 + $0x728] sm:$0xff]  ;;  %v2311_v9 = vld [vmem:[%s10938_s1 + $0x7b8] sm:$0xff]  ;;  %v2286_v24 = vld [vmem:[%s10938_s1 + $0x6f0] sm:$0xff] }
 0x40a   :  { %5770 = vmatmul.mubr.f32.vlgmr.msra.gmra.mrb[4].mxu0 %v5401_v25  ;;  %v5069_v28 = vrot.slane %v1868_v12, %v7022_v59  ;;  %v6518_v17 = vpack.c.bf16 %v2307_v54, %v2306_v2  ;;  %v2291_v25 = vld [vmem:[%s10938_s1 + $0x718] sm:$0xff]  ;;  %v6500_v52 = vpack.c.bf16 %v2265_v38, %v2264_v18  ;;  %v2266_v2 = vld [vmem:[%s10938_s1 + $0x650] sm:$0xff] }
 0x40b   :  { %6485 = vmatpush3.bf16.msra.mxu0 %v6484_v11  ;;  %v4991_v63 = vsel %vm2934_vm14, %v4990_v60, %v4986_v49  ;;  %v2283_v49 = vld [vmem:[%s10938_s1 + $0x6d8] sm:$0xff] }
 0x40c   :  { %v1823_v41 = vpop.xlane.xlu1 %1822  ;;  %6487 = vmatprep.subr.bf16.mxu0 %v6486_v45  ;;  %v5070_v8 = vsel %vm2934_vm14, %v5069_v28, %v5065_v62  ;;  %v2262_v45 = vld [vmem:[%s10938_s1 + $0x630] sm:$0xff]  ;;  %v6520_v28 = vpack.c.bf16 %v2291_v25, %v2290_v14  ;;  %v2267_v54 = vld [vmem:[%s10938_s1 + $0x658] sm:$0xff]  ;;  %v2269_v25 = vld [vmem:[%s10938_s1 + $0x668] sm:$0xff] }
 0x40d   :  { %v4995_v51 = vrot.slane %v1823_v41, %v7027_v61  ;;  %v1871_v3 = vpop.xlane.xlu0 %1870  ;;  %v6496_v60 = vpack.c.bf16 %v2263_v27, %v2262_v45  ;;  %v2292_v41 = vld [vmem:[%s10938_s1 + $0x720] sm:$0xff]  ;;  %v2313_v45 = vld [vmem:[%s10938_s1 + $0x7c8] sm:$0xff]  ;;  %v6504_v14 = vpack.c.bf16 %v2267_v54, %v2266_v2 }
 0x40e   :  { %v5074_v10 = vrot.slane %v1871_v3, %v7027_v61  ;;  %v2310_v3 = vld [vmem:[%s10938_s1 + $0x7b0] sm:$0xff] }
 0x40f   :  { %v4996_v1 = vsel %vm2941_vm15, %v4995_v51, %v4991_v63  ;;  %6489 = vmatpush3.bf16.msra.mxu0 %v6488_v31  ;;  %v6498_v31 = vpack.c.bf16 %v2281_v36, %v2280_v35  ;;  %v6524_v63 = vpack.c.bf16 %v2293_v47, %v2292_v41  ;;  %v2296_v35 = vld [vmem:[%s10938_s1 + $0x740] sm:$0xff] }
 0x410   :  { %v1925_v39 = vpop.xlane.xlu1 %1924  ;;  %v5075_v11 = vsel %vm2941_vm15, %v5074_v10, %v5070_v8  ;;  %v5403_v6 = vsel %vm5392_vm12, %v4996_v1, %v10989_v22  ;;  %6491 = vmatprep.subr.bf16.mxu0 %v6490_v43  ;;  %v6502_v10 = vpack.c.bf16 %v2283_v49, %v2282_v20  ;;  %v2294_v8 = vld [vmem:[%s10938_s1 + $0x730] sm:$0xff]  ;;  %v2284_v22 = vld [vmem:[%s10938_s1 + $0x6e0] sm:$0xff]  ;;  %v6532_v41 = vpack.c.bf16 %v2297_v0, %v2296_v35 }
 0x411   :  { %v5162_v5 = vrot.slane %v1925_v39, %v6907_v32  ;;  %v1922_v19 = vpop.xlane.xlu0 %1921  ;;  %v5404_v12 = vsel %vm5392_vm12, %v5075_v11, %v10990_v55  ;;  %v6526_v39 = vpack.c.bf16 %v2311_v9, %v2310_v3  ;;  %v2295_v11 = vld [vmem:[%s10938_s1 + $0x738] sm:$0xff] }
 0x412   :  { %v5158_v37 = vrot.slane %v1922_v19, %v6901_v30  ;;  %5839 = vmatprep.mubr.f32.mxu1 %v5404_v12  ;;  %v6528_v55 = vpack.c.bf16 %v2295_v11, %v2294_v8  ;;  %v2299_v3 = vld [vmem:[%s10938_s1 + $0x758] sm:$0xff]  ;;  %v2301_v11 = vld [vmem:[%s10938_s1 + $0x768] sm:$0xff] }
 0x413   :  { %5840 = vmatmul.mubr.f32.vlgmr.msra.gmra.mrb[4].mxu1 %v5403_v6  ;;  %6493 = vmatpush3.bf16.msra.mxu0 %v6492_v4  ;;  %v2285_v6 = vld [vmem:[%s10938_s1 + $0x6e8] sm:$0xff] }
 0x414   :  { %v5163_v34 = vsel %vm2843_vm1, %v5162_v5, %v5158_v37  ;;  %v1877_v44 = vpop.xlane.xlu1 %1876  ;;  %6517 = vmatpush3.bf16.msra.mxu1 %v6516_v16  ;;  %6495 = vmatprep.subr.bf16.mxu0 %v6494_v21  ;;  %v2312_v21 = vld [vmem:[%s10938_s1 + $0x7c0] sm:$0xff]  ;;  %v6506_v12 = vpack.c.bf16 %v2285_v6, %v2284_v22  ;;  %v2318_v6 = vld [vmem:[%s10938_s1 + $0x7f0] sm:$0xff] }
 0x415   :  { %v5083_v43 = vrot.slane %v1877_v44, %v6907_v32  ;;  %v1874_v15 = vpop.xlane.xlu0 %1873  ;;  %6519 = vmatprep.subr.bf16.mxu1 %v6518_v17  ;;  %v2268_v17 = vld [vmem:[%s10938_s1 + $0x660] sm:$0xff]  ;;  %v6530_v37 = vpack.c.bf16 %v2313_v45, %v2312_v21  ;;  %v2314_v44 = vld [vmem:[%s10938_s1 + $0x7d0] sm:$0xff] }
 0x416   :  { %v5079_v51 = vrot.slane %v1874_v15, %v6901_v30  ;;  %v2270_v15 = vld [vmem:[%s10938_s1 + $0x670] sm:$0xff] }
 0x417   :  { %6497 = vmatpush3.bf16.msra.mxu0 %v6496_v60  ;;  %v2287_v60 = vld [vmem:[%s10938_s1 + $0x6f8] sm:$0xff] }
 0x418   :  { %v5084_v33 = vsel %vm2843_vm1, %v5083_v43, %v5079_v51  ;;  %v1880_v62 = vpop.xlane.xlu1 %1879  ;;  %6521 = vmatpush3.bf16.msra.mxu1 %v6520_v28  ;;  %6499 = vmatprep.subr.bf16.mxu0 %v6498_v31  ;;  %v2315_v28 = vld [vmem:[%s10938_s1 + $0x7d8] sm:$0xff]  ;;  %v6508_v31 = vpack.c.bf16 %v2269_v25, %v2268_v17  ;;  %v6510_v43 = vpack.c.bf16 %v2287_v60, %v2286_v24  ;;  %v2298_v51 = vld [vmem:[%s10938_s1 + $0x750] sm:$0xff] }
 0x419   :  { %v5088_v1 = vrot.slane %v1880_v62, %v10973_v48  ;;  %v1928_v4 = vpop.xlane.xlu0 %1927  ;;  %6523 = vmatprep.subr.bf16.mxu1 %v6522_v26  ;;  %v2271_v26 = vld [vmem:[%s10938_s1 + $0x678] sm:$0xff]  ;;  %v6534_v49 = vpack.c.bf16 %v2315_v28, %v2314_v44  ;;  %v2317_v62 = vld [vmem:[%s10938_s1 + $0x7e8] sm:$0xff]  ;;  %v6536_v8 = vpack.c.bf16 %v2299_v3, %v2298_v51 }
 0x41a   :  { %v5167_v16 = vrot.slane %v1928_v4, %v10973_v48 }
 0x41b   :  { %v5089_v27 = vsel %vm2850_vm2, %v5088_v1, %v5084_v33  ;;  %6501 = vmatpush3.bf16.msra.mxu0 %v6500_v52  ;;  %v2316_v33 = vld [vmem:[%s10938_s1 + $0x7e0] sm:$0xff] }
 0x41c   :  { %v5168_v5 = vsel %vm2850_vm2, %v5167_v16, %v5163_v34  ;;  %v2018_v19 = vpop.xlane.xlu1 %2017  ;;  %6525 = vmatpush3.bf16.msra.mxu1 %v6524_v63  ;;  %6503 = vmatprep.subr.bf16.mxu0 %v6502_v10  ;;  %v6512_v10 = vpack.c.bf16 %v2271_v26, %v2270_v15  ;;  %v6538_v4 = vpack.c.bf16 %v2317_v62, %v2316_v33  ;;  %v2319_v16 = vld [vmem:[%s10938_s1 + $0x7f8] sm:$0xff] }
 0x41d   :  { %v1931_v36 = vpop.xlane.xlu0 %1930  ;;  %6527 = vmatprep.subr.bf16.mxu1 %v6526_v39  ;;  %v5316_v9 = vrot.slane %v2018_v19, %v6901_v30  ;;  %v2300_v39 = vld [vmem:[%s10938_s1 + $0x760] sm:$0xff]  ;;  %v6542_v19 = vpack.c.bf16 %v2319_v16, %v2318_v6 }
 0x41e   :  { %v5172_v34 = vrot.slane %v1931_v36, %v10974_v50 }
 0x41f   :  { %6505 = vmatpush3.bf16.msra.mxu0 %v6504_v14 }
 0x420   :  { %v5173_v18 = vsel %vm2857_vm3, %v5172_v34, %v5168_v5  ;;  %v1883_v38 = vpop.xlane.xlu1 %1882  ;;  %6529 = vmatpush3.bf16.msra.mxu1 %v6528_v55  ;;  %6507 = vmatprep.subr.bf16.mxu0 %v6506_v12  ;;  %v2302_v55 = vld [vmem:[%s10938_s1 + $0x770] sm:$0xff]  ;;  %v2303_v12 = vld [vmem:[%s10938_s1 + $0x778] sm:$0xff] }
 0x421   :  { %v5093_v47 = vrot.slane %v1883_v38, %v10974_v50  ;;  %v2021_v20 = vpop.xlane.xlu0 %2020  ;;  %6531 = vmatprep.subr.bf16.mxu1 %v6530_v37  ;;  %v6544_v0 = vpack.c.bf16 %v2303_v12, %v2302_v55 }
 0x422   :  { %v5320_v52 = vrot.slane %v2021_v20, %v6907_v32 }
 0x423   :  { %v5094_v63 = vsel %vm2857_vm3, %v5093_v47, %v5089_v27  ;;  %6509 = vmatpush3.bf16.msra.mxu0 %v6508_v31  ;;  %v6540_v27 = vpack.c.bf16 %v2301_v11, %v2300_v39 }
 0x424   :  { %v5321_v2 = vsel %vm2843_vm1, %v5320_v52, %v5316_v9  ;;  %v1970_v54 = vpop.xlane.xlu1 %1969  ;;  %6533 = vmatpush3.bf16.msra.mxu1 %v6532_v41  ;;  %6511 = vmatprep.subr.bf16.mxu0 %v6510_v43 }
 0x425   :  { %v1934_v1 = vpop.xlane.xlu0 %1933  ;;  %6535 = vmatprep.subr.bf16.mxu1 %v6534_v49  ;;  %v5237_v17 = vrot.slane %v1970_v54, %v6901_v30 }
 0x426   :  { %v5177_v22 = vrot.slane %v1934_v1, %v10975_v58 }
 0x427   :  { %6513 = vmatpush3.bf16.msra.mxu0 %v6512_v10 }
 0x428   :  { %v5178_v21 = vsel %vm2864_vm4, %v5177_v22, %v5173_v18  ;;  %v2024_v45 = vpop.xlane.xlu1 %2023  ;;  %6537 = vmatpush3.bf16.msra.mxu1 %v6536_v8 }
 0x429   :  { %v5325_v14 = vrot.slane %v2024_v45, %v10973_v48  ;;  %v1973_v5 = vpop.xlane.xlu0 %1972  ;;  %6539 = vmatprep.subr.bf16.mxu1 %v6538_v4 }
 0x42a   :  { %v5241_v25 = vrot.slane %v1973_v5, %v6907_v32 }
 0x42b   :  { %v5326_v35 = vsel %vm2850_vm2, %v5325_v14, %v5321_v2 }
 0x42c   :  { %v5242_v36 = vsel %vm2843_vm1, %v5241_v25, %v5237_v17  ;;  %v1937_v37 = vpop.xlane.xlu1 %1936  ;;  %6541 = vmatpush3.bf16.msra.mxu1 %v6540_v27  ;;  %vm10991_vm1 = vcmask 589312  }
 0x42d   :  { %v5182_v24 = vrot.slane %v1937_v37, %v6919_v40  ;;  %v1886_v60 = vpop.xlane.xlu0 %1885  ;;  %6543 = vmatprep.subr.bf16.mxu1 %v6542_v19  ;;  %vm10996_vm10 = vmmov %vm10991_vm1 }
 0x42e   :  { %v5098_v34 = vrot.slane %v1886_v60, %v10975_v58 }
 0x42f   :  { %v10738_v44 = vsel %vm2871_vm5, %v5182_v24, %v5178_v21 }
 0x430   :  { %v5099_v30 = vsel %vm2864_vm4, %v5098_v34, %v5094_v63  ;;  %v2027_v28 = vpop.xlane.xlu1 %2026  ;;  %6545 = vmatpush3.bf16.msra.mxu1 %v6544_v0 }
 0x431   :  { %v5330_v32 = vrot.slane %v2027_v28, %v10974_v50  ;;  %v1976_v31 = vpop.xlane.xlu0 %1975 }
 0x432   :  { %v5246_v18 = vrot.slane %v1976_v31, %v10973_v48 }
 0x433   :  { %v5331_v38 = vsel %vm2857_vm3, %v5330_v32, %v5326_v35 }
 0x434   :  { %v5247_v41 = vsel %vm2850_vm2, %v5246_v18, %v5242_v36  ;;  %v1940_v43 = vpop.xlane.xlu1 %1939  ;;  %vm10992_vm2 = vmmov %vm10986_vm0 }
 0x435   :  { %v1889_v15 = vpop.xlane.xlu0 %1888 }
 0x436   :  { %v5103_v26 = vrot.slane %v1889_v15, %v6919_v40 }
 0x438   :  { %v10747_v47 = vsel %vm2871_vm5, %v5103_v26, %v5099_v30  ;;  %v2030_v20 = vpop.xlane.xlu1 %2029 }
 0x439   :  { %v5335_v49 = vrot.slane %v2030_v20, %v10975_v58  ;;  %v1979_v51 = vpop.xlane.xlu0 %1978 }
 0x43a   :  { %v5251_v3 = vrot.slane %v1979_v51, %v10974_v50 }
 0x43b   :  { %v5336_v9 = vsel %vm2864_vm4, %v5335_v49, %v5331_v38  ;;  %v5187_v38 = vrot.slane %v1940_v43, %v6944_v57 }
 0x43c   :  { %v5252_v48 = vsel %vm2857_vm3, %v5251_v3, %v5247_v41  ;;  %v1943_v52 = vpop.xlane.xlu1 %1942  ;;  %vm10993_vm3 = vmmov %vm10988_vm8 }
 0x43d   :  { %v10753_v33 = vpop.xlane.xlu0 %1891  ;;  %v5192_v41 = vrot.slane %v1943_v52, %v6941_v56  ;;  %v5188_v51 = vsel %vm2878_vm6, %v5187_v38, %v10738_v44  ;;  %vm10997_vm8 = vmmov %vm10993_vm3 }
 0x43e   :  { %v5108_v44 = vrot.slane %v10753_v33, %v6944_v57 }
 0x440   :  { %v2033_v62 = vpop.xlane.xlu1 %2032 }
 0x441   :  { %v5340_v63 = vrot.slane %v2033_v62, %v6919_v40  ;;  %v1982_v10 = vpop.xlane.xlu0 %1981 }
 0x442   :  { %v5256_v2 = vrot.slane %v1982_v10, %v10975_v58 }
 0x443   :  { %v10758_v54 = vsel %vm2871_vm5, %v5340_v63, %v5336_v9  ;;  %v5193_v9 = vsel %vm2885_vm7, %v5192_v41, %v5188_v51 }
 0x444   :  { %v10761_v8 = vsel %vm2864_vm4, %v5256_v2, %v5252_v48  ;;  %v1946_v50 = vpop.xlane.xlu1 %1945  ;;  %vm10995_vm4 = vmmov %vm10991_vm1 }
 0x445   :  { %v10763_v1 = vpop.xlane.xlu0 %1894  ;;  %v5197_v15 = vrot.slane %v1946_v50, %v6974_v13 }
 0x447   :  { %v5198_v62 = vsel %vm10991_vm1, %v5197_v15, %v5193_v9 }
 0x448   :  { %v10765_v4 = vpop.xlane.xlu1 %2035 }
 0x449   :  { %v10767_v39 = vpop.xlane.xlu0 %1984 }
 0x44a   :  { %v5261_v41 = vrot.slane %v10767_v39, %v6919_v40 }
 0x44c   :  { %v1949_v11 = vpop.xlane.xlu1 %1948 }
 0x44d   :  { %v10769_v22 = vpop.xlane.xlu0 %1897  ;;  %v5202_v20 = vrot.slane %v1949_v11, %v6962_v7 }
 0x44f   :  { %v5203_v63 = vsel %vm2899_vm9, %v5202_v20, %v5198_v62 }
 0x450   :  { %v10771_v6 = vpop.xlane.xlu1 %2038 }
 0x451   :  { %v10773_v16 = vpop.xlane.xlu0 %1987 }
 0x454   :  { %v1952_v58 = vpop.xlane.xlu1 %1951 }
 0x455   :  { %v10775_v21 = vpop.xlane.xlu0 %1900  ;;  %v5207_v3 = vrot.slane %v1952_v58, %v6994_v29  ;;  %v5113_v58 = vrot.slane %v10763_v1, %v6941_v56 }
 0x457   :  { %v5208_v50 = vsel %vm10992_vm2, %v5207_v3, %v5203_v63 }
 0x458   :  { %v10777_v45 = vpop.xlane.xlu1 %2041 }
 0x459   :  { %v10779_v27 = vpop.xlane.xlu0 %1990  ;;  %v5355_v51 = vrot.slane %v10777_v45, %v6974_v13  ;;  %v5262_v45 = vsel %vm2871_vm5, %v5261_v41, %v10761_v8  ;;  %vm10998_vm5 = vmmov %vm10991_vm1 }
 0x45a   :  { %v5271_v9 = vrot.slane %v10779_v27, %v6941_v56  ;;  %vm11002_vm1 = vmmov %vm10993_vm3 }
 0x45b   :  { %vm11003_vm2 = vmmov %vm11002_vm1 }
 0x45c   :  { %v1955_v14 = vpop.xlane.xlu1 %1954  ;;  %v6112_v5 = vpop.f32.mrb[2].mxu0 }
 0x45d   :  { %v10781_v19 = vpop.xlane.xlu0 %1903  ;;  %v6113_v55 = vpop.f32.mrb[3].mxu0  ;;  %v5212_v48 = vrot.slane %v1955_v14, %v6982_v23 }
 0x45e   :  { %v6114_v12 = vadd.f32 %v6113_v55, %v6112_v5 }
 0x45f   :  { %v5213_v14 = vsel %vm2913_vm11, %v5212_v48, %v5208_v50 }
 0x460   :  { %v5632_v17 = vadd.f32 %v6114_v12, %v10351_v53  ;;  %v10784_v25 = vpop.xlane.xlu1 %2044  ;;  %v5118_v12 = vrot.slane %v10769_v22, %v6974_v13  ;;  %v5128_v22 = vrot.slane %v10781_v19, %v6994_v29  ;;  %v5266_v19 = vrot.slane %v10773_v16, %v6944_v57 }
 0x461   :  { %v10786_v35 = vpop.xlane.xlu0 %1993  ;;  %v5360_v8 = vrot.slane %v10784_v25, %v6962_v7 }
 0x462   :  { %v5276_v48 = vrot.slane %v10786_v35, %v6974_v13 }
 0x464   :  { %v1958_v36 = vpop.xlane.xlu1 %1957 }
 0x465   :  { %v10788_v37 = vpop.xlane.xlu0 %1906  ;;  %v6147_v0 = vpop.f32.mrb[2].mxu1  ;;  %v5217_v43 = vrot.slane %v1958_v36, %v7002_v42 }
 0x466   :  { %v6148_v24 = vpop.f32.mrb[3].mxu1 }
 0x467   :  { %v6149_v60 = vadd.f32 %v6148_v24, %v6147_v0  ;;  %v5218_v5 = vsel %vm10993_vm3, %v5217_v43, %v5213_v14  ;;  %v5109_v0 = vsel %vm2878_vm6, %v5108_v44, %v10747_v47  ;;  %v5123_v24 = vrot.slane %v10775_v21, %v6962_v7 }
 0x468   :  { %v10790_v34 = vpop.xlane.xlu1 %2047  ;;  %v5350_v47 = vrot.slane %v10771_v6, %v6941_v56  ;;  %v5133_v21 = vrot.slane %v10788_v37, %v6982_v23 }
 0x469   :  { %v10792_v30 = vadd.f32 %v6149_v60, %v5632_v17  ;;  %v10794_v28 = vpop.xlane.xlu0 %1996  ;;  %v5114_v60 = vsel %vm2885_vm7, %v5113_v58, %v5109_v0  ;;  %v5365_v50 = vrot.slane %v10790_v34, %v6994_v29 }
 0x46a   :  { %v5281_v56 = vrot.slane %v10794_v28, %v6962_v7 }
 0x46c   :  { %v1961_v32 = vpop.xlane.xlu1 %1960 }
 0x46d   :  { %v10796_v31 = vpop.xlane.xlu0 %1909  ;;  %v5222_v10 = vrot.slane %v1961_v32, %v7008_v46  ;;  %v5345_v32 = vrot.slane %v10765_v4, %v6944_v57  ;;  %v5119_v4 = vsel %vm10995_vm4, %v5118_v12, %v5114_v60 }
 0x46e   :  { %v5138_v40 = vrot.slane %v10796_v31, %v7002_v42  ;;  %v5124_v6 = vsel %vm2899_vm9, %v5123_v24, %v5119_v4  ;;  %v11005_v4 = vld [vmem:[#allocation15_spill] sm:$0xff] }
 0x46f   :  { %v5223_v17 = vsel %vm2927_vm13, %v5222_v10, %v5218_v5  ;;  %v5346_v3 = vsel %vm2878_vm6, %v5345_v32, %v10758_v54  ;;  %v5129_v57 = vsel %vm10986_vm0, %v5128_v22, %v5124_v6  ;;  %v5267_v54 = vsel %vm2878_vm6, %v5266_v19, %v5262_v45  ;;  %vm11000_vm6 = vmmov %vm10986_vm0 }
 0x470   :  { %v10798_v53 = vpop.xlane.xlu1 %2050  ;;  %v5351_v31 = vsel %vm2885_vm7, %v5350_v47, %v5346_v3  ;;  %v5272_v44 = vsel %vm2885_vm7, %v5271_v9, %v5267_v54  ;;  %vm11001_vm7 = vmmov %vm10986_vm0 }
 0x471   :  { %v10800_v18 = vpop.xlane.xlu0 %1999  ;;  %v5356_v43 = vsel %vm10996_vm10, %v5355_v51, %v5351_v31  ;;  %v5277_v58 = vsel %vm10998_vm5, %v5276_v48, %v5272_v44  ;;  %v5370_v7 = vrot.slane %v10798_v53, %v6982_v23 }
 0x472   :  { %v5286_v10 = vrot.slane %v10800_v18, %v6994_v29  ;;  %v5282_v5 = vsel %vm2899_vm9, %v5281_v56, %v5277_v58 }
 0x474   :  { %v1964_v26 = vpop.xlane.xlu1 %1963 }
 0x475   :  { %v1913_v49 = vpop.xlane.xlu0 %1912  ;;  %v5227_v11 = vrot.slane %v1964_v26, %v7022_v59  ;;  %v10994_v26 = vld [vmem:[#allocation13_spill] sm:$0xff] }
 0x476   :  { %v5143_v37 = vrot.slane %v1913_v49, %v7008_v46  ;;  %v5134_v49 = vsel %vm2913_vm11, %v5133_v21, %v5129_v57 }
 0x477   :  { %v5228_v1 = vsel %vm2934_vm14, %v5227_v11, %v5223_v17  ;;  %v5139_v27 = vsel %vm10997_vm8, %v5138_v40, %v5134_v49  ;;  %v5361_v17 = vsel %vm2899_vm9, %v5360_v8, %v5356_v43  ;;  %v6009_v43 = vld [vmem:[%s10939_s2] ss:$0 sm:$0xff] }
 0x478   :  { %v10813_v52 = vpop.xlane.xlu1 %2053  ;;  %v5144_v13 = vsel %vm2927_vm13, %v5143_v37, %v5139_v27 }
 0x479   :  { %v10817_v2 = vpop.xlane.xlu0 %2002  ;;  %v5375_v29 = vrot.slane %v10813_v52, %v7002_v42 }
 0x47a   :  { %v5291_v28 = vrot.slane %v10817_v2, %v6982_v23  ;;  %v5287_v23 = vsel %vm11000_vm6, %v5286_v10, %v5282_v5 }
 0x47c   :  { %v1967_v55 = vpop.xlane.xlu1 %1966  ;;  %v5292_v0 = vsel %vm2913_vm11, %v5291_v28, %v5287_v23 }
 0x47d   :  { %v5232_v36 = vrot.slane %v1967_v55, %v7027_v61  ;;  %v1916_v33 = vpop.xlane.xlu0 %1915  ;;  %v10999_v55 = vld [vmem:[#allocation12_spill] sm:$0xff] }
 0x47e   :  { %v5148_v16 = vrot.slane %v1916_v33, %v7022_v59  ;;  %v5366_v33 = vsel %vm11001_vm7, %v5365_v50, %v5361_v17 }
 0x47f   :  { %v5233_v38 = vsel %vm2941_vm15, %v5232_v36, %v5228_v1  ;;  %v5371_v52 = vsel %vm2913_vm11, %v5370_v7, %v5366_v33 }
 0x480   :  { %v2057_v15 = vpop.xlane.xlu1 %2056  ;;  %v5406_v20 = vsel %vm5392_vm12, %v5233_v38, %v10994_v26  ;;  %v5149_v11 = vsel %vm2934_vm14, %v5148_v16, %v5144_v13  ;;  %v5376_v60 = vsel %vm11003_vm2, %v5375_v29, %v5371_v52  ;;  %v11004_v26 = vld [vmem:[#allocation14_spill] sm:$0xff] }
 0x481   :  { %v2006_v39 = vpop.xlane.xlu0 %2005  ;;  %5909 = vmatprep.mubr.f32.mxu0 %v5406_v20  ;;  %v5380_v53 = vrot.slane %v2057_v15, %v7008_v46 }
 0x482   :  { %v5296_v25 = vrot.slane %v2006_v39, %v7002_v42 }
 0x483   :  { %v5381_v38 = vsel %vm2927_vm13, %v5380_v53, %v5376_v60 }
 0x484   :  { %v2009_v62 = vpop.xlane.xlu1 %2008  ;;  %v5297_v24 = vsel %vm11002_vm1, %v5296_v25, %v5292_v0 }
 0x485   :  { %v1919_v63 = vpop.xlane.xlu0 %1918  ;;  %v5301_v34 = vrot.slane %v2009_v62, %v7008_v46 }
 0x486   :  { %v5153_v35 = vrot.slane %v1919_v63, %v7027_v61 }
 0x487   :  { %v5302_v32 = vsel %vm2927_vm13, %v5301_v34, %v5297_v24 }
 0x488   :  { %v5154_v18 = vsel %vm2941_vm15, %v5153_v35, %v5149_v11  ;;  %v2012_v14 = vpop.xlane.xlu1 %2011 }
 0x489   :  { %v2060_v2 = vpop.xlane.xlu0 %2059  ;;  %v5405_v12 = vsel %vm5392_vm12, %v5154_v18, %v10999_v55  ;;  %v5306_v36 = vrot.slane %v2012_v14, %v7022_v59 }
 0x48a   :  { %5910 = vmatmul.mubr.f32.vlgmr.msra.gmra.mrb[6].mxu0 %v5405_v12  ;;  %v5385_v42 = vrot.slane %v2060_v2, %v7022_v59 }
 0x48b   :  { %v5307_v41 = vsel %vm2934_vm14, %v5306_v36, %v5302_v32 }
 0x48c   :  { %v2015_v1 = vpop.xlane.xlu1 %2014  ;;  %v5386_v59 = vsel %vm2934_vm14, %v5385_v42, %v5381_v38 }
 0x48d   :  { %v5311_v46 = vrot.slane %v2015_v1, %v7027_v61  ;;  %v2063_v22 = vpop.xlane.xlu0 %2062 }
 0x48e   :  { %v5390_v47 = vrot.slane %v2063_v22, %v7027_v61 }
 0x48f   :  { %v5312_v21 = vsel %vm2941_vm15, %v5311_v46, %v5307_v41 }
 0x490   :  { %v5391_v15 = vsel %vm2941_vm15, %v5390_v47, %v5386_v59  ;;  %v5407_v20 = vsel %vm5392_vm12, %v5312_v21, %v11004_v26 }
 0x491   :  { %v5408_v19 = vsel %vm5392_vm12, %v5391_v15, %v11005_v4 }
 0x492   :  { %5979 = vmatprep.mubr.f32.mxu1 %v5408_v19 }
 0x493   :  { %5980 = vmatmul.mubr.f32.vlgmr.msra.gmra.mrb[6].mxu1 %v5407_v20 }
 0x4dd   :  { %v6182_v51 = vpop.f32.mrb[4].mxu0 }
 0x4de   :  { %v6183_v40 = vpop.f32.mrb[5].mxu0 }
 0x4df   :  { %v6184_v39 = vadd.f32 %v6183_v40, %v6182_v51 }
 0x4e1   :  { %v5772_v6 = vadd.f32 %v6184_v39, %v10792_v30 }
 0x4e6   :  { %v6217_v61 = vpop.f32.mrb[4].mxu1 }
 0x4e7   :  { %v6218_v37 = vpop.f32.mrb[5].mxu1 }
 0x4e8   :  { %v6219_v3 = vadd.f32 %v6218_v37, %v6217_v61 }
 0x4ea   :  { %v5842_v9 = vadd.f32 %v6219_v3, %v5772_v6 }
 0x55d   :  { %v6252_v57 = vpop.f32.mrb[6].mxu0 }
 0x55e   :  { %v6253_v16 = vpop.f32.mrb[7].mxu0 }
 0x55f   :  { %v6254_v45 = vadd.f32 %v6253_v16, %v6252_v57 }
 0x561   :  { %v5912_v31 = vadd.f32 %v6254_v45, %v5842_v9 }
 0x566   :  { %v6287_v48 = vpop.f32.mrb[6].mxu1 }
 0x567   :  { %v6288_v49 = vpop.f32.mrb[7].mxu1 }
 0x568   :  { %v6289_v62 = vadd.f32 %v6288_v49, %v6287_v48 }
 0x56a   :  { %v5982_v54 = vadd.f32 %v6289_v62, %v5912_v31 }
 0x56c   :  { %v5985_v56 = vmul.f32 0.0625, %v5982_v54 }
 0x56e   :  { %v5993_v30 = vadd.f32 %v6009_v43, %v5985_v56 }
 0x570   :  { %5994 = vst [vmem:[#allocation2] sm:$0x3] %v5993_v30 }
 0x571   :  { %6558 = shalt.err (!%p6555_p4)
}
 0x572   :  { %s6559_s10 = scalar_lea.hbm %s10940_s3, 32 }
 0x573   :  { %p6560_p5 = scmp.ne.s32.totalorder %s10940_s3, %s6559_s10  ;;  %p6563_p6 = scmp.lt.u32.totalorder %s6559_s10, %s10940_s3 }
 0x575   :  { %p6565_p7 = pnand %p6563_p6, %p6560_p5 }
 0x577   :  { %6568 = shalt.err (!%p6565_p7)
}
 0x578   :  { %6004 = dma.vmem_to_hbm [thread:$0]  %s6002_s6, 32, %s10940_s3, [#allocation3]  }
 0x579   :  { %6569 = dma.done.wait [#allocation3], 32  }
 0x57a   :  { %6570 = vsyncadd [#allocation3], 4294967264 }
 0x57b   :  { %6008 = vsyncpa [#allocation3], 1 }

</bundles_post_ra>
